<compile_context>
chip_gen: v6e
topology: v6e:2x2x1
jax: 0.10.0
libtpu: 0.0.40
codegen_flags: <defaults>
</compile_context>

<pallas_src>
import functools

import jax
import jax.numpy as jnp
from jax.experimental import pallas as pl
from jax.experimental.pallas import tpu as pltpu


# ----------------------------------------------------------------------------
# Pallas kernels
# ----------------------------------------------------------------------------
def _stem_kernel(w_ref, x_ref, b_ref, o_ref, *, relu_rows):
    # w: (Cout_tot, Q) bf16, x: (Q, TL) bf16, b: (Cout_tot, 1) f32, o: (Cout_tot, TL) f32
    acc = jnp.dot(w_ref[...], x_ref[...], preferred_element_type=jnp.float32) + b_ref[...]
    # static row split: conv00 rows -> ReLU (VPU), offset rows -> tanh (EUP only on 4K rows)
    o_ref[:relu_rows, :] = jnp.maximum(acc[:relu_rows, :], 0.0)
    o_ref[relu_rows:, :] = jnp.tanh(acc[relu_rows:, :])


def _conv1_kernel(w_ref, x_ref, r_ref, s_ref, o_ref):
    # conv1 + ReLU, then single-FMA epilogue: relu(acc)*bn_scale + (residual*scale+shift)
    acc = jnp.dot(w_ref[...], x_ref[...], preferred_element_type=jnp.float32)
    o_ref[...] = jnp.maximum(acc, 0.0) * s_ref[...] + r_ref[...]


def _dsconv_tail_kernel(fc_ref, feat_ref, sel_ref, wf_ref, b_ref, g_ref, gb_ref, o_ref,
                        *, morph, K, C, Wd, Hd, groups, eps):
    # fc_ref  : (1, K, P) f32   fractional-axis snake coordinates for this batch
    # feat_ref: (C*Wd, Hd) bf16 feature slab of batch 0 (reference's base-index bug)
    # sel_ref : morph 0 -> (Hd, K*P) constant 0/1 column-shift one-hot (exact in bf16)
    #           morph 1 -> (Wd, K*P) constant 0/1 row-shift one-hot
    # wf_ref  : (K, C, C*Wd) bf16 dsc conv weight pre-folded with the block-diagonal
    #           w'-reduction: wf[k, co, ci*Wd + w'] = W[co, ci, k]
    # b/g/gb  : (C, 1) f32 dsc bias / GroupNorm gamma / beta
    # o_ref   : (1, C, P) f32
    P = Wd * Hd
    A = feat_ref[...]                                                  # (C*Wd, Hd) bf16
    fc = fc_ref[0]                                                     # (K, P) f32
    frac_max = float(Wd) if morph == 0 else float(Hd)

    if morph == 0:
        # Batched constant column gather (integer axis): ONE bf16 MXU matmul for all K.
        # TMP[ci*Wd+w', k*P+p] = feat[ci, w', h_p + k - c]  (exact bf16 values; 0 out of range)
        TMP = jnp.dot(A, sel_ref[...], preferred_element_type=jnp.float32)   # (C*Wd, K*P)
        iota = jax.lax.broadcasted_iota(jnp.int32, (Wd, P), 0)        # feature-row index
    else:
        iota = jax.lax.broadcasted_iota(jnp.int32, (Hd, P), 0)        # feature-col index

    z = jnp.zeros((C, P), jnp.float32)
    for k in range(K):
        t = fc[k:k + 1, :]                                             # (1, P) fractional coord
        t0 = jnp.floor(t)
        t1 = t0 + 1.0
        # gather indices clamp to [0, max-1]; interp weights clamp to [0, max] (reference)
        i0 = jnp.clip(t0, 0.0, frac_max - 1.0).astype(jnp.int32)
        i1 = jnp.clip(t1, 0.0, frac_max - 1.0).astype(jnp.int32)
        w0 = jnp.clip(t1, 0.0, frac_max) - t                           # (1, P) f32
        w1 = t - jnp.clip(t0, 0.0, frac_max)

        # 0/1 one-hots along the fractional axis: channel-independent, exact in bf16
        S0 = (iota == i0).astype(jnp.bfloat16)
        S1 = (iota == i1).astype(jnp.bfloat16)

        wk = wf_ref[k]                                                 # (C, C*Wd) bf16

        if morph == 0:
            Tk = TMP[:, k * P:(k + 1) * P].astype(jnp.bfloat16)        # exact bf16 values
            M0 = jnp.broadcast_to(S0[None], (C, Wd, P)).reshape(C * Wd, P)
            M1 = jnp.broadcast_to(S1[None], (C, Wd, P)).reshape(C * Wd, P)
            u0 = jnp.dot(wk, Tk * M0, preferred_element_type=jnp.float32)   # (C, P)
            u1 = jnp.dot(wk, Tk * M1, preferred_element_type=jnp.float32)
        else:
            # data-dependent column gathers as bf16 0/1-one-hot MXU matmuls (f32 accumulate)
            G0 = jnp.dot(A, S0, preferred_element_type=jnp.float32).astype(jnp.bfloat16)
            G1 = jnp.dot(A, S1, preferred_element_type=jnp.float32).astype(jnp.bfloat16)
            Rk = sel_ref[:, k * P:(k + 1) * P]                         # (Wd, P) bf16 constant
            M = jnp.broadcast_to(Rk[None], (C, Wd, P)).reshape(C * Wd, P)
            u0 = jnp.dot(wk, G0 * M, preferred_element_type=jnp.float32)
            u1 = jnp.dot(wk, G1 * M, preferred_element_type=jnp.float32)

        # fractional bilinear weights applied on the VPU in f32 (no bf16 rounding of them)
        z = z + w0 * u0 + w1 * u1

    z = z + b_ref[...]

    # GroupNorm (two-pass: mean, then centered variance) + affine + ReLU
    cg = C // groups
    n = float(cg * P)
    pieces = []
    for g in range(groups):
        zg = z[g * cg:(g + 1) * cg, :]
        m = jnp.sum(zg, axis=(0, 1), keepdims=True) / n
        zc = zg - m
        var = jnp.sum(zc * zc, axis=(0, 1), keepdims=True) / n
        pieces.append(zc * jax.lax.rsqrt(var + eps))
    zn = pieces[0] if groups == 1 else jnp.concatenate(pieces, axis=0)
    o_ref[0] = jnp.maximum(zn * g_ref[...] + gb_ref[...], 0.0)


# ----------------------------------------------------------------------------
# Glue helpers (padding / im2col / constant builders only)
# ----------------------------------------------------------------------------
def _pick_sp_tile(HW, B):
    """Lane tile dividing H*W; prefer the largest tile that still gives >=4 grid steps."""
    cands = [t for t in (1024, 512, 256, 128) if HW % t == 0]
    for t in cands:
        if B * (HW // t) >= 4:
            return t
    if cands:
        return cands[-1]      # smallest dividing tile -> most steps
    return HW                 # irregular spatial size: one full-row block per batch


def _im2col_bqhw(x, KH, KW):
    """x (B, Cin, H, W) -> patches (B, KH*KW*Cin, H*W), q = (kh*KW+kw)*Cin + ci."""
    B, Cin, H, W = x.shape
    xp = jnp.pad(x, ((0, 0), (0, 0), (1, 1), (1, 1)))
    cols = []
    for i in range(KH):
        for j in range(KW):
            cols.append(jax.lax.slice(xp, (0, 0, i, j), (B, Cin, i + H, j + W)))
    return jnp.concatenate(cols, axis=1).reshape(B, KH * KW * Cin, H * W)


def _make_shift_onehot(K, Wd, Hd, morph, dtype=jnp.bfloat16):
    """Constant 0/1 integer-axis selection: morph0 -> (Hd, K*P) cols, morph1 -> (Wd, K*P) rows.
    Out-of-range taps get an all-zero column, reproducing the reference's weight cancellation."""
    center = K // 2
    P = Wd * Hd
    p = jnp.arange(P, dtype=jnp.int32)
    if morph == 0:
        pos, n = p % Hd, Hd            # column index h_p
    else:
        pos, n = p // Hd, Wd           # row index w_p
    offs = jnp.arange(K, dtype=jnp.int32) - center
    tgt = pos[None, :] + offs[:, None]                                  # (K, P)
    valid = (tgt >= 0) & (tgt < n)
    oh = (jnp.arange(n, dtype=jnp.int32)[:, None, None] == tgt[None]) & valid[None]
    return oh.astype(dtype).reshape(n, K * P)                           # col index = k*P + p


def _fold_dsc_weight(dsc_w, morph, K, C, Wd, dtype=jnp.bfloat16):
    """dsc conv weight folded with the block-diagonal w'-reduction -> (K, C, C*Wd)."""
    wk = dsc_w[:, :, :, 0] if morph == 0 else dsc_w[:, :, 0, :]         # (Co, Ci, K)
    wk = jnp.transpose(wk, (2, 0, 1))                                   # (K, Co, Ci)
    return jnp.broadcast_to(wk[:, :, :, None], (K, C, C, Wd)).reshape(K, C, C * Wd).astype(dtype)


def snake_coords(off, morph, K, extend_scope, Wd, Hd, if_offset=True):
    """Exact reproduction of DSC._coordinate_map_3D as (B, K, Wd*Hd) coords [b, k, w*Hd+h]."""
    B = off.shape[0]
    center = K // 2
    y_off, x_off = off[:, :K], off[:, K:]

    def cum(o):   # cumulative-offset loop from the reference (empty body for K=3)
        new = o
        new = new.at[:, center].set(0.0)
        for idx in range(1, center):
            new = new.at[:, center + idx].set(new[:, center + idx - 1] + o[:, center + idx])
            new = new.at[:, center - idx].set(new[:, center - idx + 1] + o[:, center - idx])
        return new

    w_idx = jnp.arange(Wd, dtype=jnp.float32)[None, None, :, None]
    h_idx = jnp.arange(Hd, dtype=jnp.float32)[None, None, None, :]
    k_idx = (jnp.arange(K, dtype=jnp.float32) - center)[None, :, None, None]
    if morph == 0:
        y_new = jnp.broadcast_to(w_idx, (B, K, Wd, Hd))
        x_new = jnp.broadcast_to(h_idx + k_idx, (B, K, Wd, Hd))
        if if_offset:
            y_new = y_new + extend_scope * cum(y_off)
    else:
        y_new = jnp.broadcast_to(w_idx + k_idx, (B, K, Wd, Hd))
        x_new = jnp.broadcast_to(h_idx, (B, K, Wd, Hd))
        if if_offset:
            x_new = x_new + extend_scope * cum(x_off)
    return y_new.reshape(B, K, Wd * Hd), x_new.reshape(B, K, Wd * Hd)


# ----------------------------------------------------------------------------
# pallas_call wrappers
# ----------------------------------------------------------------------------
def fused_stem_conv(x, w_stem, b_stem, relu_rows):
    """Fused conv00 + both offset convs; returns (B, Cout_tot, H*W) f32 (native layout)."""
    B, Cin, H, W = x.shape
    Cout = w_stem.shape[0]
    HW = H * W
    Q = 9 * Cin
    pat = _im2col_bqhw(x.astype(jnp.bfloat16), 3, 3)                    # (B, Q, HW) bf16
    wm = jnp.transpose(w_stem, (0, 2, 3, 1)).reshape(Cout, Q).astype(jnp.bfloat16)
    b2 = b_stem.reshape(Cout, 1).astype(jnp.float32)
    TL = _pick_sp_tile(HW, B)
    nsp = HW // TL
    cost = pl.CostEstimate(flops=2 * Cout * Q * B * HW,
                           transcendentals=(Cout - relu_rows) * B * HW,
                           bytes_accessed=pat.size * 2 + wm.size * 2 + B * Cout * HW * 4)
    return pl.pallas_call(
        functools.partial(_stem_kernel, relu_rows=relu_rows),
        out_shape=jax.ShapeDtypeStruct((B, Cout, HW), jnp.float32),
        grid=(B, nsp),
        in_specs=[
            pl.BlockSpec((Cout, Q), lambda b, s: (0, 0)),
            pl.BlockSpec((None, Q, TL), lambda b, s: (b, 0, s)),
            pl.BlockSpec((Cout, 1), lambda b, s: (0, 0)),
        ],
        out_specs=pl.BlockSpec((None, Cout, TL), lambda b, s: (b, 0, s)),
        compiler_params=pltpu.CompilerParams(dimension_semantics=("parallel", "parallel")),
        cost_estimate=cost,
    )(wm, pat, b2)


def conv1_residual_bn(cat, conv1_w, x_res, scale, shift):
    """conv1 (3x3, ReLU) + residual add + shortcut-BN, native (B, C, H*W) layouts."""
    B, Cin, H, W = cat.shape
    Cout = conv1_w.shape[0]
    HW = H * W
    Q = 9 * Cin
    pat = _im2col_bqhw(cat.astype(jnp.bfloat16), 3, 3)                  # (B, Q, HW) bf16
    wm = jnp.transpose(conv1_w, (0, 2, 3, 1)).reshape(Cout, Q).astype(jnp.bfloat16)
    s2 = scale.reshape(Cout, 1).astype(jnp.float32)
    # bn_shortcut(x1 + x) = relu(conv1)*scale + (x*scale + shift); precombine the residual part
    rst = (x_res.reshape(B, Cout, HW) * scale.reshape(1, Cout, 1)
           + shift.reshape(1, Cout, 1)).astype(jnp.float32)
    TL = _pick_sp_tile(HW, B)
    nsp = HW // TL
    cost = pl.CostEstimate(flops=2 * Cout * Q * B * HW, transcendentals=0,
                           bytes_accessed=pat.size * 2 + rst.size * 4 + B * Cout * HW * 4)
    out = pl.pallas_call(
        _conv1_kernel,
        out_shape=jax.ShapeDtypeStruct((B, Cout, HW), jnp.float32),
        grid=(B, nsp),
        in_specs=[
            pl.BlockSpec((Cout, Q), lambda b, s: (0, 0)),
            pl.BlockSpec((None, Q, TL), lambda b, s: (b, 0, s)),
            pl.BlockSpec((None, Cout, TL), lambda b, s: (b, 0, s)),
            pl.BlockSpec((Cout, 1), lambda b, s: (0, 0)),
        ],
        out_specs=pl.BlockSpec((None, Cout, TL), lambda b, s: (b, 0, s)),
        compiler_params=pltpu.CompilerParams(dimension_semantics=("parallel", "parallel")),
        cost_estimate=cost,
    )(wm, pat, rst, s2)
    return out.reshape(B, Cout, H, W)


def dsconv_tail(frac_coords, feat0_bf16, sel_const, wfold, bias, gn_gamma, gn_beta,
                *, morph, K, C, Wd, Hd, groups, eps=1e-5):
    """Fused snake bilinear sampling + dsc conv + GroupNorm + ReLU; grid over batch."""
    B = frac_coords.shape[0]
    P = Wd * Hd
    # rough VMEM footprint of the biggest live set; raise the scoped limit only when needed
    est = (C * Wd * K * P * 4 + 6 * C * Wd * P * 4
           + sel_const.size * 2 + feat0_bf16.size * 2 + wfold.size * 2 + 4 * C * P * 4)
    cp = dict(dimension_semantics=("parallel",))
    if est > (24 << 20):
        cp["vmem_limit_bytes"] = int(min(2 * est, 96 << 20))
    return pl.pallas_call(
        functools.partial(_dsconv_tail_kernel, morph=morph, K=K, C=C, Wd=Wd, Hd=Hd,
                          groups=groups, eps=eps),
        out_shape=jax.ShapeDtypeStruct((B, C, P), jnp.float32),
        grid=(B,),
        in_specs=[
            pl.BlockSpec((1, K, P), lambda b: (b, 0, 0)),
            pl.BlockSpec(feat0_bf16.shape, lambda b: (0, 0)),
            pl.BlockSpec(sel_const.shape, lambda b: (0, 0)),
            pl.BlockSpec(wfold.shape, lambda b: (0, 0, 0)),
            pl.BlockSpec((C, 1), lambda b: (0, 0)),
            pl.BlockSpec((C, 1), lambda b: (0, 0)),
            pl.BlockSpec((C, 1), lambda b: (0, 0)),
        ],
        out_specs=pl.BlockSpec((1, C, P), lambda b: (b, 0, 0)),
        compiler_params=pltpu.CompilerParams(**cp),
    )(frac_coords, feat0_bf16, sel_const, wfold,
      bias.reshape(C, 1).astype(jnp.float32),
      gn_gamma.reshape(C, 1).astype(jnp.float32),
      gn_beta.reshape(C, 1).astype(jnp.float32))


# ----------------------------------------------------------------------------
# DSC3Block forward
# ----------------------------------------------------------------------------
def dsc3block_forward(x, params, K=3, extend_scope=1.0, if_offset=True):
    eps = 1e-5
    x = x.astype(jnp.float32)
    B, C, H, W = x.shape
    Wd, Hd = H, W                      # DSC naming: width = dim2, height = dim3
    HW = H * W

    # fold offset-conv eval-BatchNorm into weights; fuse conv00 + both offset convs
    def fold(pd):
        s = pd["bn_gamma"] / jnp.sqrt(pd["bn_rv"] + eps)
        return pd["off_w"] * s[:, None, None, None], (pd["off_b"] - pd["bn_rm"]) * s + pd["bn_beta"]

    wx_eff, bx_eff = fold(params["dsx"])
    wy_eff, by_eff = fold(params["dsy"])
    w_stem = jnp.concatenate([params["conv00_w"], wx_eff, wy_eff], axis=0)
    b_stem = jnp.concatenate([jnp.zeros((C,), jnp.float32), bx_eff, by_eff], axis=0)

    stem = fused_stem_conv(x, w_stem, b_stem, relu_rows=C)        # (B, C+4K, HW) f32
    x00 = stem[:, :C, :].reshape(B, C, H, W)
    off_x = stem[:, C:C + 2 * K, :].reshape(B, 2 * K, H, W)
    off_y = stem[:, C + 2 * K:, :].reshape(B, 2 * K, H, W)

    # NOTE: reproduces the reference's base-index bug — all batches sample batch 0.
    feat0 = x[0].reshape(C * Wd, Hd).astype(jnp.bfloat16)         # row = ci*Wd + w

    def branch(off, pd, morph):
        yc, xc = snake_coords(off, morph, K, extend_scope, Wd, Hd, if_offset)
        fc = yc if morph == 0 else xc                             # fractional-axis coords only
        sel = _make_shift_onehot(K, Wd, Hd, morph)
        wf = _fold_dsc_weight(pd["dsc_w"], morph, K, C, Wd)
        out = dsconv_tail(fc, feat0, sel, wf, pd["dsc_b"], pd["gn_gamma"], pd["gn_beta"],
                          morph=morph, K=K, C=C, Wd=Wd, Hd=Hd, groups=C // 4)
        return out.reshape(B, C, H, W)

    x0x = branch(off_x, params["dsx"], 0)
    x0y = branch(off_y, params["dsy"], 1)

    cat = jnp.concatenate([x00, x0x, x0y], axis=1)
    scale = params["bns_gamma"] / jnp.sqrt(params["bns_rv"] + eps)
    shift = params["bns_beta"] - params["bns_rm"] * scale
    return conv1_residual_bn(cat, params["conv1_w"], x, scale, shift)   # bn_shortcut(x1 + x)


# ----------------------------------------------------------------------------
# Deterministic parameter init (shapes from DSC3Block.__init__)
# ----------------------------------------------------------------------------
def init_params(key, C, K):
    ks = iter(jax.random.split(key, 64))

    def nrm(shape, s=0.1):
        return s * jax.random.normal(next(ks), shape, jnp.float32)

    def dsconv_params(dsc_w_shape):
        return dict(
            off_w=nrm((2 * K, C, 3, 3)),
            off_b=nrm((2 * K,)),
            bn_gamma=1.0 + nrm((2 * K,)),
            bn_beta=nrm((2 * K,)),
            bn_rm=nrm((2 * K,)),
            bn_rv=1.0 + jnp.abs(nrm((2 * K,))),
            dsc_w=nrm(dsc_w_shape),
            dsc_b=nrm((C,)),
            gn_gamma=1.0 + nrm((C,)),
            gn_beta=nrm((C,)),
        )

    return dict(
        conv00_w=nrm((C, C, 3, 3)),
        conv1_w=nrm((C, 3 * C, 3, 3)),
        dsx=dsconv_params((C, C, K, 1)),   # dsc_conv_x: kernel (K,1), stride (K,1)
        dsy=dsconv_params((C, C, 1, K)),   # dsc_conv_y: kernel (1,K), stride (1,K)
        bns_gamma=1.0 + nrm((C,)),
        bns_beta=nrm((C,)),
        bns_rm=nrm((C,)),
        bns_rv=1.0 + jnp.abs(nrm((C,))),
    )


if __name__ == "__main__":
    B, C, H, W = 2, 4, 16, 16   # in_ch == out_ch == 4 (divisible by 4 for GroupNorm)
    key = jax.random.PRNGKey(0)
    kx, kp = jax.random.split(key)
    x = jax.random.normal(kx, (B, C, H, W), jnp.float32)
    params = init_params(kp, C, K=3)

    fwd = jax.jit(dsc3block_forward)
    out = jax.block_until_ready(fwd(x, params))

    assert out.shape == (B, C, H, W), out.shape
    assert bool(jnp.all(jnp.isfinite(out)))
    print("KERNEL_OK")
</pallas_src>

<mosaic_0001>
module attributes {stable_mosaic.version = 11 : i64} {
  func.func @_stem_kernel(%arg0: i32, %arg1: i32, %arg2: memref<16x36xbf16, #tpu.memory_space<vmem>>, %arg3: memref<1x36x128xbf16, #tpu.memory_space<vmem>>, %arg4: memref<16x1xf32, #tpu.memory_space<vmem>>, %arg5: memref<1x16x128xf32, #tpu.memory_space<vmem>>) attributes {dimension_semantics = [#tpu.dimension_semantics<parallel>, #tpu.dimension_semantics<parallel>], iteration_bounds = array<i64: 2, 2>, scalar_prefetch = 0 : i64, scratch_operands = 0 : i64, tpu.core_type = #tpu.core_type<tc>, window_params = [{pipeline_mode = #tpu.pipeline_mode<synchronous>, transform_indices = @transform_0, window_bounds = array<i64: 16, 36>}, {transform_indices = @transform_1, window_bounds = array<i64: 1, 36, 128>}, {pipeline_mode = #tpu.pipeline_mode<synchronous>, transform_indices = @transform_2, window_bounds = array<i64: 16, 1>}, {transform_indices = @transform_3, window_bounds = array<i64: 1, 16, 128>}]} {
    %c0 = arith.constant 0 : index
    %c0_0 = arith.constant 0 : index
    %0 = vector.load %arg2[%c0, %c0_0] : memref<16x36xbf16, #tpu.memory_space<vmem>>, vector<16x36xbf16>
    %c0_1 = arith.constant 0 : index
    %c0_2 = arith.constant 0 : index
    %c0_3 = arith.constant 0 : index
    %1 = vector.load %arg3[%c0_1, %c0_2, %c0_3] : memref<1x36x128xbf16, #tpu.memory_space<vmem>>, vector<1x36x128xbf16>
    %2 = vector.shape_cast %1 : vector<1x36x128xbf16> to vector<36x128xbf16>
    %cst = arith.constant dense<0.000000e+00> : vector<16x128xf32>
    %3 = tpu.matmul %0, %2, %cst {dimension_numbers = #tpu.dot_dimension_numbers<[1], [0], [0], [1], [0, 0, 1, 1], [], []>} : vector<16x36xbf16>, vector<36x128xbf16>, vector<16x128xf32> -> vector<16x128xf32>
    %c0_4 = arith.constant 0 : index
    %c0_5 = arith.constant 0 : index
    %4 = vector.load %arg4[%c0_4, %c0_5] : memref<16x1xf32, #tpu.memory_space<vmem>>, vector<16x1xf32>
    %5 = vector.broadcast %4 : vector<16x1xf32> to vector<16x128xf32>
    %6 = arith.addf %3, %5 : vector<16x128xf32>
    %7 = vector.extract_strided_slice %6 {offsets = [0, 0], sizes = [4, 128], strides = [1, 1]} : vector<16x128xf32> to vector<4x128xf32>
    %cst_6 = arith.constant 0.000000e+00 : f32
    %8 = vector.broadcast %cst_6 : f32 to vector<4x128xf32>
    %9 = arith.maximumf %7, %8 : vector<4x128xf32>
    %c0_7 = arith.constant 0 : index
    %c0_8 = arith.constant 0 : index
    %c0_9 = arith.constant 0 : index
    %10 = vector.load %arg5[%c0_7, %c0_8, %c0_9] : memref<1x16x128xf32, #tpu.memory_space<vmem>>, vector<1x4x128xf32>
    %11 = vector.shape_cast %10 : vector<1x4x128xf32> to vector<4x128xf32>
    %12 = vector.shape_cast %9 : vector<4x128xf32> to vector<1x4x128xf32>
    tpu.vector_store %arg5[%c0_7, %c0_8, %c0_9], %12 {strides = array<i32>} : memref<1x16x128xf32, #tpu.memory_space<vmem>>, vector<1x4x128xf32>,
    %13 = vector.extract_strided_slice %6 {offsets = [4, 0], sizes = [12, 128], strides = [1, 1]} : vector<16x128xf32> to vector<12x128xf32>
    %14 = math.tanh %13 : vector<12x128xf32>
    %c0_10 = arith.constant 0 : index
    %c4 = arith.constant 4 : index
    %c0_11 = arith.constant 0 : index
    %15 = vector.load %arg5[%c0_10, %c4, %c0_11] : memref<1x16x128xf32, #tpu.memory_space<vmem>>, vector<1x12x128xf32>
    %16 = vector.shape_cast %15 : vector<1x12x128xf32> to vector<12x128xf32>
    %17 = vector.shape_cast %14 : vector<12x128xf32> to vector<1x12x128xf32>
    tpu.vector_store %arg5[%c0_10, %c4, %c0_11], %17 {strides = array<i32>} : memref<1x16x128xf32, #tpu.memory_space<vmem>>, vector<1x12x128xf32>,
    return
  }
  func.func @transform_0(%arg0: i32, %arg1: i32) -> (i32, i32) {
    %c0_i32 = arith.constant 0 : i32
    %c0_i32_0 = arith.constant 0 : i32
    %c0_i32_1 = arith.constant 0 : i32
    return %c0_i32, %c0_i32_0 : i32, i32
  }
  func.func @transform_1(%arg0: i32, %arg1: i32) -> (i32, i32, i32) {
    %c0_i32 = arith.constant 0 : i32
    %c0_i32_0 = arith.constant 0 : i32
    return %arg0, %c0_i32, %arg1 : i32, i32, i32
  }
  func.func @transform_2(%arg0: i32, %arg1: i32) -> (i32, i32) {
    %c0_i32 = arith.constant 0 : i32
    %c0_i32_0 = arith.constant 0 : i32
    %c0_i32_1 = arith.constant 0 : i32
    return %c0_i32, %c0_i32_0 : i32, i32
  }
  func.func @transform_3(%arg0: i32, %arg1: i32) -> (i32, i32, i32) {
    %c0_i32 = arith.constant 0 : i32
    %c0_i32_0 = arith.constant 0 : i32
    return %arg0, %c0_i32, %arg1 : i32, i32, i32
  }
}

module attributes {stable_mosaic.version = 11 : i64} {
  func.func @_dsconv_tail_kernel(%arg0: i32, %arg1: memref<1x3x256xf32, #tpu.memory_space<vmem>>, %arg2: memref<64x16xbf16, #tpu.memory_space<vmem>>, %arg3: memref<16x768xbf16, #tpu.memory_space<vmem>>, %arg4: memref<3x4x64xbf16, #tpu.memory_space<vmem>>, %arg5: memref<4x1xf32, #tpu.memory_space<vmem>>, %arg6: memref<4x1xf32, #tpu.memory_space<vmem>>, %arg7: memref<4x1xf32, #tpu.memory_space<vmem>>, %arg8: memref<1x4x256xf32, #tpu.memory_space<vmem>>) attributes {dimension_semantics = [#tpu.dimension_semantics<parallel>], iteration_bounds = array<i64: 2>, scalar_prefetch = 0 : i64, scratch_operands = 0 : i64, tpu.core_type = #tpu.core_type<tc>, window_params = [{transform_indices = @transform_0, window_bounds = array<i64: 1, 3, 256>}, {pipeline_mode = #tpu.pipeline_mode<synchronous>, transform_indices = @transform_1, window_bounds = array<i64: 64, 16>}, {pipeline_mode = #tpu.pipeline_mode<synchronous>, transform_indices = @transform_2, window_bounds = array<i64: 16, 768>}, {pipeline_mode = #tpu.pipeline_mode<synchronous>, transform_indices = @transform_3, window_bounds = array<i64: 3, 4, 64>}, {pipeline_mode = #tpu.pipeline_mode<synchronous>, transform_indices = @transform_4, window_bounds = array<i64: 4, 1>}, {pipeline_mode = #tpu.pipeline_mode<synchronous>, transform_indices = @transform_5, window_bounds = array<i64: 4, 1>}, {pipeline_mode = #tpu.pipeline_mode<synchronous>, transform_indices = @transform_6, window_bounds = array<i64: 4, 1>}, {transform_indices = @transform_7, window_bounds = array<i64: 1, 4, 256>}]} {
    %c0 = arith.constant 0 : index
    %c0_0 = arith.constant 0 : index
    %0 = vector.load %arg2[%c0, %c0_0] : memref<64x16xbf16, #tpu.memory_space<vmem>>, vector<64x16xbf16>
    %c0_1 = arith.constant 0 : index
    %c0_2 = arith.constant 0 : index
    %c0_3 = arith.constant 0 : index
    %1 = vector.load %arg1[%c0_1, %c0_2, %c0_3] : memref<1x3x256xf32, #tpu.memory_space<vmem>>, vector<1x3x256xf32>
    %2 = vector.shape_cast %1 : vector<1x3x256xf32> to vector<3x256xf32>
    %c0_4 = arith.constant 0 : index
    %c0_5 = arith.constant 0 : index
    %3 = vector.load %arg3[%c0_4, %c0_5] : memref<16x768xbf16, #tpu.memory_space<vmem>>, vector<16x768xbf16>
    %cst = arith.constant dense<0.000000e+00> : vector<64x768xf32>
    %4 = tpu.matmul %0, %3, %cst {dimension_numbers = #tpu.dot_dimension_numbers<[1], [0], [0], [1], [0, 0, 1, 1], [], []>} : vector<64x16xbf16>, vector<16x768xbf16>, vector<64x768xf32> -> vector<64x768xf32>
    %5 = tpu.iota {dimensions = array<i32: 0>} : vector<16x256xi32>
    %cst_6 = arith.constant 0.000000e+00 : f32
    %6 = vector.broadcast %cst_6 : f32 to vector<4x256xf32>
    %7 = vector.extract_strided_slice %2 {offsets = [0, 0], sizes = [1, 256], strides = [1, 1]} : vector<3x256xf32> to vector<1x256xf32>
    %8 = math.floor %7 : vector<1x256xf32>
    %cst_7 = arith.constant 1.000000e+00 : f32
    %9 = vector.broadcast %cst_7 : f32 to vector<1x256xf32>
    %10 = arith.addf %8, %9 : vector<1x256xf32>
    %cst_8 = arith.constant 0.000000e+00 : f32
    %cst_9 = arith.constant 1.500000e+01 : f32
    %11 = vector.broadcast %cst_8 : f32 to vector<1x256xf32>
    %12 = arith.maximumf %11, %8 : vector<1x256xf32>
    %13 = vector.broadcast %cst_9 : f32 to vector<1x256xf32>
    %14 = arith.minimumf %13, %12 : vector<1x256xf32>
    %15 = arith.fptosi %14 : vector<1x256xf32> to vector<1x256xi32>
    %cst_10 = arith.constant 0.000000e+00 : f32
    %cst_11 = arith.constant 1.500000e+01 : f32
    %16 = vector.broadcast %cst_10 : f32 to vector<1x256xf32>
    %17 = arith.maximumf %16, %10 : vector<1x256xf32>
    %18 = vector.broadcast %cst_11 : f32 to vector<1x256xf32>
    %19 = arith.minimumf %18, %17 : vector<1x256xf32>
    %20 = arith.fptosi %19 : vector<1x256xf32> to vector<1x256xi32>
    %cst_12 = arith.constant 0.000000e+00 : f32
    %cst_13 = arith.constant 1.600000e+01 : f32
    %21 = vector.broadcast %cst_12 : f32 to vector<1x256xf32>
    %22 = arith.maximumf %21, %10 : vector<1x256xf32>
    %23 = vector.broadcast %cst_13 : f32 to vector<1x256xf32>
    %24 = arith.minimumf %23, %22 : vector<1x256xf32>
    %25 = arith.subf %24, %7 : vector<1x256xf32>
    %cst_14 = arith.constant 0.000000e+00 : f32
    %cst_15 = arith.constant 1.600000e+01 : f32
    %26 = vector.broadcast %cst_14 : f32 to vector<1x256xf32>
    %27 = arith.maximumf %26, %8 : vector<1x256xf32>
    %28 = vector.broadcast %cst_15 : f32 to vector<1x256xf32>
    %29 = arith.minimumf %28, %27 : vector<1x256xf32>
    %30 = arith.subf %7, %29 : vector<1x256xf32>
    %31 = vector.broadcast %15 : vector<1x256xi32> to vector<16x256xi32>
    %32 = arith.cmpi eq, %5, %31 : vector<16x256xi32>
    %33 = arith.extui %32 : vector<16x256xi1> to vector<16x256xi32>
    %34 = arith.sitofp %33 : vector<16x256xi32> to vector<16x256xf32>
    %35 = arith.truncf %34 : vector<16x256xf32> to vector<16x256xbf16>
    %36 = vector.broadcast %20 : vector<1x256xi32> to vector<16x256xi32>
    %37 = arith.cmpi eq, %5, %36 : vector<16x256xi32>
    %38 = arith.extui %37 : vector<16x256xi1> to vector<16x256xi32>
    %39 = arith.sitofp %38 : vector<16x256xi32> to vector<16x256xf32>
    %40 = arith.truncf %39 : vector<16x256xf32> to vector<16x256xbf16>
    %c0_16 = arith.constant 0 : index
    %c0_17 = arith.constant 0 : index
    %c0_18 = arith.constant 0 : index
    %41 = vector.load %arg4[%c0_16, %c0_17, %c0_18] : memref<3x4x64xbf16, #tpu.memory_space<vmem>>, vector<1x4x64xbf16>
    %42 = vector.shape_cast %41 : vector<1x4x64xbf16> to vector<4x64xbf16>
    %43 = vector.extract_strided_slice %4 {offsets = [0, 0], sizes = [64, 256], strides = [1, 1]} : vector<64x768xf32> to vector<64x256xf32>
    %44 = arith.truncf %43 : vector<64x256xf32> to vector<64x256xbf16>
    %45 = vector.shape_cast %35 : vector<16x256xbf16> to vector<1x16x256xbf16>
    %46 = vector.shape_cast %45 : vector<1x16x256xbf16> to vector<1x16x256xbf16>
    %47 = vector.broadcast %46 : vector<1x16x256xbf16> to vector<4x16x256xbf16>
    %48 = vector.shape_cast %47 : vector<4x16x256xbf16> to vector<64x256xbf16>
    %49 = vector.shape_cast %40 : vector<16x256xbf16> to vector<1x16x256xbf16>
    %50 = vector.shape_cast %49 : vector<1x16x256xbf16> to vector<1x16x256xbf16>
    %51 = vector.broadcast %50 : vector<1x16x256xbf16> to vector<4x16x256xbf16>
    %52 = vector.shape_cast %51 : vector<4x16x256xbf16> to vector<64x256xbf16>
    %53 = arith.mulf %44, %48 : vector<64x256xbf16>
    %cst_19 = arith.constant dense<0.000000e+00> : vector<4x256xf32>
    %54 = tpu.matmul %42, %53, %cst_19 {dimension_numbers = #tpu.dot_dimension_numbers<[1], [0], [0], [1], [0, 0, 1, 1], [], []>} : vector<4x64xbf16>, vector<64x256xbf16>, vector<4x256xf32> -> vector<4x256xf32>
    %55 = arith.mulf %44, %52 : vector<64x256xbf16>
    %cst_20 = arith.constant dense<0.000000e+00> : vector<4x256xf32>
    %56 = tpu.matmul %42, %55, %cst_20 {dimension_numbers = #tpu.dot_dimension_numbers<[1], [0], [0], [1], [0, 0, 1, 1], [], []>} : vector<4x64xbf16>, vector<64x256xbf16>, vector<4x256xf32> -> vector<4x256xf32>
    %57 = vector.broadcast %25 : vector<1x256xf32> to vector<4x256xf32>
    %58 = arith.mulf %57, %54 : vector<4x256xf32>
    %59 = arith.addf %6, %58 : vector<4x256xf32>
    %60 = vector.broadcast %30 : vector<1x256xf32> to vector<4x256xf32>
    %61 = arith.mulf %60, %56 : vector<4x256xf32>
    %62 = arith.addf %59, %61 : vector<4x256xf32>
    %63 = vector.extract_strided_slice %2 {offsets = [1, 0], sizes = [1, 256], strides = [1, 1]} : vector<3x256xf32> to vector<1x256xf32>
    %64 = math.floor %63 : vector<1x256xf32>
    %cst_21 = arith.constant 1.000000e+00 : f32
    %65 = vector.broadcast %cst_21 : f32 to vector<1x256xf32>
    %66 = arith.addf %64, %65 : vector<1x256xf32>
    %cst_22 = arith.constant 0.000000e+00 : f32
    %cst_23 = arith.constant 1.500000e+01 : f32
    %67 = vector.broadcast %cst_22 : f32 to vector<1x256xf32>
    %68 = arith.maximumf %67, %64 : vector<1x256xf32>
    %69 = vector.broadcast %cst_23 : f32 to vector<1x256xf32>
    %70 = arith.minimumf %69, %68 : vector<1x256xf32>
    %71 = arith.fptosi %70 : vector<1x256xf32> to vector<1x256xi32>
    %cst_24 = arith.constant 0.000000e+00 : f32
    %cst_25 = arith.constant 1.500000e+01 : f32
    %72 = vector.broadcast %cst_24 : f32 to vector<1x256xf32>
    %73 = arith.maximumf %72, %66 : vector<1x256xf32>
    %74 = vector.broadcast %cst_25 : f32 to vector<1x256xf32>
    %75 = arith.minimumf %74, %73 : vector<1x256xf32>
    %76 = arith.fptosi %75 : vector<1x256xf32> to vector<1x256xi32>
    %cst_26 = arith.constant 0.000000e+00 : f32
    %cst_27 = arith.constant 1.600000e+01 : f32
    %77 = vector.broadcast %cst_26 : f32 to vector<1x256xf32>
    %78 = arith.maximumf %77, %66 : vector<1x256xf32>
    %79 = vector.broadcast %cst_27 : f32 to vector<1x256xf32>
    %80 = arith.minimumf %79, %78 : vector<1x256xf32>
    %81 = arith.subf %80, %63 : vector<1x256xf32>
    %cst_28 = arith.constant 0.000000e+00 : f32
    %cst_29 = arith.constant 1.600000e+01 : f32
    %82 = vector.broadcast %cst_28 : f32 to vector<1x256xf32>
    %83 = arith.maximumf %82, %64 : vector<1x256xf32>
    %84 = vector.broadcast %cst_29 : f32 to vector<1x256xf32>
    %85 = arith.minimumf %84, %83 : vector<1x256xf32>
    %86 = arith.subf %63, %85 : vector<1x256xf32>
    %87 = vector.broadcast %71 : vector<1x256xi32> to vector<16x256xi32>
    %88 = arith.cmpi eq, %5, %87 : vector<16x256xi32>
    %89 = arith.extui %88 : vector<16x256xi1> to vector<16x256xi32>
    %90 = arith.sitofp %89 : vector<16x256xi32> to vector<16x256xf32>
    %91 = arith.truncf %90 : vector<16x256xf32> to vector<16x256xbf16>
    %92 = vector.broadcast %76 : vector<1x256xi32> to vector<16x256xi32>
    %93 = arith.cmpi eq, %5, %92 : vector<16x256xi32>
    %94 = arith.extui %93 : vector<16x256xi1> to vector<16x256xi32>
    %95 = arith.sitofp %94 : vector<16x256xi32> to vector<16x256xf32>
    %96 = arith.truncf %95 : vector<16x256xf32> to vector<16x256xbf16>
    %c1 = arith.constant 1 : index
    %c0_30 = arith.constant 0 : index
    %c0_31 = arith.constant 0 : index
    %97 = vector.load %arg4[%c1, %c0_30, %c0_31] : memref<3x4x64xbf16, #tpu.memory_space<vmem>>, vector<1x4x64xbf16>
    %98 = vector.shape_cast %97 : vector<1x4x64xbf16> to vector<4x64xbf16>
    %99 = vector.extract_strided_slice %4 {offsets = [0, 256], sizes = [64, 256], strides = [1, 1]} : vector<64x768xf32> to vector<64x256xf32>
    %100 = arith.truncf %99 : vector<64x256xf32> to vector<64x256xbf16>
    %101 = vector.shape_cast %91 : vector<16x256xbf16> to vector<1x16x256xbf16>
    %102 = vector.shape_cast %101 : vector<1x16x256xbf16> to vector<1x16x256xbf16>
    %103 = vector.broadcast %102 : vector<1x16x256xbf16> to vector<4x16x256xbf16>
    %104 = vector.shape_cast %103 : vector<4x16x256xbf16> to vector<64x256xbf16>
    %105 = vector.shape_cast %96 : vector<16x256xbf16> to vector<1x16x256xbf16>
    %106 = vector.shape_cast %105 : vector<1x16x256xbf16> to vector<1x16x256xbf16>
    %107 = vector.broadcast %106 : vector<1x16x256xbf16> to vector<4x16x256xbf16>
    %108 = vector.shape_cast %107 : vector<4x16x256xbf16> to vector<64x256xbf16>
    %109 = arith.mulf %100, %104 : vector<64x256xbf16>
    %cst_32 = arith.constant dense<0.000000e+00> : vector<4x256xf32>
    %110 = tpu.matmul %98, %109, %cst_32 {dimension_numbers = #tpu.dot_dimension_numbers<[1], [0], [0], [1], [0, 0, 1, 1], [], []>} : vector<4x64xbf16>, vector<64x256xbf16>, vector<4x256xf32> -> vector<4x256xf32>
    %111 = arith.mulf %100, %108 : vector<64x256xbf16>
    %cst_33 = arith.constant dense<0.000000e+00> : vector<4x256xf32>
    %112 = tpu.matmul %98, %111, %cst_33 {dimension_numbers = #tpu.dot_dimension_numbers<[1], [0], [0], [1], [0, 0, 1, 1], [], []>} : vector<4x64xbf16>, vector<64x256xbf16>, vector<4x256xf32> -> vector<4x256xf32>
    %113 = vector.broadcast %81 : vector<1x256xf32> to vector<4x256xf32>
    %114 = arith.mulf %113, %110 : vector<4x256xf32>
    %115 = arith.addf %62, %114 : vector<4x256xf32>
    %116 = vector.broadcast %86 : vector<1x256xf32> to vector<4x256xf32>
    %117 = arith.mulf %116, %112 : vector<4x256xf32>
    %118 = arith.addf %115, %117 : vector<4x256xf32>
    %119 = vector.extract_strided_slice %2 {offsets = [2, 0], sizes = [1, 256], strides = [1, 1]} : vector<3x256xf32> to vector<1x256xf32>
    %120 = math.floor %119 : vector<1x256xf32>
    %cst_34 = arith.constant 1.000000e+00 : f32
    %121 = vector.broadcast %cst_34 : f32 to vector<1x256xf32>
    %122 = arith.addf %120, %121 : vector<1x256xf32>
    %cst_35 = arith.constant 0.000000e+00 : f32
    %cst_36 = arith.constant 1.500000e+01 : f32
    %123 = vector.broadcast %cst_35 : f32 to vector<1x256xf32>
    %124 = arith.maximumf %123, %120 : vector<1x256xf32>
    %125 = vector.broadcast %cst_36 : f32 to vector<1x256xf32>
    %126 = arith.minimumf %125, %124 : vector<1x256xf32>
    %127 = arith.fptosi %126 : vector<1x256xf32> to vector<1x256xi32>
    %cst_37 = arith.constant 0.000000e+00 : f32
    %cst_38 = arith.constant 1.500000e+01 : f32
    %128 = vector.broadcast %cst_37 : f32 to vector<1x256xf32>
    %129 = arith.maximumf %128, %122 : vector<1x256xf32>
    %130 = vector.broadcast %cst_38 : f32 to vector<1x256xf32>
    %131 = arith.minimumf %130, %129 : vector<1x256xf32>
    %132 = arith.fptosi %131 : vector<1x256xf32> to vector<1x256xi32>
    %cst_39 = arith.constant 0.000000e+00 : f32
    %cst_40 = arith.constant 1.600000e+01 : f32
    %133 = vector.broadcast %cst_39 : f32 to vector<1x256xf32>
    %134 = arith.maximumf %133, %122 : vector<1x256xf32>
    %135 = vector.broadcast %cst_40 : f32 to vector<1x256xf32>
    %136 = arith.minimumf %135, %134 : vector<1x256xf32>
    %137 = arith.subf %136, %119 : vector<1x256xf32>
    %cst_41 = arith.constant 0.000000e+00 : f32
    %cst_42 = arith.constant 1.600000e+01 : f32
    %138 = vector.broadcast %cst_41 : f32 to vector<1x256xf32>
    %139 = arith.maximumf %138, %120 : vector<1x256xf32>
    %140 = vector.broadcast %cst_42 : f32 to vector<1x256xf32>
    %141 = arith.minimumf %140, %139 : vector<1x256xf32>
    %142 = arith.subf %119, %141 : vector<1x256xf32>
    %143 = vector.broadcast %127 : vector<1x256xi32> to vector<16x256xi32>
    %144 = arith.cmpi eq, %5, %143 : vector<16x256xi32>
    %145 = arith.extui %144 : vector<16x256xi1> to vector<16x256xi32>
    %146 = arith.sitofp %145 : vector<16x256xi32> to vector<16x256xf32>
    %147 = arith.truncf %146 : vector<16x256xf32> to vector<16x256xbf16>
    %148 = vector.broadcast %132 : vector<1x256xi32> to vector<16x256xi32>
    %149 = arith.cmpi eq, %5, %148 : vector<16x256xi32>
    %150 = arith.extui %149 : vector<16x256xi1> to vector<16x256xi32>
    %151 = arith.sitofp %150 : vector<16x256xi32> to vector<16x256xf32>
    %152 = arith.truncf %151 : vector<16x256xf32> to vector<16x256xbf16>
    %c2 = arith.constant 2 : index
    %c0_43 = arith.constant 0 : index
    %c0_44 = arith.constant 0 : index
    %153 = vector.load %arg4[%c2, %c0_43, %c0_44] : memref<3x4x64xbf16, #tpu.memory_space<vmem>>, vector<1x4x64xbf16>
    %154 = vector.shape_cast %153 : vector<1x4x64xbf16> to vector<4x64xbf16>
    %155 = vector.extract_strided_slice %4 {offsets = [0, 512], sizes = [64, 256], strides = [1, 1]} : vector<64x768xf32> to vector<64x256xf32>
    %156 = arith.truncf %155 : vector<64x256xf32> to vector<64x256xbf16>
    %157 = vector.shape_cast %147 : vector<16x256xbf16> to vector<1x16x256xbf16>
    %158 = vector.shape_cast %157 : vector<1x16x256xbf16> to vector<1x16x256xbf16>
    %159 = vector.broadcast %158 : vector<1x16x256xbf16> to vector<4x16x256xbf16>
    %160 = vector.shape_cast %159 : vector<4x16x256xbf16> to vector<64x256xbf16>
    %161 = vector.shape_cast %152 : vector<16x256xbf16> to vector<1x16x256xbf16>
    %162 = vector.shape_cast %161 : vector<1x16x256xbf16> to vector<1x16x256xbf16>
    %163 = vector.broadcast %162 : vector<1x16x256xbf16> to vector<4x16x256xbf16>
    %164 = vector.shape_cast %163 : vector<4x16x256xbf16> to vector<64x256xbf16>
    %165 = arith.mulf %156, %160 : vector<64x256xbf16>
    %cst_45 = arith.constant dense<0.000000e+00> : vector<4x256xf32>
    %166 = tpu.matmul %154, %165, %cst_45 {dimension_numbers = #tpu.dot_dimension_numbers<[1], [0], [0], [1], [0, 0, 1, 1], [], []>} : vector<4x64xbf16>, vector<64x256xbf16>, vector<4x256xf32> -> vector<4x256xf32>
    %167 = arith.mulf %156, %164 : vector<64x256xbf16>
    %cst_46 = arith.constant dense<0.000000e+00> : vector<4x256xf32>
    %168 = tpu.matmul %154, %167, %cst_46 {dimension_numbers = #tpu.dot_dimension_numbers<[1], [0], [0], [1], [0, 0, 1, 1], [], []>} : vector<4x64xbf16>, vector<64x256xbf16>, vector<4x256xf32> -> vector<4x256xf32>
    %169 = vector.broadcast %137 : vector<1x256xf32> to vector<4x256xf32>
    %170 = arith.mulf %169, %166 : vector<4x256xf32>
    %171 = arith.addf %118, %170 : vector<4x256xf32>
    %172 = vector.broadcast %142 : vector<1x256xf32> to vector<4x256xf32>
    %173 = arith.mulf %172, %168 : vector<4x256xf32>
    %174 = arith.addf %171, %173 : vector<4x256xf32>
    %c0_47 = arith.constant 0 : index
    %c0_48 = arith.constant 0 : index
    %175 = vector.load %arg5[%c0_47, %c0_48] : memref<4x1xf32, #tpu.memory_space<vmem>>, vector<4x1xf32>
    %176 = vector.broadcast %175 : vector<4x1xf32> to vector<4x256xf32>
    %177 = arith.addf %174, %176 : vector<4x256xf32>
    %178 = vector.shape_cast %177 : vector<4x256xf32> to vector<1x4x256xf32>
    %cst_49 = arith.constant dense<0.000000e+00> : vector<1xf32>
    %179 = vector.multi_reduction <add>, %178, %cst_49 [1, 2] : vector<1x4x256xf32> to vector<1xf32>
    %180 = vector.shape_cast %179 : vector<1xf32> to vector<1x1x1xf32>
    %181 = vector.extract %180[0, 0, 0] : f32 from vector<1x1x1xf32>
    %182 = vector.broadcast %181 : f32 to vector<1x1xf32>
    %cst_50 = arith.constant 1.024000e+03 : f32
    %183 = vector.broadcast %cst_50 : f32 to vector<1x1xf32>
    %184 = arith.divf %182, %183 : vector<1x1xf32>
    %185 = vector.broadcast %184 : vector<1x1xf32> to vector<4x256xf32>
    %186 = arith.subf %177, %185 : vector<4x256xf32>
    %187 = arith.mulf %186, %186 : vector<4x256xf32>
    %188 = vector.shape_cast %187 : vector<4x256xf32> to vector<1x4x256xf32>
    %cst_51 = arith.constant dense<0.000000e+00> : vector<1xf32>
    %189 = vector.multi_reduction <add>, %188, %cst_51 [1, 2] : vector<1x4x256xf32> to vector<1xf32>
    %190 = vector.shape_cast %189 : vector<1xf32> to vector<1x1x1xf32>
    %191 = vector.extract %190[0, 0, 0] : f32 from vector<1x1x1xf32>
    %192 = vector.broadcast %191 : f32 to vector<1x1xf32>
    %cst_52 = arith.constant 1.024000e+03 : f32
    %193 = vector.broadcast %cst_52 : f32 to vector<1x1xf32>
    %194 = arith.divf %192, %193 : vector<1x1xf32>
    %cst_53 = arith.constant 9.99999974E-6 : f32
    %195 = vector.broadcast %cst_53 : f32 to vector<1x1xf32>
    %196 = arith.addf %194, %195 : vector<1x1xf32>
    %197 = math.rsqrt %196 : vector<1x1xf32>
    %198 = vector.broadcast %197 : vector<1x1xf32> to vector<4x256xf32>
    %199 = arith.mulf %186, %198 : vector<4x256xf32>
    %c0_54 = arith.constant 0 : index
    %c0_55 = arith.constant 0 : index
    %200 = vector.load %arg6[%c0_54, %c0_55] : memref<4x1xf32, #tpu.memory_space<vmem>>, vector<4x1xf32>
    %201 = vector.broadcast %200 : vector<4x1xf32> to vector<4x256xf32>
    %202 = arith.mulf %199, %201 : vector<4x256xf32>
    %c0_56 = arith.constant 0 : index
    %c0_57 = arith.constant 0 : index
    %203 = vector.load %arg7[%c0_56, %c0_57] : memref<4x1xf32, #tpu.memory_space<vmem>>, vector<4x1xf32>
    %204 = vector.broadcast %203 : vector<4x1xf32> to vector<4x256xf32>
    %205 = arith.addf %202, %204 : vector<4x256xf32>
    %cst_58 = arith.constant 0.000000e+00 : f32
    %206 = vector.broadcast %cst_58 : f32 to vector<4x256xf32>
    %207 = arith.maximumf %205, %206 : vector<4x256xf32>
    %c0_59 = arith.constant 0 : index
    %c0_60 = arith.constant 0 : index
    %c0_61 = arith.constant 0 : index
    %208 = vector.load %arg8[%c0_59, %c0_60, %c0_61] : memref<1x4x256xf32, #tpu.memory_space<vmem>>, vector<1x4x256xf32>
    %209 = vector.shape_cast %208 : vector<1x4x256xf32> to vector<4x256xf32>
    %210 = vector.shape_cast %207 : vector<4x256xf32> to vector<1x4x256xf32>
    tpu.vector_store %arg8[%c0_59, %c0_60, %c0_61], %210 {strides = array<i32>} : memref<1x4x256xf32, #tpu.memory_space<vmem>>, vector<1x4x256xf32>,
    return
  }
  func.func @transform_0(%arg0: i32) -> (i32, i32, i32) {
    %c0_i32 = arith.constant 0 : i32
    %c0_i32_0 = arith.constant 0 : i32
    %c0_i32_1 = arith.constant 0 : i32
    return %arg0, %c0_i32, %c0_i32_0 : i32, i32, i32
  }
  func.func @transform_1(%arg0: i32) -> (i32, i32) {
    %c0_i32 = arith.constant 0 : i32
    %c0_i32_0 = arith.constant 0 : i32
    %c0_i32_1 = arith.constant 0 : i32
    return %c0_i32, %c0_i32_0 : i32, i32
  }
  func.func @transform_2(%arg0: i32) -> (i32, i32) {
    %c0_i32 = arith.constant 0 : i32
    %c0_i32_0 = arith.constant 0 : i32
    %c0_i32_1 = arith.constant 0 : i32
    return %c0_i32, %c0_i32_0 : i32, i32
  }
  func.func @transform_3(%arg0: i32) -> (i32, i32, i32) {
    %c0_i32 = arith.constant 0 : i32
    %c0_i32_0 = arith.constant 0 : i32
    %c0_i32_1 = arith.constant 0 : i32
    %c0_i32_2 = arith.constant 0 : i32
    return %c0_i32, %c0_i32_0, %c0_i32_1 : i32, i32, i32
  }
  func.func @transform_4(%arg0: i32) -> (i32, i32) {
    %c0_i32 = arith.constant 0 : i32
    %c0_i32_0 = arith.constant 0 : i32
    %c0_i32_1 = arith.constant 0 : i32
    return %c0_i32, %c0_i32_0 : i32, i32
  }
  func.func @transform_5(%arg0: i32) -> (i32, i32) {
    %c0_i32 = arith.constant 0 : i32
    %c0_i32_0 = arith.constant 0 : i32
    %c0_i32_1 = arith.constant 0 : i32
    return %c0_i32, %c0_i32_0 : i32, i32
  }
  func.func @transform_6(%arg0: i32) -> (i32, i32) {
    %c0_i32 = arith.constant 0 : i32
    %c0_i32_0 = arith.constant 0 : i32
    %c0_i32_1 = arith.constant 0 : i32
    return %c0_i32, %c0_i32_0 : i32, i32
  }
  func.func @transform_7(%arg0: i32) -> (i32, i32, i32) {
    %c0_i32 = arith.constant 0 : i32
    %c0_i32_0 = arith.constant 0 : i32
    %c0_i32_1 = arith.constant 0 : i32
    return %arg0, %c0_i32, %c0_i32_0 : i32, i32, i32
  }
}

module attributes {stable_mosaic.version = 11 : i64} {
  func.func @_dsconv_tail_kernel(%arg0: i32, %arg1: memref<1x3x256xf32, #tpu.memory_space<vmem>>, %arg2: memref<64x16xbf16, #tpu.memory_space<vmem>>, %arg3: memref<16x768xbf16, #tpu.memory_space<vmem>>, %arg4: memref<3x4x64xbf16, #tpu.memory_space<vmem>>, %arg5: memref<4x1xf32, #tpu.memory_space<vmem>>, %arg6: memref<4x1xf32, #tpu.memory_space<vmem>>, %arg7: memref<4x1xf32, #tpu.memory_space<vmem>>, %arg8: memref<1x4x256xf32, #tpu.memory_space<vmem>>) attributes {dimension_semantics = [#tpu.dimension_semantics<parallel>], iteration_bounds = array<i64: 2>, scalar_prefetch = 0 : i64, scratch_operands = 0 : i64, tpu.core_type = #tpu.core_type<tc>, window_params = [{transform_indices = @transform_0, window_bounds = array<i64: 1, 3, 256>}, {pipeline_mode = #tpu.pipeline_mode<synchronous>, transform_indices = @transform_1, window_bounds = array<i64: 64, 16>}, {pipeline_mode = #tpu.pipeline_mode<synchronous>, transform_indices = @transform_2, window_bounds = array<i64: 16, 768>}, {pipeline_mode = #tpu.pipeline_mode<synchronous>, transform_indices = @transform_3, window_bounds = array<i64: 3, 4, 64>}, {pipeline_mode = #tpu.pipeline_mode<synchronous>, transform_indices = @transform_4, window_bounds = array<i64: 4, 1>}, {pipeline_mode = #tpu.pipeline_mode<synchronous>, transform_indices = @transform_5, window_bounds = array<i64: 4, 1>}, {pipeline_mode = #tpu.pipeline_mode<synchronous>, transform_indices = @transform_6, window_bounds = array<i64: 4, 1>}, {transform_indices = @transform_7, window_bounds = array<i64: 1, 4, 256>}]} {
    %c0 = arith.constant 0 : index
    %c0_0 = arith.constant 0 : index
    %0 = vector.load %arg2[%c0, %c0_0] : memref<64x16xbf16, #tpu.memory_space<vmem>>, vector<64x16xbf16>
    %c0_1 = arith.constant 0 : index
    %c0_2 = arith.constant 0 : index
    %c0_3 = arith.constant 0 : index
    %1 = vector.load %arg1[%c0_1, %c0_2, %c0_3] : memref<1x3x256xf32, #tpu.memory_space<vmem>>, vector<1x3x256xf32>
    %2 = vector.shape_cast %1 : vector<1x3x256xf32> to vector<3x256xf32>
    %3 = tpu.iota {dimensions = array<i32: 0>} : vector<16x256xi32>
    %cst = arith.constant 0.000000e+00 : f32
    %4 = vector.broadcast %cst : f32 to vector<4x256xf32>
    %5 = vector.extract_strided_slice %2 {offsets = [0, 0], sizes = [1, 256], strides = [1, 1]} : vector<3x256xf32> to vector<1x256xf32>
    %6 = math.floor %5 : vector<1x256xf32>
    %cst_4 = arith.constant 1.000000e+00 : f32
    %7 = vector.broadcast %cst_4 : f32 to vector<1x256xf32>
    %8 = arith.addf %6, %7 : vector<1x256xf32>
    %cst_5 = arith.constant 0.000000e+00 : f32
    %cst_6 = arith.constant 1.500000e+01 : f32
    %9 = vector.broadcast %cst_5 : f32 to vector<1x256xf32>
    %10 = arith.maximumf %9, %6 : vector<1x256xf32>
    %11 = vector.broadcast %cst_6 : f32 to vector<1x256xf32>
    %12 = arith.minimumf %11, %10 : vector<1x256xf32>
    %13 = arith.fptosi %12 : vector<1x256xf32> to vector<1x256xi32>
    %cst_7 = arith.constant 0.000000e+00 : f32
    %cst_8 = arith.constant 1.500000e+01 : f32
    %14 = vector.broadcast %cst_7 : f32 to vector<1x256xf32>
    %15 = arith.maximumf %14, %8 : vector<1x256xf32>
    %16 = vector.broadcast %cst_8 : f32 to vector<1x256xf32>
    %17 = arith.minimumf %16, %15 : vector<1x256xf32>
    %18 = arith.fptosi %17 : vector<1x256xf32> to vector<1x256xi32>
    %cst_9 = arith.constant 0.000000e+00 : f32
    %cst_10 = arith.constant 1.600000e+01 : f32
    %19 = vector.broadcast %cst_9 : f32 to vector<1x256xf32>
    %20 = arith.maximumf %19, %8 : vector<1x256xf32>
    %21 = vector.broadcast %cst_10 : f32 to vector<1x256xf32>
    %22 = arith.minimumf %21, %20 : vector<1x256xf32>
    %23 = arith.subf %22, %5 : vector<1x256xf32>
    %cst_11 = arith.constant 0.000000e+00 : f32
    %cst_12 = arith.constant 1.600000e+01 : f32
    %24 = vector.broadcast %cst_11 : f32 to vector<1x256xf32>
    %25 = arith.maximumf %24, %6 : vector<1x256xf32>
    %26 = vector.broadcast %cst_12 : f32 to vector<1x256xf32>
    %27 = arith.minimumf %26, %25 : vector<1x256xf32>
    %28 = arith.subf %5, %27 : vector<1x256xf32>
    %29 = vector.broadcast %13 : vector<1x256xi32> to vector<16x256xi32>
    %30 = arith.cmpi eq, %3, %29 : vector<16x256xi32>
    %31 = arith.extui %30 : vector<16x256xi1> to vector<16x256xi32>
    %32 = arith.sitofp %31 : vector<16x256xi32> to vector<16x256xf32>
    %33 = arith.truncf %32 : vector<16x256xf32> to vector<16x256xbf16>
    %34 = vector.broadcast %18 : vector<1x256xi32> to vector<16x256xi32>
    %35 = arith.cmpi eq, %3, %34 : vector<16x256xi32>
    %36 = arith.extui %35 : vector<16x256xi1> to vector<16x256xi32>
    %37 = arith.sitofp %36 : vector<16x256xi32> to vector<16x256xf32>
    %38 = arith.truncf %37 : vector<16x256xf32> to vector<16x256xbf16>
    %c0_13 = arith.constant 0 : index
    %c0_14 = arith.constant 0 : index
    %c0_15 = arith.constant 0 : index
    %39 = vector.load %arg4[%c0_13, %c0_14, %c0_15] : memref<3x4x64xbf16, #tpu.memory_space<vmem>>, vector<1x4x64xbf16>
    %40 = vector.shape_cast %39 : vector<1x4x64xbf16> to vector<4x64xbf16>
    %cst_16 = arith.constant dense<0.000000e+00> : vector<64x256xf32>
    %41 = tpu.matmul %0, %33, %cst_16 {dimension_numbers = #tpu.dot_dimension_numbers<[1], [0], [0], [1], [0, 0, 1, 1], [], []>} : vector<64x16xbf16>, vector<16x256xbf16>, vector<64x256xf32> -> vector<64x256xf32>
    %42 = arith.truncf %41 : vector<64x256xf32> to vector<64x256xbf16>
    %cst_17 = arith.constant dense<0.000000e+00> : vector<64x256xf32>
    %43 = tpu.matmul %0, %38, %cst_17 {dimension_numbers = #tpu.dot_dimension_numbers<[1], [0], [0], [1], [0, 0, 1, 1], [], []>} : vector<64x16xbf16>, vector<16x256xbf16>, vector<64x256xf32> -> vector<64x256xf32>
    %44 = arith.truncf %43 : vector<64x256xf32> to vector<64x256xbf16>
    %c0_18 = arith.constant 0 : index
    %c0_19 = arith.constant 0 : index
    %45 = vector.load %arg3[%c0_18, %c0_19] : memref<16x768xbf16, #tpu.memory_space<vmem>>, vector<16x256xbf16>
    %46 = vector.shape_cast %45 : vector<16x256xbf16> to vector<1x16x256xbf16>
    %47 = vector.shape_cast %46 : vector<1x16x256xbf16> to vector<1x16x256xbf16>
    %48 = vector.broadcast %47 : vector<1x16x256xbf16> to vector<4x16x256xbf16>
    %49 = vector.shape_cast %48 : vector<4x16x256xbf16> to vector<64x256xbf16>
    %50 = arith.mulf %42, %49 : vector<64x256xbf16>
    %cst_20 = arith.constant dense<0.000000e+00> : vector<4x256xf32>
    %51 = tpu.matmul %40, %50, %cst_20 {dimension_numbers = #tpu.dot_dimension_numbers<[1], [0], [0], [1], [0, 0, 1, 1], [], []>} : vector<4x64xbf16>, vector<64x256xbf16>, vector<4x256xf32> -> vector<4x256xf32>
    %52 = arith.mulf %44, %49 : vector<64x256xbf16>
    %cst_21 = arith.constant dense<0.000000e+00> : vector<4x256xf32>
    %53 = tpu.matmul %40, %52, %cst_21 {dimension_numbers = #tpu.dot_dimension_numbers<[1], [0], [0], [1], [0, 0, 1, 1], [], []>} : vector<4x64xbf16>, vector<64x256xbf16>, vector<4x256xf32> -> vector<4x256xf32>
    %54 = vector.broadcast %23 : vector<1x256xf32> to vector<4x256xf32>
    %55 = arith.mulf %54, %51 : vector<4x256xf32>
    %56 = arith.addf %4, %55 : vector<4x256xf32>
    %57 = vector.broadcast %28 : vector<1x256xf32> to vector<4x256xf32>
    %58 = arith.mulf %57, %53 : vector<4x256xf32>
    %59 = arith.addf %56, %58 : vector<4x256xf32>
    %60 = vector.extract_strided_slice %2 {offsets = [1, 0], sizes = [1, 256], strides = [1, 1]} : vector<3x256xf32> to vector<1x256xf32>
    %61 = math.floor %60 : vector<1x256xf32>
    %cst_22 = arith.constant 1.000000e+00 : f32
    %62 = vector.broadcast %cst_22 : f32 to vector<1x256xf32>
    %63 = arith.addf %61, %62 : vector<1x256xf32>
    %cst_23 = arith.constant 0.000000e+00 : f32
    %cst_24 = arith.constant 1.500000e+01 : f32
    %64 = vector.broadcast %cst_23 : f32 to vector<1x256xf32>
    %65 = arith.maximumf %64, %61 : vector<1x256xf32>
    %66 = vector.broadcast %cst_24 : f32 to vector<1x256xf32>
    %67 = arith.minimumf %66, %65 : vector<1x256xf32>
    %68 = arith.fptosi %67 : vector<1x256xf32> to vector<1x256xi32>
    %cst_25 = arith.constant 0.000000e+00 : f32
    %cst_26 = arith.constant 1.500000e+01 : f32
    %69 = vector.broadcast %cst_25 : f32 to vector<1x256xf32>
    %70 = arith.maximumf %69, %63 : vector<1x256xf32>
    %71 = vector.broadcast %cst_26 : f32 to vector<1x256xf32>
    %72 = arith.minimumf %71, %70 : vector<1x256xf32>
    %73 = arith.fptosi %72 : vector<1x256xf32> to vector<1x256xi32>
    %cst_27 = arith.constant 0.000000e+00 : f32
    %cst_28 = arith.constant 1.600000e+01 : f32
    %74 = vector.broadcast %cst_27 : f32 to vector<1x256xf32>
    %75 = arith.maximumf %74, %63 : vector<1x256xf32>
    %76 = vector.broadcast %cst_28 : f32 to vector<1x256xf32>
    %77 = arith.minimumf %76, %75 : vector<1x256xf32>
    %78 = arith.subf %77, %60 : vector<1x256xf32>
    %cst_29 = arith.constant 0.000000e+00 : f32
    %cst_30 = arith.constant 1.600000e+01 : f32
    %79 = vector.broadcast %cst_29 : f32 to vector<1x256xf32>
    %80 = arith.maximumf %79, %61 : vector<1x256xf32>
    %81 = vector.broadcast %cst_30 : f32 to vector<1x256xf32>
    %82 = arith.minimumf %81, %80 : vector<1x256xf32>
    %83 = arith.subf %60, %82 : vector<1x256xf32>
    %84 = vector.broadcast %68 : vector<1x256xi32> to vector<16x256xi32>
    %85 = arith.cmpi eq, %3, %84 : vector<16x256xi32>
    %86 = arith.extui %85 : vector<16x256xi1> to vector<16x256xi32>
    %87 = arith.sitofp %86 : vector<16x256xi32> to vector<16x256xf32>
    %88 = arith.truncf %87 : vector<16x256xf32> to vector<16x256xbf16>
    %89 = vector.broadcast %73 : vector<1x256xi32> to vector<16x256xi32>
    %90 = arith.cmpi eq, %3, %89 : vector<16x256xi32>
    %91 = arith.extui %90 : vector<16x256xi1> to vector<16x256xi32>
    %92 = arith.sitofp %91 : vector<16x256xi32> to vector<16x256xf32>
    %93 = arith.truncf %92 : vector<16x256xf32> to vector<16x256xbf16>
    %c1 = arith.constant 1 : index
    %c0_31 = arith.constant 0 : index
    %c0_32 = arith.constant 0 : index
    %94 = vector.load %arg4[%c1, %c0_31, %c0_32] : memref<3x4x64xbf16, #tpu.memory_space<vmem>>, vector<1x4x64xbf16>
    %95 = vector.shape_cast %94 : vector<1x4x64xbf16> to vector<4x64xbf16>
    %cst_33 = arith.constant dense<0.000000e+00> : vector<64x256xf32>
    %96 = tpu.matmul %0, %88, %cst_33 {dimension_numbers = #tpu.dot_dimension_numbers<[1], [0], [0], [1], [0, 0, 1, 1], [], []>} : vector<64x16xbf16>, vector<16x256xbf16>, vector<64x256xf32> -> vector<64x256xf32>
    %97 = arith.truncf %96 : vector<64x256xf32> to vector<64x256xbf16>
    %cst_34 = arith.constant dense<0.000000e+00> : vector<64x256xf32>
    %98 = tpu.matmul %0, %93, %cst_34 {dimension_numbers = #tpu.dot_dimension_numbers<[1], [0], [0], [1], [0, 0, 1, 1], [], []>} : vector<64x16xbf16>, vector<16x256xbf16>, vector<64x256xf32> -> vector<64x256xf32>
    %99 = arith.truncf %98 : vector<64x256xf32> to vector<64x256xbf16>
    %c0_35 = arith.constant 0 : index
    %c256 = arith.constant 256 : index
    %100 = vector.load %arg3[%c0_35, %c256] : memref<16x768xbf16, #tpu.memory_space<vmem>>, vector<16x256xbf16>
    %101 = vector.shape_cast %100 : vector<16x256xbf16> to vector<1x16x256xbf16>
    %102 = vector.shape_cast %101 : vector<1x16x256xbf16> to vector<1x16x256xbf16>
    %103 = vector.broadcast %102 : vector<1x16x256xbf16> to vector<4x16x256xbf16>
    %104 = vector.shape_cast %103 : vector<4x16x256xbf16> to vector<64x256xbf16>
    %105 = arith.mulf %97, %104 : vector<64x256xbf16>
    %cst_36 = arith.constant dense<0.000000e+00> : vector<4x256xf32>
    %106 = tpu.matmul %95, %105, %cst_36 {dimension_numbers = #tpu.dot_dimension_numbers<[1], [0], [0], [1], [0, 0, 1, 1], [], []>} : vector<4x64xbf16>, vector<64x256xbf16>, vector<4x256xf32> -> vector<4x256xf32>
    %107 = arith.mulf %99, %104 : vector<64x256xbf16>
    %cst_37 = arith.constant dense<0.000000e+00> : vector<4x256xf32>
    %108 = tpu.matmul %95, %107, %cst_37 {dimension_numbers = #tpu.dot_dimension_numbers<[1], [0], [0], [1], [0, 0, 1, 1], [], []>} : vector<4x64xbf16>, vector<64x256xbf16>, vector<4x256xf32> -> vector<4x256xf32>
    %109 = vector.broadcast %78 : vector<1x256xf32> to vector<4x256xf32>
    %110 = arith.mulf %109, %106 : vector<4x256xf32>
    %111 = arith.addf %59, %110 : vector<4x256xf32>
    %112 = vector.broadcast %83 : vector<1x256xf32> to vector<4x256xf32>
    %113 = arith.mulf %112, %108 : vector<4x256xf32>
    %114 = arith.addf %111, %113 : vector<4x256xf32>
    %115 = vector.extract_strided_slice %2 {offsets = [2, 0], sizes = [1, 256], strides = [1, 1]} : vector<3x256xf32> to vector<1x256xf32>
    %116 = math.floor %115 : vector<1x256xf32>
    %cst_38 = arith.constant 1.000000e+00 : f32
    %117 = vector.broadcast %cst_38 : f32 to vector<1x256xf32>
    %118 = arith.addf %116, %117 : vector<1x256xf32>
    %cst_39 = arith.constant 0.000000e+00 : f32
    %cst_40 = arith.constant 1.500000e+01 : f32
    %119 = vector.broadcast %cst_39 : f32 to vector<1x256xf32>
    %120 = arith.maximumf %119, %116 : vector<1x256xf32>
    %121 = vector.broadcast %cst_40 : f32 to vector<1x256xf32>
    %122 = arith.minimumf %121, %120 : vector<1x256xf32>
    %123 = arith.fptosi %122 : vector<1x256xf32> to vector<1x256xi32>
    %cst_41 = arith.constant 0.000000e+00 : f32
    %cst_42 = arith.constant 1.500000e+01 : f32
    %124 = vector.broadcast %cst_41 : f32 to vector<1x256xf32>
    %125 = arith.maximumf %124, %118 : vector<1x256xf32>
    %126 = vector.broadcast %cst_42 : f32 to vector<1x256xf32>
    %127 = arith.minimumf %126, %125 : vector<1x256xf32>
    %128 = arith.fptosi %127 : vector<1x256xf32> to vector<1x256xi32>
    %cst_43 = arith.constant 0.000000e+00 : f32
    %cst_44 = arith.constant 1.600000e+01 : f32
    %129 = vector.broadcast %cst_43 : f32 to vector<1x256xf32>
    %130 = arith.maximumf %129, %118 : vector<1x256xf32>
    %131 = vector.broadcast %cst_44 : f32 to vector<1x256xf32>
    %132 = arith.minimumf %131, %130 : vector<1x256xf32>
    %133 = arith.subf %132, %115 : vector<1x256xf32>
    %cst_45 = arith.constant 0.000000e+00 : f32
    %cst_46 = arith.constant 1.600000e+01 : f32
    %134 = vector.broadcast %cst_45 : f32 to vector<1x256xf32>
    %135 = arith.maximumf %134, %116 : vector<1x256xf32>
    %136 = vector.broadcast %cst_46 : f32 to vector<1x256xf32>
    %137 = arith.minimumf %136, %135 : vector<1x256xf32>
    %138 = arith.subf %115, %137 : vector<1x256xf32>
    %139 = vector.broadcast %123 : vector<1x256xi32> to vector<16x256xi32>
    %140 = arith.cmpi eq, %3, %139 : vector<16x256xi32>
    %141 = arith.extui %140 : vector<16x256xi1> to vector<16x256xi32>
    %142 = arith.sitofp %141 : vector<16x256xi32> to vector<16x256xf32>
    %143 = arith.truncf %142 : vector<16x256xf32> to vector<16x256xbf16>
    %144 = vector.broadcast %128 : vector<1x256xi32> to vector<16x256xi32>
    %145 = arith.cmpi eq, %3, %144 : vector<16x256xi32>
    %146 = arith.extui %145 : vector<16x256xi1> to vector<16x256xi32>
    %147 = arith.sitofp %146 : vector<16x256xi32> to vector<16x256xf32>
    %148 = arith.truncf %147 : vector<16x256xf32> to vector<16x256xbf16>
    %c2 = arith.constant 2 : index
    %c0_47 = arith.constant 0 : index
    %c0_48 = arith.constant 0 : index
    %149 = vector.load %arg4[%c2, %c0_47, %c0_48] : memref<3x4x64xbf16, #tpu.memory_space<vmem>>, vector<1x4x64xbf16>
    %150 = vector.shape_cast %149 : vector<1x4x64xbf16> to vector<4x64xbf16>
    %cst_49 = arith.constant dense<0.000000e+00> : vector<64x256xf32>
    %151 = tpu.matmul %0, %143, %cst_49 {dimension_numbers = #tpu.dot_dimension_numbers<[1], [0], [0], [1], [0, 0, 1, 1], [], []>} : vector<64x16xbf16>, vector<16x256xbf16>, vector<64x256xf32> -> vector<64x256xf32>
    %152 = arith.truncf %151 : vector<64x256xf32> to vector<64x256xbf16>
    %cst_50 = arith.constant dense<0.000000e+00> : vector<64x256xf32>
    %153 = tpu.matmul %0, %148, %cst_50 {dimension_numbers = #tpu.dot_dimension_numbers<[1], [0], [0], [1], [0, 0, 1, 1], [], []>} : vector<64x16xbf16>, vector<16x256xbf16>, vector<64x256xf32> -> vector<64x256xf32>
    %154 = arith.truncf %153 : vector<64x256xf32> to vector<64x256xbf16>
    %c0_51 = arith.constant 0 : index
    %c512 = arith.constant 512 : index
    %155 = vector.load %arg3[%c0_51, %c512] : memref<16x768xbf16, #tpu.memory_space<vmem>>, vector<16x256xbf16>
    %156 = vector.shape_cast %155 : vector<16x256xbf16> to vector<1x16x256xbf16>
    %157 = vector.shape_cast %156 : vector<1x16x256xbf16> to vector<1x16x256xbf16>
    %158 = vector.broadcast %157 : vector<1x16x256xbf16> to vector<4x16x256xbf16>
    %159 = vector.shape_cast %158 : vector<4x16x256xbf16> to vector<64x256xbf16>
    %160 = arith.mulf %152, %159 : vector<64x256xbf16>
    %cst_52 = arith.constant dense<0.000000e+00> : vector<4x256xf32>
    %161 = tpu.matmul %150, %160, %cst_52 {dimension_numbers = #tpu.dot_dimension_numbers<[1], [0], [0], [1], [0, 0, 1, 1], [], []>} : vector<4x64xbf16>, vector<64x256xbf16>, vector<4x256xf32> -> vector<4x256xf32>
    %162 = arith.mulf %154, %159 : vector<64x256xbf16>
    %cst_53 = arith.constant dense<0.000000e+00> : vector<4x256xf32>
    %163 = tpu.matmul %150, %162, %cst_53 {dimension_numbers = #tpu.dot_dimension_numbers<[1], [0], [0], [1], [0, 0, 1, 1], [], []>} : vector<4x64xbf16>, vector<64x256xbf16>, vector<4x256xf32> -> vector<4x256xf32>
    %164 = vector.broadcast %133 : vector<1x256xf32> to vector<4x256xf32>
    %165 = arith.mulf %164, %161 : vector<4x256xf32>
    %166 = arith.addf %114, %165 : vector<4x256xf32>
    %167 = vector.broadcast %138 : vector<1x256xf32> to vector<4x256xf32>
    %168 = arith.mulf %167, %163 : vector<4x256xf32>
    %169 = arith.addf %166, %168 : vector<4x256xf32>
    %c0_54 = arith.constant 0 : index
    %c0_55 = arith.constant 0 : index
    %170 = vector.load %arg5[%c0_54, %c0_55] : memref<4x1xf32, #tpu.memory_space<vmem>>, vector<4x1xf32>
    %171 = vector.broadcast %170 : vector<4x1xf32> to vector<4x256xf32>
    %172 = arith.addf %169, %171 : vector<4x256xf32>
    %173 = vector.shape_cast %172 : vector<4x256xf32> to vector<1x4x256xf32>
    %cst_56 = arith.constant dense<0.000000e+00> : vector<1xf32>
    %174 = vector.multi_reduction <add>, %173, %cst_56 [1, 2] : vector<1x4x256xf32> to vector<1xf32>
    %175 = vector.shape_cast %174 : vector<1xf32> to vector<1x1x1xf32>
    %176 = vector.extract %175[0, 0, 0] : f32 from vector<1x1x1xf32>
    %177 = vector.broadcast %176 : f32 to vector<1x1xf32>
    %cst_57 = arith.constant 1.024000e+03 : f32
    %178 = vector.broadcast %cst_57 : f32 to vector<1x1xf32>
    %179 = arith.divf %177, %178 : vector<1x1xf32>
    %180 = vector.broadcast %179 : vector<1x1xf32> to vector<4x256xf32>
    %181 = arith.subf %172, %180 : vector<4x256xf32>
    %182 = arith.mulf %181, %181 : vector<4x256xf32>
    %183 = vector.shape_cast %182 : vector<4x256xf32> to vector<1x4x256xf32>
    %cst_58 = arith.constant dense<0.000000e+00> : vector<1xf32>
    %184 = vector.multi_reduction <add>, %183, %cst_58 [1, 2] : vector<1x4x256xf32> to vector<1xf32>
    %185 = vector.shape_cast %184 : vector<1xf32> to vector<1x1x1xf32>
    %186 = vector.extract %185[0, 0, 0] : f32 from vector<1x1x1xf32>
    %187 = vector.broadcast %186 : f32 to vector<1x1xf32>
    %cst_59 = arith.constant 1.024000e+03 : f32
    %188 = vector.broadcast %cst_59 : f32 to vector<1x1xf32>
    %189 = arith.divf %187, %188 : vector<1x1xf32>
    %cst_60 = arith.constant 9.99999974E-6 : f32
    %190 = vector.broadcast %cst_60 : f32 to vector<1x1xf32>
    %191 = arith.addf %189, %190 : vector<1x1xf32>
    %192 = math.rsqrt %191 : vector<1x1xf32>
    %193 = vector.broadcast %192 : vector<1x1xf32> to vector<4x256xf32>
    %194 = arith.mulf %181, %193 : vector<4x256xf32>
    %c0_61 = arith.constant 0 : index
    %c0_62 = arith.constant 0 : index
    %195 = vector.load %arg6[%c0_61, %c0_62] : memref<4x1xf32, #tpu.memory_space<vmem>>, vector<4x1xf32>
    %196 = vector.broadcast %195 : vector<4x1xf32> to vector<4x256xf32>
    %197 = arith.mulf %194, %196 : vector<4x256xf32>
    %c0_63 = arith.constant 0 : index
    %c0_64 = arith.constant 0 : index
    %198 = vector.load %arg7[%c0_63, %c0_64] : memref<4x1xf32, #tpu.memory_space<vmem>>, vector<4x1xf32>
    %199 = vector.broadcast %198 : vector<4x1xf32> to vector<4x256xf32>
    %200 = arith.addf %197, %199 : vector<4x256xf32>
    %cst_65 = arith.constant 0.000000e+00 : f32
    %201 = vector.broadcast %cst_65 : f32 to vector<4x256xf32>
    %202 = arith.maximumf %200, %201 : vector<4x256xf32>
    %c0_66 = arith.constant 0 : index
    %c0_67 = arith.constant 0 : index
    %c0_68 = arith.constant 0 : index
    %203 = vector.load %arg8[%c0_66, %c0_67, %c0_68] : memref<1x4x256xf32, #tpu.memory_space<vmem>>, vector<1x4x256xf32>
    %204 = vector.shape_cast %203 : vector<1x4x256xf32> to vector<4x256xf32>
    %205 = vector.shape_cast %202 : vector<4x256xf32> to vector<1x4x256xf32>
    tpu.vector_store %arg8[%c0_66, %c0_67, %c0_68], %205 {strides = array<i32>} : memref<1x4x256xf32, #tpu.memory_space<vmem>>, vector<1x4x256xf32>,
    return
  }
  func.func @transform_0(%arg0: i32) -> (i32, i32, i32) {
    %c0_i32 = arith.constant 0 : i32
    %c0_i32_0 = arith.constant 0 : i32
    %c0_i32_1 = arith.constant 0 : i32
    return %arg0, %c0_i32, %c0_i32_0 : i32, i32, i32
  }
  func.func @transform_1(%arg0: i32) -> (i32, i32) {
    %c0_i32 = arith.constant 0 : i32
    %c0_i32_0 = arith.constant 0 : i32
    %c0_i32_1 = arith.constant 0 : i32
    return %c0_i32, %c0_i32_0 : i32, i32
  }
  func.func @transform_2(%arg0: i32) -> (i32, i32) {
    %c0_i32 = arith.constant 0 : i32
    %c0_i32_0 = arith.constant 0 : i32
    %c0_i32_1 = arith.constant 0 : i32
    return %c0_i32, %c0_i32_0 : i32, i32
  }
  func.func @transform_3(%arg0: i32) -> (i32, i32, i32) {
    %c0_i32 = arith.constant 0 : i32
    %c0_i32_0 = arith.constant 0 : i32
    %c0_i32_1 = arith.constant 0 : i32
    %c0_i32_2 = arith.constant 0 : i32
    return %c0_i32, %c0_i32_0, %c0_i32_1 : i32, i32, i32
  }
  func.func @transform_4(%arg0: i32) -> (i32, i32) {
    %c0_i32 = arith.constant 0 : i32
    %c0_i32_0 = arith.constant 0 : i32
    %c0_i32_1 = arith.constant 0 : i32
    return %c0_i32, %c0_i32_0 : i32, i32
  }
  func.func @transform_5(%arg0: i32) -> (i32, i32) {
    %c0_i32 = arith.constant 0 : i32
    %c0_i32_0 = arith.constant 0 : i32
    %c0_i32_1 = arith.constant 0 : i32
    return %c0_i32, %c0_i32_0 : i32, i32
  }
  func.func @transform_6(%arg0: i32) -> (i32, i32) {
    %c0_i32 = arith.constant 0 : i32
    %c0_i32_0 = arith.constant 0 : i32
    %c0_i32_1 = arith.constant 0 : i32
    return %c0_i32, %c0_i32_0 : i32, i32
  }
  func.func @transform_7(%arg0: i32) -> (i32, i32, i32) {
    %c0_i32 = arith.constant 0 : i32
    %c0_i32_0 = arith.constant 0 : i32
    %c0_i32_1 = arith.constant 0 : i32
    return %arg0, %c0_i32, %c0_i32_0 : i32, i32, i32
  }
}

module attributes {stable_mosaic.version = 11 : i64} {
  func.func @_conv1_kernel(%arg0: i32, %arg1: i32, %arg2: memref<4x108xbf16, #tpu.memory_space<vmem>>, %arg3: memref<1x108x128xbf16, #tpu.memory_space<vmem>>, %arg4: memref<1x4x128xf32, #tpu.memory_space<vmem>>, %arg5: memref<4x1xf32, #tpu.memory_space<vmem>>, %arg6: memref<1x4x128xf32, #tpu.memory_space<vmem>>) attributes {dimension_semantics = [#tpu.dimension_semantics<parallel>, #tpu.dimension_semantics<parallel>], iteration_bounds = array<i64: 2, 2>, scalar_prefetch = 0 : i64, scratch_operands = 0 : i64, tpu.core_type = #tpu.core_type<tc>, window_params = [{pipeline_mode = #tpu.pipeline_mode<synchronous>, transform_indices = @transform_0, window_bounds = array<i64: 4, 108>}, {transform_indices = @transform_1, window_bounds = array<i64: 1, 108, 128>}, {transform_indices = @transform_2, window_bounds = array<i64: 1, 4, 128>}, {pipeline_mode = #tpu.pipeline_mode<synchronous>, transform_indices = @transform_3, window_bounds = array<i64: 4, 1>}, {transform_indices = @transform_4, window_bounds = array<i64: 1, 4, 128>}]} {
    %c0 = arith.constant 0 : index
    %c0_0 = arith.constant 0 : index
    %0 = vector.load %arg2[%c0, %c0_0] : memref<4x108xbf16, #tpu.memory_space<vmem>>, vector<4x108xbf16>
    %c0_1 = arith.constant 0 : index
    %c0_2 = arith.constant 0 : index
    %c0_3 = arith.constant 0 : index
    %1 = vector.load %arg3[%c0_1, %c0_2, %c0_3] : memref<1x108x128xbf16, #tpu.memory_space<vmem>>, vector<1x108x128xbf16>
    %2 = vector.shape_cast %1 : vector<1x108x128xbf16> to vector<108x128xbf16>
    %cst = arith.constant dense<0.000000e+00> : vector<4x128xf32>
    %3 = tpu.matmul %0, %2, %cst {dimension_numbers = #tpu.dot_dimension_numbers<[1], [0], [0], [1], [0, 0, 1, 1], [], []>} : vector<4x108xbf16>, vector<108x128xbf16>, vector<4x128xf32> -> vector<4x128xf32>
    %cst_4 = arith.constant 0.000000e+00 : f32
    %4 = vector.broadcast %cst_4 : f32 to vector<4x128xf32>
    %5 = arith.maximumf %3, %4 : vector<4x128xf32>
    %c0_5 = arith.constant 0 : index
    %c0_6 = arith.constant 0 : index
    %6 = vector.load %arg5[%c0_5, %c0_6] : memref<4x1xf32, #tpu.memory_space<vmem>>, vector<4x1xf32>
    %7 = vector.broadcast %6 : vector<4x1xf32> to vector<4x128xf32>
    %8 = arith.mulf %5, %7 : vector<4x128xf32>
    %c0_7 = arith.constant 0 : index
    %c0_8 = arith.constant 0 : index
    %c0_9 = arith.constant 0 : index
    %9 = vector.load %arg4[%c0_7, %c0_8, %c0_9] : memref<1x4x128xf32, #tpu.memory_space<vmem>>, vector<1x4x128xf32>
    %10 = vector.shape_cast %9 : vector<1x4x128xf32> to vector<4x128xf32>
    %11 = arith.addf %8, %10 : vector<4x128xf32>
    %c0_10 = arith.constant 0 : index
    %c0_11 = arith.constant 0 : index
    %c0_12 = arith.constant 0 : index
    %12 = vector.load %arg6[%c0_10, %c0_11, %c0_12] : memref<1x4x128xf32, #tpu.memory_space<vmem>>, vector<1x4x128xf32>
    %13 = vector.shape_cast %12 : vector<1x4x128xf32> to vector<4x128xf32>
    %14 = vector.shape_cast %11 : vector<4x128xf32> to vector<1x4x128xf32>
    tpu.vector_store %arg6[%c0_10, %c0_11, %c0_12], %14 {strides = array<i32>} : memref<1x4x128xf32, #tpu.memory_space<vmem>>, vector<1x4x128xf32>,
    return
  }
  func.func @transform_0(%arg0: i32, %arg1: i32) -> (i32, i32) {
    %c0_i32 = arith.constant 0 : i32
    %c0_i32_0 = arith.constant 0 : i32
    %c0_i32_1 = arith.constant 0 : i32
    return %c0_i32, %c0_i32_0 : i32, i32
  }
  func.func @transform_1(%arg0: i32, %arg1: i32) -> (i32, i32, i32) {
    %c0_i32 = arith.constant 0 : i32
    %c0_i32_0 = arith.constant 0 : i32
    return %arg0, %c0_i32, %arg1 : i32, i32, i32
  }
  func.func @transform_2(%arg0: i32, %arg1: i32) -> (i32, i32, i32) {
    %c0_i32 = arith.constant 0 : i32
    %c0_i32_0 = arith.constant 0 : i32
    return %arg0, %c0_i32, %arg1 : i32, i32, i32
  }
  func.func @transform_3(%arg0: i32, %arg1: i32) -> (i32, i32) {
    %c0_i32 = arith.constant 0 : i32
    %c0_i32_0 = arith.constant 0 : i32
    %c0_i32_1 = arith.constant 0 : i32
    return %c0_i32, %c0_i32_0 : i32, i32
  }
  func.func @transform_4(%arg0: i32, %arg1: i32) -> (i32, i32, i32) {
    %c0_i32 = arith.constant 0 : i32
    %c0_i32_0 = arith.constant 0 : i32
    return %arg0, %c0_i32, %arg1 : i32, i32, i32
  }
}

</mosaic_0001>

<bundles_post_ra>
// kernel: dsc3block_forward.4
= control target key start
LH: loop header
LB: loop body
LE: loop exit
PB: predicated region body
PF: predicated region fallthrough
CT: control target
= control target key end

     0   :  { %s638_s12 = smov 0   ;;  %s640_s13 = smov 0   ;;  %s743_s0 = inlined_call_operand.vmem [shape: bf16[16,36], index: 0, kind: input, shape index: {}]   ;;  %s744_s1 = inlined_call_operand.vmem [shape: bf16[2,36,256], index: 1, kind: input, shape index: {}]   ;;  %s745_s2 = inlined_call_operand.vmem [shape: f32[16,1], index: 2, kind: input, shape index: {}]   ;;  %s746_s3 = inlined_call_operand.vmem [shape: f32[2,16,256], index: 3, kind: output, shape index: {}]  }
   0x1   :  { %s642_s14 = smov 0   ;;  %s644_s15 = smov 0  }
   0x2   :  { %s646_s16 = smov 0   ;;  %s648_s17 = smov 0  }
   0x3   :  { %s650_s18 = smov 0  }
   0x4 LB: > { %s22_s19 = sadd.s32 1, %s605_s16  ;;  %s25_s20 = sadd.s32 1, %s609_s17  ;;  %s613_s18 = sphi %s650_s18, %s13_s18   ;;  %s609_s17 = sphi %s648_s17, %s753_s17   ;;  %s605_s16 = sphi %s646_s16, %s752_s16   ;;  %s601_s15 = sphi %s644_s15, %s751_s15   ;;  %s597_s14 = sphi %s642_s14, %s750_s14   ;;  %s593_s13 = sphi %s640_s13, %s749_s13   ;;  %s589_s12 = sphi %s638_s12, %s748_s12  }
   0x5   : > { %p23_p0 = scmp.ge.s32.totalorder %s22_s19, 2  ;;  %s457_s21 = sadd.s32 4294967295, %s613_s18  }
   0x6   : > { %p62_p1 = scmp.ne.s32.totalorder %s593_s13, %s589_s12  ;;  %p63_p2 = scmp.eq.s32.totalorder %s613_s18, 0 }
   0x7   : > { %s755_s19 = smov (%p23_p0, %s22_s19), 0  ;;  %s757_s20 = smov (!%p23_p0, %s25_s20), %s609_s17 }
   0x8   : > { %p27_p3 = scmp.ge.s32.totalorder %s757_s20, 2  ;;  %p115_p4 = scmp.eq.s32.totalorder %s457_s21, 3 }
   0x9   : > { %s51_s22 = ssub.s32 %s605_s16, %s755_s19  ;;  %p64_p5 = por %p63_p2, %p62_p1 }
   0xa   : > { %s759_s20 = smov (%p27_p3, %s757_s20), 0  ;;  %p686_p6 = por %p115_p4, %p62_p1 }
   0xb   : > { %s50_s24 = ssub.s32 %s609_s17, %s759_s20  ;;  %s55_s26 = sadd.s32 1, %s593_s13 }
   0xc   : > { %s52_s25 = sor.u32 %s51_s22, %s50_s24  ;;  %p460_p8 = scmp.ge.s32.totalorder %s613_s18, 4 }
   0xd   : > { %p53_p7 = scmp.eq.s32.totalorder %s52_s25, 0 }
   0xe   : > { %143 = sbr.rel (%p460_p8) target bundleno = 29 (0x1d), region = 24 }
   0xf   : > { %s694_s27 = scalar_select %p53_p7, %s593_s13, %s55_s26  }
  0x13   : > { %146 = sbr.rel (!%p64_p5) target bundleno = 29 (0x1d), region = 28  ;;  %s148_s28 = sand.u32 (%p64_p5), 1, %s593_s13  }
  0x14   : > { %s489_s29 = smul.u32 (%p64_p5), 10, %s609_s17 }
  0x15   : > { %s488_s30 = smul.u32 (%p64_p5), 20, %s148_s28 }
  0x16   : > { %s152_s4 = sadd.s32 (%p64_p5), %s605_s16, %s489_s29 }
  0x17   : > { %s461_s5 = sshll.u32 (%p64_p5), %s152_s4, 2  ;;  %s150_s9 = scalar_lea.vmem (%p64_p5), [#allocation2], %s488_s30 }
  0x18   : > { %s154_s8 = scalar_lea.vmem %s744_s1, %s461_s5 }
  0x19   : > { %v171_v0 = vld [vmem:[%s154_s8] sm:$0xf]  ;;  %v173_v1 = vld [vmem:[%s154_s8 + $0x8] sm:$0xf]  ;;  %v175_v2 = vld [vmem:[%s154_s8 + $0x10] sm:$0xf] }
  0x1a   : > { %172 = vst [vmem:[%s150_s9] sm:$0xf] %v171_v0  ;;  %174 = vst [vmem:[%s150_s9 + $0x4] sm:$0xf] %v173_v1  ;;  %v177_v3 = vld [vmem:[%s154_s8 + $0x18] sm:$0xf] }
  0x1b   : > { %176 = vst [vmem:[%s150_s9 + $0x8] sm:$0xf] %v175_v2  ;;  %v179_v4 = vld [vmem:[%s154_s8 + $0x20] sm:$0xf]  ;;  %178 = vst [vmem:[%s150_s9 + $0xc] sm:$0xf] %v177_v3 }
  0x1c   : > { %180 = vst [vmem:[%s150_s9 + $0x10] sm:$0xf] %v179_v4 }
  0x1d PF: > { %p462_p9 = scmp.ge.s32.totalorder %s613_s18, 1  ;;  %p213_p10 = scmp.lt.s32.totalorder %s613_s18, 5 }
  0x1f   : > { %p214_p11 = pnand %p462_p9, %p213_p10 }
  0x20   : > { %s220_s10 = sand.u32 (!%p214_p11), 1, %s589_s12  }
  0x21   : > { %217 = sbr.rel (%p214_p11) target bundleno = 274 (0x112), region = 69  ;;  %s463_s29 = sshll.u32 (!%p214_p11), %s220_s10, 4 }
  0x22   : > { %s490_s11 = smul.u32 (!%p214_p11), 20, %s220_s10  ;;  %s241_s30 = scalar_lea.vmem (!%p214_p11), [#allocation3], %s463_s29 }
  0x24   : > { %s222_s24 = scalar_lea.vmem (!%p214_p11), [#allocation2], %s490_s11 }
  0x26   : > { %v615_v5 = vmov 0.0   ;;  %vm616_vm0 = vmmov 0   ;;  %v617_v6 = vmov 0   ;;  %v250_v7 = vld [vmem:[%s745_s2] sm:$0xff]  ;;  %vm286_vm1 = vcmask 1041408   ;;  %v251_v9 = vld [vmem:[%s745_s2 + $0x8] sm:$0xff] }
  0x27   : > { %478 = vmatprep.subr.bf16.mxu0 %v615_v5  ;;  %484 = vmatprep.mubr.msk.bf16.mxu0 %vm616_vm0, %v615_v5  ;;  %v551_v8 = vld [vmem:[%s222_s24 + $0x10] ss:$0 sps:$4 sm:$0x33]   ;;  %v552_v11 = vld [vmem:[%s222_s24 + $0x8] sm:$0xff]   ;;  %v553_v12 = vld [vmem:[%s222_s24] sm:$0xff]   ;;  %vm282_vm2 = vcmask 293888  }
  0x28   : > { %550 = vset.pattern.permute.xlu0 %v617_v6  ;;  %v288_v10 = vsel %vm286_vm1, %v551_v8, 0  ;;  %v554_v13 = vld [vmem:[%s743_s0] sm:$0xff]   ;;  %s470_s4 = sshll.u32 (%p686_p6), %s601_s15, 2 }
  0x29   : > { %254 = vperm.xlu0 %550, %v250_v7   ;;  %479 = vmatpush3.bf16.msra.mxu0 %v288_v10  ;;  %s345_s5 = sadd.s32 (%p686_p6), %s597_s14, %s470_s4 }
  0x2a   : > { %480 = vmatprep.subr.bf16.mxu0 %v615_v5  ;;  %s471_s6 = sshll.u32 (%p686_p6), %s345_s5, 3 }
  0x2b   : > { %s347_s9 = scalar_lea.vmem (%p686_p6), %s746_s3, %s471_s6 }
  0x2d   : > { %259 = vperm.xlu0 %550, %v251_v9   ;;  %481 = vmatpush3.bf16.msra.mxu0 %v552_v11 }
  0x2e   : > { %482 = vmatprep.subr.bf16.mxu0 %v615_v5 }
  0x31   : > { %483 = vmatpush3.bf16.msra.mxu0 %v553_v12 }
  0x34   : > { %485 = vmatmul.mubr.msk.bf16.vlgmr.msra.gmra.mxu0 %vm282_vm2, %v554_v13 }
  0xa4   : > { %v255_v14 = vpop.permute.xlu0 %254 }
  0xa8   : > { %v260_v19 = vpop.permute.xlu0 %259 }
  0xf4   : > { %v324_v15 = vpop.f32.mrf.mxu0 }
  0xf5   : > { %v325_v16 = vadd.f32 %v324_v15, %v255_v14 }
  0xf6   : > { %v486_v17 = vpop.f32.mrf.mxu0 }
  0xf7   : > { %v331_v18 = vmax.f32 %v325_v16, 0.0  ;;  %555 = vtanh.f32 %v325_v16 }
  0xf8   : > { %v327_v20 = vpop.f32.mrf.mxu0 }
  0xf9   : > { %332 = vst [vmem:[%s241_s30] sm:$0xf] %v331_v18  ;;  %v328_v21 = vadd.f32 %v327_v20, %v260_v19 }
  0xfa   : > { %v487_v22 = vpop.f32.mrf.mxu0 }
  0xfb   : > { %557 = vtanh.f32 %v328_v21 }
 0x104   : > { %v556_v23 = vpop.eup %555 }
 0x105   : > { %335 = vst [vmem:[%s241_s30] sm:$0xf0] %v556_v23  ;;  %343 = sbr.rel (!%p686_p6) target bundleno = 274 (0x112), region = 77 }
 0x108   : > { %v558_v24 = vpop.eup %557 }
 0x109   : > { %336 = vst [vmem:[%s241_s30 + $0x8] sm:$0xff] %v558_v24 }
 0x10c   : > { %v378_v25 = vld [vmem:[%s241_s30] sm:$0xff] }
 0x10d   : > { %379 = vst [vmem:[%s347_s9] sm:$0xff] %v378_v25 }
 0x110   : > { %v380_v26 = vld [vmem:[%s241_s30 + $0x8] sm:$0xff] }
 0x111   : > { %381 = vst [vmem:[%s347_s9 + $0x10] sm:$0xff] %v380_v26 }
 0x112 PF: > { %s13_s18 = sadd.s32 1, %s613_s18   ;;  %s748_s12 = smov %s593_s13 }
 0x113   : > { %p10_p12 = scmp.ge.s32.totalorder %s13_s18, 6   ;;  %s749_s13 = smov %s694_s27 }
 0x114   : > { %s750_s14 = smov %s605_s16  ;;  %s751_s15 = smov %s609_s17 }
 0x115   : > { %s752_s16 = smov %s755_s19  ;;  %s753_s17 = smov %s759_s20 }
 0x116   :  { %12 = sbr.rel (!%p10_p12) target bundleno = 4 (0x4), region = 146 }

// kernel: dsc3block_forward.5
= control target key start
LH: loop header
LB: loop body
LE: loop exit
PB: predicated region body
PF: predicated region fallthrough
CT: control target
= control target key end

     0   :  { %s1515_s24 = smov 0   ;;  %s1978_s0 = inlined_call_operand.vmem [shape: f32[2,3,256], index: 0, kind: input, shape index: {}]   ;;  %s1979_s1 = inlined_call_operand.vmem [shape: bf16[64,16], index: 1, kind: input, shape index: {}]   ;;  %s1980_s2 = inlined_call_operand.vmem [shape: bf16[16,768], index: 2, kind: input, shape index: {}]   ;;  %s1981_s3 = inlined_call_operand.vmem [shape: bf16[3,4,64], index: 3, kind: input, shape index: {}]   ;;  %s1982_s4 = inlined_call_operand.vmem [shape: f32[4,1], index: 4, kind: input, shape index: {}]   ;;  %s1983_s5 = inlined_call_operand.vmem [shape: f32[4,1], index: 5, kind: input, shape index: {}]   ;;  %s1984_s6 = inlined_call_operand.vmem [shape: f32[4,1], index: 6, kind: input, shape index: {}]   ;;  %s1985_s7 = inlined_call_operand.vmem [shape: f32[2,4,256], index: 7, kind: output, shape index: {}]  }
   0x1 LB: > { %s1363_s25 = sadd.s32 4294967295, %s1471_s24   ;;  %p1367_p0 = scmp.ge.s32.totalorder %s1471_s24, 1  ;;  %s1471_s24 = sphi %s1515_s24, %s17_s24  }
   0x2   : > { %p237_p1 = scmp.lt.s32.totalorder %s1471_s24, 3 }
   0x4   : > { %p238_p2 = pnand %p1367_p0, %p237_p1 }
   0x5   : > { %p269_p3 = scmp.lt.s32.totalorder (!%p238_p2), %s1363_s25, 1 }
   0x6   : > { %241 = sbr.rel (%p238_p2) target bundleno = 953 (0x3b9), region = 48 }
   0xb   : > { %v1450_v0 = vld [vmem:[%s1980_s2 + $0x4] ss:$24 sps:$4 sm:$0xff]   ;;  %v1473_v2 = vmov 0   ;;  %v1454_v3 = vld [vmem:[%s1980_s2] ss:$24 sps:$4 sm:$0xff]   ;;  %vm345_vm0 = vcmask 130048   ;;  %v577_v21 = vlaneseq }
   0xc   : > { %v1452_v1 = vld [vmem:[%s1980_s2 + $0xc] ss:$24 sps:$4 sm:$0xff]   ;;  %390 = vmatprep.mubr.bf16.mxu0 %v1473_v2  ;;  %463 = vmatprep.mubr.bf16.mxu1 %v1473_v2  ;;  %v1455_v4 = vld [vmem:[%s1980_s2 + $0x8] ss:$24 sps:$4 sm:$0xff]   ;;  %v1458_v9 = vld [vmem:[%s1979_s1 + $0x10] sm:$0xff]   ;;  %s1987_s25 = smov (!%p269_p3, %s1363_s25), 1 }
   0xd   : > { %372 = vmatprep.subr.bf16.mxu0 %v1450_v0  ;;  %1448 = vset.pattern.permute.xlu0 %v1473_v2  ;;  %v1456_v5 = vld [vmem:[%s1979_s1] sm:$0xff]   ;;  %v1460_v6 = vld [vmem:[%s1980_s2 + $0x10] ss:$24 sps:$4 sm:$0xff]   ;;  %v1462_v7 = vld [vmem:[%s1980_s2 + $0x14] ss:$24 sps:$4 sm:$0xff]   ;;  %s1428_s27 = sshll.u32 %s1987_s25, 3 }
   0xe   : > { %445 = vmatprep.subr.bf16.mxu1 %v1452_v1  ;;  %1449 = vset.pattern.permute.xlu1 %v1473_v2  ;;  %v1457_v8 = vld [vmem:[%s1979_s1 + $0x8] sm:$0xff]   ;;  %v1459_v10 = vld [vmem:[%s1979_s1 + $0x18] sm:$0xff]   ;;  %v1239_v11 = vld [vmem:[%s1982_s4] sm:$0xf]  ;;  %s273_s30 = scalar_lea.vmem %s1978_s0, %s1428_s27  ;;  %v1622_v27 = vshrl.u32 %v577_v21, 7  ;;  %v1474_v63 = vmov 0.0   ;;  %s278_s22 = scalar_lea.vmem %s1985_s7, %s1428_s27 }
   0xf   : > { %373 = vmatpush1.bf16.msra.mxu0 %v1454_v3  ;;  %446 = vmatpush1.bf16.msra.mxu1 %v1455_v4  ;;  %v1596_v12 = vld [vmem:[%s273_s30] sm:$0x77]  ;;  %vm669_vm13 = vcmask 523264  }
  0x10   : > { %518 = vmatprep.subr.bf16.mxu0 %v1462_v7  ;;  %1242 = vperm.xlu0 %1448, %v1239_v11   ;;  %v580_v13 = vfloor.f32 %v1596_v12  ;;  %v1629_v31 = vsub.s32 1, %v1622_v27  ;;  %v1634_v33 = vsub.s32 5, %v1622_v27  ;;  %v1643_v37 = vsub.s32 4, %v1622_v27 }
  0x11   : > { %v1650_v40 = vsub.s32 0, %v1622_v27  ;;  %v1668_v55 = vadd.s32 8, %v1622_v27 }
  0x12   : > { %1382 = vmatmul.mubr.msk.bf16.vlgmr.msra.gmra.mxu0 %vm345_vm0, %v1456_v5  ;;  %1386 = vmatmul.mubr.msk.bf16.vlgmr.msra.gmra.mxu1 %vm345_vm0, %v1456_v5  ;;  %v1603_v16 = vmax.f32 %v580_v13, 0.0  ;;  %v1631_v32 = vadd.f32 1.0, %v580_v13 }
  0x13   : > { %400 = vmatprep.mubr.bf16.mxu0 %v1473_v2  ;;  %473 = vmatprep.mubr.bf16.mxu1 %v1473_v2 }
  0x14   : > { %519 = vmatpush1.bf16.msra.mxu0 %v1460_v6  ;;  %v583_v22 = vmin.f32 %v1603_v16, 15.0  ;;  %v585_v42 = vmax.f32 %v1631_v32, 0.0 }
  0x16   : > { %v1430_v28 = vtrunc.f32 %v583_v22  ;;  %v586_v51 = vmin.f32 %v585_v42, 15.0 }
  0x18   : > { %v1640_v36 = vcvt.f32.s32 %v1430_v28  ;;  %v1432_v60 = vtrunc.f32 %v586_v51 }
  0x1a   : > { %1383 = vmatmul.mubr.msk.bf16.gmra.mxu0 %vm345_vm0, %v1457_v8  ;;  %1387 = vmatmul.mubr.msk.bf16.gmra.mxu1 %vm345_vm0, %v1457_v8  ;;  %v812_v41 = vrot.slane %v1640_v36, %v1629_v31  ;;  %v816_v43 = vrot.slane %v1640_v36, %v1634_v33  ;;  %v599_v46 = vrot.slane %v1640_v36, %v1643_v37  ;;  %v1684_v7 = vcvt.f32.s32 %v1432_v60 }
  0x1b   : > { %410 = vmatprep.mubr.bf16.mxu0 %v1473_v2  ;;  %483 = vmatprep.mubr.bf16.mxu1 %v1473_v2  ;;  %v595_v49 = vrot.slane %v1640_v36, %v1650_v40 }
  0x1c   : > { %v820_v50 = vrot.slane %v812_v41, %v1629_v31  ;;  %v824_v52 = vrot.slane %v816_v43, %v1629_v31  ;;  %v607_v56 = vrot.slane %v599_v46, %v1650_v40 }
  0x1d   : > { %v603_v59 = vrot.slane %v595_v49, %v1650_v40 }
  0x1e   : > { %vm825_vm1 = vcmp.eq.s32.totalorder %v1622_v27, %v820_v50  ;;  %vm827_vm2 = vcmp.eq.s32.totalorder %v1668_v55, %v820_v50  ;;  %vm826_vm3 = vcmp.eq.s32.totalorder %v1622_v27, %v824_v52  ;;  %vm828_vm4 = vcmp.eq.s32.totalorder %v1668_v55, %v824_v52 }
  0x1f   : > { %v1404_v0 = vsel %vm825_vm1, 1.0, %v1474_v63  ;;  %v1406_v1 = vsel %vm827_vm2, 1.0, %v1474_v63  ;;  %vm609_vm5 = vcmp.eq.s32.totalorder %v1622_v27, %v607_v56  ;;  %vm611_vm6 = vcmp.eq.s32.totalorder %v1668_v55, %v607_v56 }
  0x20   : > { %vm608_vm7 = vcmp.eq.s32.totalorder %v1622_v27, %v603_v59  ;;  %vm610_vm8 = vcmp.eq.s32.totalorder %v1668_v55, %v603_v59  ;;  %v1407_v6 = vsel %vm828_vm4, 1.0, %v1474_v63  ;;  %v1395_v11 = vsel %vm609_vm5, 1.0, %v1474_v63 }
  0x21   : > { %v1397_v13 = vsel %vm611_vm6, 1.0, %v1474_v63  ;;  %v1394_v22 = vsel %vm608_vm7, 1.0, %v1474_v63  ;;  %v1396_v28 = vsel %vm610_vm8, 1.0, %v1474_v63  ;;  %v629_v50 = vrot.slane %v1684_v7, %v1643_v37 }
  0x22   : > { %1384 = vmatmul.mubr.msk.bf16.gmra.mxu0 %vm345_vm0, %v1458_v9  ;;  %1388 = vmatmul.mubr.msk.bf16.gmra.mxu1 %vm345_vm0, %v1458_v9  ;;  %v621_v52 = vpack.c.bf16 %v1397_v13, %v1395_v11 }
  0x23   : > { %420 = vmatprep.mubr.bf16.mxu0 %v1473_v2  ;;  %493 = vmatprep.mubr.bf16.mxu1 %v1473_v2 }
  0x2a   : > { %1385 = vmatmul.mubr.msk.bf16.gmra.mxu0 %vm345_vm0, %v1459_v10  ;;  %1389 = vmatmul.mubr.msk.bf16.gmra.mxu1 %vm345_vm0, %v1459_v10 }
  0x2b   : > { %536 = vmatprep.mubr.bf16.mxu0 %v1473_v2  ;;  %705 = vmatprep.mubr.bf16.mxu1 %v1473_v2 }
  0x32   : > { %1390 = vmatmul.mubr.msk.bf16.vlgmr.msra.gmra.mxu0 %vm345_vm0, %v1456_v5  ;;  %v1405_v5 = vsel %vm826_vm3, 1.0, %v1474_v63 }
  0x33   : > { %546 = vmatprep.mubr.bf16.mxu0 %v1473_v2  ;;  %v1694_v41 = vpack.c.bf16 %v1407_v6, %v1405_v5 }
  0x3a   : > { %1391 = vmatmul.mubr.msk.bf16.gmra.mxu0 %vm345_vm0, %v1457_v8 }
  0x3b   : > { %556 = vmatprep.mubr.bf16.mxu0 %v1473_v2 }
  0x42   : > { %1392 = vmatmul.mubr.msk.bf16.gmra.mxu0 %vm345_vm0, %v1458_v9 }
  0x43   : > { %566 = vmatprep.mubr.bf16.mxu0 %v1473_v2 }
  0x4a   : > { %1393 = vmatmul.mubr.msk.bf16.gmra.mxu0 %vm345_vm0, %v1459_v10  ;;  %v1686_v10 = vpack.c.bf16 %v1406_v1, %v1404_v0  ;;  %v1710_v0 = vpack.c.bf16 %v1396_v28, %v1394_v22 }
  0x4b   : > { %922 = vmatprep.mubr.bf16.mxu0 %v1473_v2 }
  0xd2   : > { %v1599_v14 = vpop.f32.mrf.mxu0  ;;  %v1601_v15 = vpop.f32.mrf.mxu1 }
  0xd4   : > { %v1605_v17 = vpop.f32.mrf.mxu0  ;;  %v1607_v18 = vpop.f32.mrf.mxu1 }
  0xd6   : > { %v1609_v19 = vpop.f32.mrf.mxu0  ;;  %v1611_v20 = vpop.f32.mrf.mxu1 }
  0xd8   : > { %v1614_v23 = vpop.f32.mrf.mxu0  ;;  %v1616_v24 = vpop.f32.mrf.mxu1 }
  0xd9   : > { %v1767_v11 = vpack.c.bf16 %v1616_v24, %v1607_v18  ;;  %v1781_v18 = vpack.c.bf16 %v1609_v19, %v1599_v14  ;;  %v1785_v24 = vpack.c.bf16 %v1611_v20, %v1601_v15  ;;  %v1801_v15 = vsub.s32 6, %v1622_v27 }
  0xda   : > { %v1618_v25 = vpop.f32.mrf.mxu0  ;;  %v1620_v26 = vpop.f32.mrf.mxu1 }
  0xdc   : > { %v1624_v29 = vpop.f32.mrf.mxu0  ;;  %v1626_v30 = vpop.f32.mrf.mxu1 }
  0xde   : > { %v1636_v34 = vpop.f32.mrf.mxu0  ;;  %v1638_v35 = vpop.f32.mrf.mxu1 }
  0xe0   : > { %v1645_v38 = vpop.f32.mrf.mxu0  ;;  %v1647_v39 = vpop.f32.mrf.mxu1 }
  0xe2   : > { %v1657_v44 = vpop.f32.mrf.mxu0  ;;  %v485_v45 = vpop.f32.mrf.mxu1 }
  0xe4   : > { %v414_v47 = vpop.f32.mrf.mxu0  ;;  %v487_v48 = vpop.f32.mrf.mxu1 }
  0xe6   : > { %v416_v53 = vpop.f32.mrf.mxu0  ;;  %v489_v54 = vpop.f32.mrf.mxu1 }
  0xe8   : > { %v418_v57 = vpop.f32.mrf.mxu0  ;;  %v491_v58 = vpop.f32.mrf.mxu1 }
  0xe9   : > { %v1696_v43 = vpack.c.bf16 %v491_v58, %v487_v48  ;;  %v1702_v56 = vpack.c.bf16 %v418_v57, %v414_v47  ;;  %v625_v48 = vrot.slane %v1684_v7, %v1650_v40  ;;  %v1714_v58 = vpack.c.bf16 %v489_v54, %v485_v45 }
  0xea   : > { %v422_v61 = vpop.f32.mrf.mxu0  ;;  %v495_v62 = vpop.f32.mrf.mxu1  ;;  %v1720_v47 = vpack.c.bf16 %v1647_v39, %v1626_v30  ;;  %v637_v45 = vrot.slane %v629_v50, %v1650_v40  ;;  %v1731_v54 = vpack.c.bf16 %v416_v53, %v1657_v44  ;;  %v1737_v30 = vpack.c.bf16 %v1645_v38, %v1624_v29 }
  0xeb   : > { %v884_v57 = vmul.bf16 %v1696_v43, %v1694_v41  ;;  %v666_v39 = vmul.bf16 %v1702_v56, %v621_v52  ;;  %v883_v44 = vmul.bf16 %v1714_v58, %v1686_v10  ;;  %v633_v53 = vrot.slane %v625_v48, %v1650_v40 }
  0xec   : > { %v424_v3 = vpop.f32.mrf.mxu0  ;;  %v497_v4 = vpop.f32.mrf.mxu1  ;;  %v882_v29 = vmul.bf16 %v1720_v47, %v1694_v41  ;;  %vm639_vm9 = vcmp.eq.s32.totalorder %v1622_v27, %v637_v45  ;;  %vm641_vm10 = vcmp.eq.s32.totalorder %v1668_v55, %v637_v45  ;;  %v664_v13 = vmul.bf16 %v1737_v30, %v621_v52 }
  0xed   : > { %vm638_vm11 = vcmp.eq.s32.totalorder %v1622_v27, %v633_v53  ;;  %vm640_vm12 = vcmp.eq.s32.totalorder %v1668_v55, %v633_v53  ;;  %v1796_v50 = vsub.s32 2, %v1622_v27  ;;  %v661_v48 = vmul.bf16 %v1781_v18, %v1710_v0 }
  0xee   : > { %v426_v8 = vpop.f32.mrf.mxu0  ;;  %v499_v9 = vpop.f32.mrf.mxu1  ;;  %v1398_v19 = vsel %vm638_vm11, 1.0, %v1474_v63  ;;  %v1400_v20 = vsel %vm640_vm12, 1.0, %v1474_v63 }
  0xef   : > { %v1690_v21 = vpack.c.bf16 %v499_v9, %v495_v62  ;;  %v1700_v51 = vpack.c.bf16 %v426_v8, %v422_v61  ;;  %v1744_v8 = vpack.c.bf16 %v1638_v35, %v1620_v26  ;;  %v1756_v26 = vpack.c.bf16 %v1636_v34, %v1618_v25 }
  0xf0   : > { %v428_v46 = vpop.f32.mrf.mxu0  ;;  %v501_v49 = vpop.f32.mrf.mxu1  ;;  %v665_v35 = vmul.bf16 %v1731_v54, %v1710_v0  ;;  %v1763_v9 = vpack.c.bf16 %v1614_v23, %v1605_v17  ;;  %v1399_v17 = vsel %vm639_vm9, 1.0, %v1474_v63  ;;  %v1401_v34 = vsel %vm641_vm10, 1.0, %v1474_v63 }
  0xf1   : > { %v1704_v59 = vpack.c.bf16 %v428_v46, %v424_v3  ;;  %v1706_v60 = vpack.c.bf16 %v501_v49, %v497_v4  ;;  %v885_v61 = vmul.bf16 %v1690_v21, %v1686_v10  ;;  %v667_v5 = vmul.bf16 %v1700_v51, %v1710_v0 }
  0xf2   : > { %v1708_v62 = vpop.f32.mrf.mxu0  ;;  %v881_v25 = vmul.bf16 %v1744_v8, %v1686_v10  ;;  %v663_v28 = vmul.bf16 %v1756_v26, %v1710_v0  ;;  %v662_v46 = vmul.bf16 %v1763_v9, %v621_v52  ;;  %v880_v49 = vmul.bf16 %v1767_v11, %v1694_v41 }
  0xf3   : > { %v668_v1 = vmul.bf16 %v1704_v59, %v621_v52  ;;  %v886_v3 = vmul.bf16 %v1706_v60, %v1694_v41  ;;  %v1809_v52 = vpack.c.bf16 %v1401_v34, %v1399_v17  ;;  %v842_v0 = vrot.slane %v1684_v7, %v1629_v31 }
  0xf4   : > { %v1727_v4 = vpop.f32.mrf.mxu0  ;;  %vm1247_vm10 = vcmask 1043456  }
  0xf5   : > { %681 = vmatprep.subr.bf16.mxu1 %v668_v1  ;;  %898 = vmatprep.subr.bf16.mxu0 %v886_v3  ;;  %v721_v1 = vmul.bf16 %v1704_v59, %v1809_v52  ;;  %v1027_v3 = vrot.slane %v1640_v36, %v1796_v50  ;;  %v1837_v59 = vld [vmem:[%s1981_s3 + $0x2] sm:$0x3]  ;;  %v850_v17 = vrot.slane %v842_v0, %v1629_v31 }
  0xf6   : > { %v1740_v6 = vpop.f32.mrf.mxu0  ;;  %682 = vmatpush1.bf16.msra.mxu1 %v667_v5  ;;  %899 = vmatpush1.bf16.msra.mxu0 %v885_v61  ;;  %v879_v61 = vmul.bf16 %v1785_v24, %v1686_v10  ;;  %v1825_v5 = vpack.c.bf16 %v1400_v20, %v1398_v19  ;;  %v1832_v10 = vld [vmem:[%s1981_s3] sm:$0x3]  ;;  %v717_v34 = vmul.bf16 %v1737_v30, %v1809_v52 }
  0xf7   : > { %683 = vmatprep.subr.bf16.mxu1 %v666_v39  ;;  %900 = vmatprep.subr.bf16.mxu0 %v884_v57  ;;  %v846_v57 = vrot.slane %v1684_v7, %v1634_v33  ;;  %v1031_v39 = vrot.slane %v1640_v36, %v1801_v15  ;;  %vm855_vm4 = vcmp.eq.s32.totalorder %v1622_v27, %v850_v17 }
  0xf8   : > { %v1751_v38 = vpop.f32.mrf.mxu0  ;;  %v720_v53 = vmul.bf16 %v1700_v51, %v1825_v5  ;;  %vm857_vm5 = vcmp.eq.s32.totalorder %v1668_v55, %v850_v17  ;;  %v1061_v17 = vrot.slane %v1684_v7, %v1801_v15 }
  0xf9   : > { %v854_v36 = vrot.slane %v846_v57, %v1629_v31  ;;  %v1410_v0 = vsel %vm857_vm5, 1.0, %v1474_v63 }
  0xfa   : > { %v1770_v22 = vpop.f32.mrf.mxu0  ;;  %684 = vmatpush1.bf16.msra.mxu1 %v665_v35  ;;  %901 = vmatpush1.bf16.msra.mxu0 %v883_v44  ;;  %v1035_v35 = vrot.slane %v1027_v3, %v1796_v50 }
  0xfb   : > { %685 = vmatprep.subr.bf16.mxu1 %v664_v13  ;;  %902 = vmatprep.subr.bf16.mxu0 %v882_v29  ;;  %v719_v29 = vmul.bf16 %v1702_v56, %v1809_v52  ;;  %vm856_vm14 = vcmp.eq.s32.totalorder %v1622_v27, %v854_v36  ;;  %v718_v56 = vmul.bf16 %v1731_v54, %v1825_v5 }
  0xfc   : > { %v1777_v23 = vpop.f32.mrf.mxu0  ;;  %vm858_vm15 = vcmp.eq.s32.totalorder %v1668_v55, %v854_v36  ;;  %vm1040_vm0 = vcmp.eq.s32.totalorder %v1622_v27, %v1035_v35  ;;  %vm1042_vm1 = vcmp.eq.s32.totalorder %v1668_v55, %v1035_v35  ;;  %v1409_v54 = vsel %vm856_vm14, 1.0, %v1474_v63 }
  0xfd   : > { %v1411_v30 = vsel %vm858_vm15, 1.0, %v1474_v63  ;;  %v1415_v19 = vsel %vm1040_vm0, 1.0, %v1474_v63  ;;  %v1417_v20 = vsel %vm1042_vm1, 1.0, %v1474_v63 }
  0xfe   : > { %v1798_v14 = vpop.f32.mrf.mxu0  ;;  %686 = vmatpush1.bf16.msra.mxu1 %v663_v28  ;;  %903 = vmatpush1.bf16.msra.mxu0 %v881_v25  ;;  %v1039_v25 = vrot.slane %v1031_v39, %v1796_v50  ;;  %v1408_v39 = vsel %vm855_vm4, 1.0, %v1474_v63  ;;  %v1052_v36 = vpack.c.bf16 %v1417_v20, %v1415_v19 }
  0xff   : > { %687 = vmatprep.subr.bf16.mxu1 %v662_v46  ;;  %904 = vmatprep.subr.bf16.mxu0 %v880_v49  ;;  %v716_v49 = vmul.bf16 %v1756_v26, %v1825_v5  ;;  %v868_v26 = vpack.c.bf16 %v1411_v30, %v1409_v54  ;;  %v1057_v54 = vrot.slane %v1684_v7, %v1796_v50 }
 0x100   : > { %v1811_v41 = vpop.f32.mrf.mxu0  ;;  %vm1041_vm2 = vcmp.eq.s32.totalorder %v1622_v27, %v1039_v25  ;;  %vm1043_vm3 = vcmp.eq.s32.totalorder %v1668_v55, %v1039_v25 }
 0x101   : > { %v1418_v57 = vsel %vm1043_vm3, 1.0, %v1474_v63  ;;  %v938_v25 = vmul.bf16 %v1706_v60, %v868_v26  ;;  %v1065_v7 = vrot.slane %v1057_v54, %v1796_v50 }
 0x102   : > { %v1823_v45 = vpop.f32.mrf.mxu0  ;;  %688 = vmatpush1.bf16.msra.mxu1 %v661_v48  ;;  %905 = vmatpush1.bf16.msra.mxu0 %v879_v61  ;;  %v715_v48 = vmul.bf16 %v1763_v9, %v1809_v52  ;;  %v1416_v61 = vsel %vm1041_vm2, 1.0, %v1474_v63 }
 0x103   : > { %730 = vmatprep.subr.bf16.mxu1 %v721_v1  ;;  %v1053_v9 = vpack.c.bf16 %v1418_v57, %v1416_v61  ;;  %vm1070_vm8 = vcmp.eq.s32.totalorder %v1622_v27, %v1065_v7  ;;  %vm1072_vm9 = vcmp.eq.s32.totalorder %v1668_v55, %v1065_v7 }
 0x104   : > { %v560_v44 = vpop.f32.mrf.mxu0 }
 0x105   : > { %1402 = vmatmul.mubr.msk.bf16.vlgmr.msra.gmra.mxu1 %vm669_vm13, %v1832_v10  ;;  %1413 = vmatmul.mubr.msk.bf16.vlgmr.msra.gmra.mxu0 %vm669_vm13, %v1837_v59 }
 0x106   : > { %v562_v13 = vpop.f32.mrf.mxu0  ;;  %731 = vmatpush1.bf16.msra.mxu1 %v720_v53  ;;  %754 = vmatprep.mubr.bf16.mxu1 %v1473_v2 }
 0x107   : > { %732 = vmatprep.subr.bf16.mxu1 %v719_v29  ;;  %1137 = vmatprep.mubr.bf16.mxu0 %v1473_v2  ;;  %v714_v29 = vmul.bf16 %v1781_v18, %v1825_v5  ;;  %v1090_v30 = vpack.c.bf16 %v562_v13, %v1823_v45  ;;  %v1089_v5 = vpack.c.bf16 %v1811_v41, %v1777_v23 }
 0x108   : > { %v564_v51 = vpop.f32.mrf.mxu0  ;;  %v932_v13 = vmul.bf16 %v1767_v11, %v868_v26 }
 0x109   : > { %v1883_v52 = vpack.c.bf16 %v564_v51, %v560_v44  ;;  %v936_v44 = vmul.bf16 %v1696_v43, %v868_v26  ;;  %v1069_v51 = vrot.slane %v1061_v17, %v1796_v50  ;;  %v1098_v45 = vmul.bf16 %v1090_v30, %v1052_v36 }
 0x10a   : > { %v568_v28 = vpop.f32.mrf.mxu0  ;;  %733 = vmatpush1.bf16.msra.mxu1 %v718_v56  ;;  %v1087_v43 = vpack.c.bf16 %v1751_v38, %v1727_v4  ;;  %v1097_v41 = vmul.bf16 %v1089_v5, %v1053_v9 }
 0x10b   : > { %734 = vmatprep.subr.bf16.mxu1 %v717_v34  ;;  %v867_v34 = vpack.c.bf16 %v1410_v0, %v1408_v39  ;;  %v1099_v60 = vmul.bf16 %v1883_v52, %v1053_v9  ;;  %vm1071_vm6 = vcmp.eq.s32.totalorder %v1622_v27, %v1069_v51  ;;  %vm1073_vm7 = vcmp.eq.s32.totalorder %v1668_v55, %v1069_v51 }
 0x10c   : > { %v570_v46 = vpop.f32.mrf.mxu0  ;;  %v1422_v38 = vsel %vm1073_vm7, 1.0, %v1474_v63  ;;  %v1419_v27 = vsel %vm1070_vm8, 1.0, %v1474_v63  ;;  %v1421_v55 = vsel %vm1072_vm9, 1.0, %v1474_v63 }
 0x10d   : > { %v937_v18 = vmul.bf16 %v1690_v21, %v867_v34  ;;  %v1088_v21 = vpack.c.bf16 %v1798_v14, %v1770_v22  ;;  %v935_v23 = vmul.bf16 %v1714_v58, %v867_v34  ;;  %v1086_v58 = vpack.c.bf16 %v1740_v6, %v1708_v62 }
 0x10e   : > { %v572_v1 = vpop.f32.mrf.mxu0  ;;  %735 = vmatpush1.bf16.msra.mxu1 %v716_v49  ;;  %v933_v4 = vmul.bf16 %v1744_v8, %v867_v34  ;;  %v1095_v14 = vmul.bf16 %v1087_v43, %v1053_v9  ;;  %v931_v6 = vmul.bf16 %v1785_v24, %v867_v34  ;;  %v1423_v49 = vld [vmem:[%s1981_s3 + $0x4] sm:$0x3]  ;;  %v1082_v19 = vpack.c.bf16 %v1421_v55, %v1419_v27 }
 0x10f   : > { %v1877_v3 = vpack.c.bf16 %v572_v1, %v568_v28  ;;  %736 = vmatprep.subr.bf16.mxu1 %v715_v48  ;;  %v1096_v22 = vmul.bf16 %v1088_v21, %v1052_v36 }
 0x110   : > { %v574_v53 = vpop.f32.mrf.mxu0  ;;  %v1150_v24 = vmul.bf16 %v1090_v30, %v1082_v19  ;;  %v1148_v48 = vmul.bf16 %v1088_v21, %v1082_v19  ;;  %v1146_v57 = vmul.bf16 %v1086_v58, %v1082_v19 }
 0x111   : > { %v1093_v35 = vpack.c.bf16 %v574_v53, %v570_v46  ;;  %v1100_v56 = vmul.bf16 %v1877_v3, %v1052_v36  ;;  %v1094_v46 = vmul.bf16 %v1086_v58, %v1052_v36  ;;  %v1152_v11 = vmul.bf16 %v1877_v3, %v1082_v19 }
 0x112   : > { %737 = vmatpush1.bf16.msra.mxu1 %v714_v29 }
 0x113   : > { %v1101_v28 = vmul.bf16 %v1093_v35, %v1053_v9  ;;  %947 = vmatprep.subr.bf16.mxu1 %v938_v25  ;;  %v590_v9 = vmin.f32 %v1603_v16, 16.0 }
 0x115   : > { %1113 = vmatprep.subr.bf16.mxu0 %v1101_v28  ;;  %1403 = vmatmul.mubr.msk.bf16.vlgmr.msra.gmra.mxu1 %vm669_vm13, %v1832_v10  ;;  %v934_v10 = vmul.bf16 %v1720_v47, %v868_v26  ;;  %v1420_v47 = vsel %vm1071_vm6, 1.0, %v1474_v63  ;;  %v591_v17 = vsub.f32 %v1596_v12, %v590_v9 }
 0x116   : > { %1114 = vmatpush1.bf16.msra.mxu0 %v1100_v56  ;;  %948 = vmatpush1.bf16.msra.mxu1 %v937_v18  ;;  %v1083_v62 = vpack.c.bf16 %v1422_v38, %v1420_v47 }
 0x117   : > { %1115 = vmatprep.subr.bf16.mxu0 %v1099_v60  ;;  %949 = vmatprep.subr.bf16.mxu1 %v936_v44  ;;  %v790_v34 = vrot.slane %v591_v17, %v1650_v40  ;;  %v794_v54 = vrot.slane %v591_v17, %v1643_v37  ;;  %v1005_v44 = vrot.slane %v591_v17, %v1629_v31 }
 0x118   : > { %971 = vmatprep.mubr.bf16.mxu1 %v1473_v2  ;;  %v1153_v8 = vmul.bf16 %v1093_v35, %v1083_v62  ;;  %v1151_v63 = vmul.bf16 %v1883_v52, %v1083_v62  ;;  %v1149_v20 = vmul.bf16 %v1089_v5, %v1083_v62  ;;  %v1147_v61 = vmul.bf16 %v1087_v43, %v1083_v62 }
 0x119   : > { %v588_v35 = vmin.f32 %v585_v42, 16.0  ;;  %v800_v18 = vrot.slane %v790_v34, %v1650_v40  ;;  %v804_v60 = vrot.slane %v794_v54, %v1650_v40  ;;  %v1009_v21 = vrot.slane %v591_v17, %v1634_v33 }
 0x11a   : > { %1116 = vmatpush1.bf16.msra.mxu0 %v1098_v45  ;;  %950 = vmatpush1.bf16.msra.mxu1 %v935_v23  ;;  %v1015_v47 = vrot.slane %v1005_v44, %v1629_v31 }
 0x11b   : > { %1117 = vmatprep.subr.bf16.mxu0 %v1097_v41  ;;  %951 = vmatprep.subr.bf16.mxu1 %v934_v10  ;;  %v589_v56 = vsub.f32 %v588_v35, %v1596_v12 }
 0x11d   : > { %v767_v28 = vrot.slane %v589_v56, %v1650_v40  ;;  %v771_v30 = vrot.slane %v589_v56, %v1643_v37  ;;  %v983_v16 = vrot.slane %v589_v56, %v1629_v31  ;;  %v987_v12 = vrot.slane %v589_v56, %v1634_v33 }
 0x11e   : > { %1118 = vmatpush1.bf16.msra.mxu0 %v1096_v22  ;;  %952 = vmatpush1.bf16.msra.mxu1 %v933_v4  ;;  %v1198_v41 = vrot.slane %v589_v56, %v1796_v50  ;;  %v1202_v55 = vrot.slane %v589_v56, %v1801_v15 }
 0x11f   : > { %1119 = vmatprep.subr.bf16.mxu0 %v1095_v14  ;;  %953 = vmatprep.subr.bf16.mxu1 %v932_v13  ;;  %v777_v42 = vrot.slane %v767_v28, %v1650_v40  ;;  %v781_v37 = vrot.slane %v771_v30, %v1650_v40  ;;  %v993_v23 = vrot.slane %v983_v16, %v1629_v31 }
 0x120   : > { %v997_v4 = vrot.slane %v987_v12, %v1629_v31  ;;  %v1019_v14 = vrot.slane %v1009_v21, %v1629_v31 }
 0x122   : > { %1120 = vmatpush1.bf16.msra.mxu0 %v1094_v46  ;;  %954 = vmatpush1.bf16.msra.mxu1 %v931_v6  ;;  %v1208_v46 = vrot.slane %v1198_v41, %v1796_v50 }
 0x123   : > { %1162 = vmatprep.subr.bf16.mxu1 %v1153_v8 }
 0x125   : > { %1424 = vmatmul.mubr.msk.bf16.vlgmr.msra.gmra.mxu0 %vm669_vm13, %v1423_v49  ;;  %1414 = vmatmul.mubr.msk.bf16.vlgmr.msra.gmra.mxu1 %vm669_vm13, %v1837_v59 }
 0x126   : > { %1163 = vmatpush1.bf16.msra.mxu1 %v1152_v11  ;;  %1186 = vmatprep.mubr.bf16.mxu1 %v1473_v2 }
 0x127   : > { %1164 = vmatprep.subr.bf16.mxu1 %v1151_v63  ;;  %v1212_v63 = vrot.slane %v1202_v55, %v1796_v50 }
 0x12a   : > { %1165 = vmatpush1.bf16.msra.mxu1 %v1150_v24  ;;  %v1224_v24 = vrot.slane %v591_v17, %v1801_v15 }
 0x12b   : > { %1166 = vmatprep.subr.bf16.mxu1 %v1149_v20 }
 0x12e   : > { %1167 = vmatpush1.bf16.msra.mxu1 %v1148_v48 }
 0x12f   : > { %1168 = vmatprep.subr.bf16.mxu1 %v1147_v61 }
 0x132   : > { %1169 = vmatpush1.bf16.msra.mxu1 %v1146_v57 }
 0x135   : > { %1425 = vmatmul.mubr.msk.bf16.vlgmr.msra.gmra.mxu1 %vm669_vm13, %v1423_v49  ;;  %v1220_v49 = vrot.slane %v591_v17, %v1796_v50 }
 0x137   : > { %v1230_v61 = vrot.slane %v1220_v49, %v1796_v50 }
 0x1c5   : > { %v707_v1 = vpop.f32.mrf.mxu1  ;;  %v924_v3 = vpop.f32.mrf.mxu0 }
 0x1c6   : > { %v782_v58 = vmul.f32 %v777_v42, %v707_v1  ;;  %v998_v40 = vmul.f32 %v993_v23, %v924_v3  ;;  %v1234_v3 = vrot.slane %v1224_v24, %v1796_v50  ;;  %v1293_v23 = vld [vmem:[%s1984_s6] sm:$0xf] }
 0x1c7   : > { %v709_v39 = vpop.f32.mrf.mxu1  ;;  %v926_v59 = vpop.f32.mrf.mxu0 }
 0x1c8   : > { %v783_v33 = vmul.f32 %v781_v37, %v709_v39  ;;  %v999_v6 = vmul.f32 %v997_v4, %v926_v59 }
 0x1c9   : > { %v711_v0 = vpop.f32.mrf.mxu1  ;;  %v928_v26 = vpop.f32.mrf.mxu0 }
 0x1cb   : > { %v712_v2 = vpop.f32.mrf.mxu1  ;;  %v929_v36 = vpop.f32.mrf.mxu0 }
 0x1cc   : > { %v1243_v2 = vpop.permute.xlu0 %1242 }
 0x1d5   : > { %v756_v53 = vpop.f32.mrf.mxu1 }
 0x1d6   : > { %v805_v45 = vmul.f32 %v800_v18, %v756_v53 }
 0x1d7   : > { %v758_v29 = vpop.f32.mrf.mxu1 }
 0x1d8   : > { %v806_v22 = vmul.f32 %v804_v60, %v758_v29  ;;  %v807_v27 = vadd.f32 %v805_v45, %v782_v58  ;;  %v1285_v45 = vld [vmem:[%s1983_s5] sm:$0xf] }
 0x1d9   : > { %v760_v52 = vpop.f32.mrf.mxu1 }
 0x1da   : > { %v808_v62 = vadd.f32 %v806_v22, %v783_v33  ;;  %v1000_v19 = vadd.f32 %v998_v40, %v807_v27 }
 0x1db   : > { %v761_v25 = vpop.f32.mrf.mxu1 }
 0x1dc   : > { %v1001_v31 = vadd.f32 %v999_v6, %v808_v62 }
 0x1e5   : > { %v1139_v5 = vpop.f32.mrf.mxu0  ;;  %v973_v32 = vpop.f32.mrf.mxu1 }
 0x1e6   : > { %v1020_v8 = vmul.f32 %v1015_v47, %v973_v32  ;;  %v1213_v48 = vmul.f32 %v1208_v46, %v1139_v5 }
 0x1e7   : > { %v1141_v51 = vpop.f32.mrf.mxu0  ;;  %v975_v7 = vpop.f32.mrf.mxu1 }
 0x1e8   : > { %v1021_v11 = vmul.f32 %v1019_v14, %v975_v7  ;;  %v1022_v20 = vadd.f32 %v1020_v8, %v1000_v19  ;;  %v1214_v1 = vmul.f32 %v1212_v63, %v1141_v51 }
 0x1e9   : > { %v1143_v43 = vpop.f32.mrf.mxu0  ;;  %v977_v10 = vpop.f32.mrf.mxu1 }
 0x1ea   : > { %v1023_v57 = vadd.f32 %v1021_v11, %v1001_v31  ;;  %v1215_v59 = vadd.f32 %v1213_v48, %v1022_v20 }
 0x1eb   : > { %v1144_v38 = vpop.f32.mrf.mxu0  ;;  %v978_v13 = vpop.f32.mrf.mxu1 }
 0x1ec   : > { %v1216_v36 = vadd.f32 %v1214_v1, %v1023_v57 }
 0x1f5   : > { %v1188_v39 = vpop.f32.mrf.mxu1 }
 0x1f6   : > { %v1235_v0 = vmul.f32 %v1230_v61, %v1188_v39 }
 0x1f7   : > { %v1190_v26 = vpop.f32.mrf.mxu1 }
 0x1f8   : > { %v1237_v53 = vadd.f32 %v1235_v0, %v1215_v59  ;;  %v1236_v29 = vmul.f32 %v1234_v3, %v1190_v26 }
 0x1f9   : > { %v1192_v9 = vpop.f32.mrf.mxu1 }
 0x1fa   : > { %v1238_v52 = vadd.f32 %v1236_v29, %v1216_v36  ;;  %v1245_v15 = vadd.f32 %v1243_v2, %v1237_v53 }
 0x1fb   : > { %v1193_v35 = vpop.f32.mrf.mxu1 }
 0x1fc   : > { %v1246_v25 = vadd.f32 %v1243_v2, %v1238_v52  ;;  %v1248_v17 = vsel %vm1247_vm10, %v1245_v15, 0.0 }
 0x1fe   : > { %v1249_v56 = vsel %vm1247_vm10, %v1246_v25, 0.0 }
 0x1ff   : > { %v1250_v34 = vadd.f32 %v1249_v56, %v1248_v17 }
 0x201   : > { %1251 = vadd.xlane.f32.xlu0 %v1250_v34 }
 0x28a   : > { %v1252_v50 = vpop.xlane.xlu0 %1251 }
 0x28b   : > { %v1253_v28 = vrot.slane %v1252_v50, 4 }
 0x28d   : > { %v1254_v54 = vadd.f32 %v1253_v28, %v1252_v50 }
 0x28f   : > { %v1255_v30 = vrot.slane %v1254_v54, 2 }
 0x291   : > { %v1256_v18 = vadd.f32 %v1255_v30, %v1254_v54 }
 0x293   : > { %v1257_v16 = vrot.slane %v1256_v18, 1 }
 0x295   : > { %v1258_v5 = vadd.f32 %v1257_v16, %v1256_v18 }
 0x297   : > { %1434 = vpush %v1258_v5 }
 0x2c8   : > { %s1435_s14 = spop %1434 }
 0x2c9   : > { %v1260_v32 = vstv %s1435_s14 }
 0x2ca   : > { %v1262_v42 = vmul.f32 0.0009765625, %v1260_v32 }
 0x2cc   : > { %v1263_v60 = vsub.f32 %v1245_v15, %v1262_v42  ;;  %v1264_v12 = vsub.f32 %v1246_v25, %v1262_v42 }
 0x2ce   : > { %v1265_v44 = vmul.f32 %v1263_v60, %v1263_v60  ;;  %v1266_v51 = vmul.f32 %v1264_v12, %v1264_v12 }
 0x2d0   : > { %v1267_v7 = vsel %vm1247_vm10, %v1265_v44, 0.0  ;;  %v1268_v21 = vsel %vm1247_vm10, %v1266_v51, 0.0 }
 0x2d1   : > { %v1269_v37 = vadd.f32 %v1268_v21, %v1267_v7 }
 0x2d3   : > { %1270 = vadd.xlane.f32.xlu1 %v1269_v37 }
 0x2e4   : > { %1288 = vperm.xlu1 %1449, %v1285_v45  }
 0x2e8   : > { %1296 = vperm.xlu1 %1449, %v1293_v23  }
 0x35c   : > { %v1271_v43 = vpop.xlane.xlu1 %1270 }
 0x35d   : > { %v1272_v41 = vrot.slane %v1271_v43, 4 }
 0x35f   : > { %v1273_v10 = vadd.f32 %v1272_v41, %v1271_v43 }
 0x360   : > { %v1289_v33 = vpop.permute.xlu1 %1288 }
 0x361   : > { %v1274_v58 = vrot.slane %v1273_v10, 2 }
 0x363   : > { %v1275_v22 = vadd.f32 %v1274_v58, %v1273_v10 }
 0x364   : > { %v1297_v6 = vpop.permute.xlu1 %1296 }
 0x365   : > { %v1276_v4 = vrot.slane %v1275_v22, 1 }
 0x367   : > { %v1277_v47 = vadd.f32 %v1276_v4, %v1275_v22 }
 0x369   : > { %1436 = vpush %v1277_v47 }
 0x39a   : > { %s1437_s19 = spop %1436 }
 0x39b   : > { %v1279_v38 = vstv %s1437_s19 }
 0x39c   : > { %v1280_v14 = vmul.f32 0.0009765625, %v1279_v38 }
 0x39e   : > { %v1281_v13 = vadd.f32 1e-05, %v1280_v14 }
 0x3a0   : > { %1463 = vrsqrt.f32 %v1281_v13 }
 0x3ad   : > { %v1464_v27 = vpop.eup %1463 }
 0x3ae   : > { %v1283_v40 = vmul.f32 %v1464_v27, %v1263_v60  ;;  %v1284_v55 = vmul.f32 %v1464_v27, %v1264_v12 }
 0x3b0   : > { %v1291_v46 = vmul.f32 %v1289_v33, %v1283_v40  ;;  %v1292_v62 = vmul.f32 %v1289_v33, %v1284_v55 }
 0x3b2   : > { %v1299_v8 = vadd.f32 %v1297_v6, %v1291_v46  ;;  %v1300_v49 = vadd.f32 %v1297_v6, %v1292_v62 }
 0x3b4   : > { %v1301_v19 = vmax.f32 %v1299_v8, 0.0  ;;  %v1302_v11 = vmax.f32 %v1300_v49, 0.0 }
 0x3b6   : > { %v1305_v63 = vcombine.low %v1301_v19, %v1302_v11 }
 0x3b8   : > { %1307 = vst [vmem:[%s278_s22] sm:$0xff] %v1305_v63 }
 0x3b9 PF: > { %s17_s24 = sadd.s32 1, %s1471_s24  }
 0x3ba   : > { %p14_p4 = scmp.ge.s32.totalorder %s17_s24, 4  }
 0x3bc   :  { %16 = sbr.rel (!%p14_p4) target bundleno = 1 (0x1), region = 80 }

// kernel: dsc3block_forward.6
= control target key start
LH: loop header
LB: loop body
LE: loop exit
PB: predicated region body
PF: predicated region fallthrough
CT: control target
= control target key end

     0   :  { %s1794_s24 = smov 0   ;;  %s2260_s0 = inlined_call_operand.vmem [shape: f32[2,3,256], index: 0, kind: input, shape index: {}]   ;;  %s2261_s1 = inlined_call_operand.vmem [shape: bf16[64,16], index: 1, kind: input, shape index: {}]   ;;  %s2262_s2 = inlined_call_operand.vmem [shape: bf16[16,768], index: 2, kind: input, shape index: {}]   ;;  %s2263_s3 = inlined_call_operand.vmem [shape: bf16[3,4,64], index: 3, kind: input, shape index: {}]   ;;  %s2264_s4 = inlined_call_operand.vmem [shape: f32[4,1], index: 4, kind: input, shape index: {}]   ;;  %s2265_s5 = inlined_call_operand.vmem [shape: f32[4,1], index: 5, kind: input, shape index: {}]   ;;  %s2266_s6 = inlined_call_operand.vmem [shape: f32[4,1], index: 6, kind: input, shape index: {}]   ;;  %s2267_s7 = inlined_call_operand.vmem [shape: f32[2,4,256], index: 7, kind: output, shape index: {}]  }
   0x1 LB: > { %s1606_s25 = sadd.s32 4294967295, %s1750_s24   ;;  %p1610_p0 = scmp.ge.s32.totalorder %s1750_s24, 1  ;;  %s1750_s24 = sphi %s1794_s24, %s17_s24  }
   0x2   : > { %p237_p1 = scmp.lt.s32.totalorder %s1750_s24, 3 }
   0x4   : > { %p238_p2 = pnand %p1610_p0, %p237_p1 }
   0x5   : > { %p269_p3 = scmp.lt.s32.totalorder (!%p238_p2), %s1606_s25, 1 }
   0x6   : > { %241 = sbr.rel (%p238_p2) target bundleno = 1427 (0x593), region = 48 }
   0xb   : > { %v1752_v0 = vmov 0   ;;  %s2269_s25 = smov (!%p269_p3, %s1606_s25), 1  ;;  %v289_v1 = vlaneseq  ;;  %v1753_v25 = vmov 1.0|1.0   ;;  %v1860_v26 = vld [vmem:[%s2261_s1] sm:$0xff]   ;;  %vm385_vm6 = vcmask 130048  }
   0xc   : > { %430 = vmatprep.mubr.bf16.mxu0 %v1752_v0  ;;  %511 = vmatprep.mubr.bf16.mxu1 %v1752_v0  ;;  %s1707_s26 = sshll.u32 %s2269_s25, 3  ;;  %v1877_v27 = vld [vmem:[%s2261_s1 + $0x8] sm:$0xff]   ;;  %v1888_v28 = vld [vmem:[%s2261_s1 + $0x10] sm:$0xff]   ;;  %v1899_v29 = vld [vmem:[%s2261_s1 + $0x18] sm:$0xff]  }
   0xd   : > { %1727 = vset.pattern.permute.xlu0 %v1752_v0  ;;  %1728 = vset.pattern.permute.xlu1 %v1752_v0  ;;  %s273_s29 = scalar_lea.vmem %s2260_s0, %s1707_s26  ;;  %v1817_v4 = vshrl.u32 %v289_v1, 7  ;;  %v1735_v61 = vld [vmem:[%s2262_s2 + $0x4] ss:$24 sps:$4 sm:$0xff]   ;;  %s278_s23 = scalar_lea.vmem %s2267_s7, %s1707_s26 }
   0xe   : > { %v1814_v2 = vld [vmem:[%s273_s29] sm:$0x77] }
   0xf   : > { %v292_v3 = vfloor.f32 %v1814_v2  ;;  %v1826_v10 = vsub.s32 0, %v1817_v4  ;;  %v1829_v11 = vsub.s32 4, %v1817_v4  ;;  %v1836_v15 = vadd.s32 8, %v1817_v4 }
  0x11   : > { %v1819_v5 = vmax.f32 %v292_v3, 0.0  ;;  %v1821_v6 = vadd.f32 1.0, %v292_v3  ;;  %v1938_v3 = vsub.s32 5, %v1817_v4 }
  0x13   : > { %v295_v7 = vmin.f32 %v1819_v5, 15.0  ;;  %v297_v8 = vmax.f32 %v1821_v6, 0.0 }
  0x15   : > { %v1709_v9 = vtrunc.f32 %v295_v7  ;;  %v298_v12 = vmin.f32 %v297_v8, 15.0  ;;  %v1943_v7 = vld [vmem:[%s2262_s2] ss:$24 sps:$4 sm:$0xff]  }
  0x17   : > { %v1833_v13 = vcvt.f32.s32 %v1709_v9  ;;  %v1711_v14 = vtrunc.f32 %v298_v12  ;;  %v1946_v9 = vsub.s32 1, %v1817_v4 }
  0x19   : > { %v311_v16 = vrot.slane %v1833_v13, %v1829_v11  ;;  %v307_v17 = vrot.slane %v1833_v13, %v1826_v10  ;;  %v1842_v18 = vcvt.f32.s32 %v1711_v14 }
  0x1b   : > { %v319_v19 = vrot.slane %v311_v16, %v1826_v10  ;;  %v315_v20 = vrot.slane %v307_v17, %v1826_v10  ;;  %v341_v21 = vrot.slane %v1842_v18, %v1829_v11  ;;  %v337_v22 = vrot.slane %v1842_v18, %v1826_v10 }
  0x1d   : > { %vm321_vm0 = vcmp.eq.s32.totalorder %v1817_v4, %v319_v19  ;;  %vm323_vm1 = vcmp.eq.s32.totalorder %v1836_v15, %v319_v19  ;;  %vm320_vm2 = vcmp.eq.s32.totalorder %v1817_v4, %v315_v20  ;;  %vm322_vm3 = vcmp.eq.s32.totalorder %v1836_v15, %v315_v20 }
  0x1e   : > { %vm1627_vm4 = vmpackc.low %vm323_vm1, %vm321_vm0  ;;  %v349_v23 = vrot.slane %v341_v21, %v1826_v10  ;;  %v345_v24 = vrot.slane %v337_v22, %v1826_v10 }
  0x1f   : > { %1628 = vmatprep.subr.msk.bf16.mxu0 %vm1627_vm4, %v1753_v25  ;;  %vm1629_vm5 = vmpackc.low %vm322_vm3, %vm320_vm2  ;;  %vm580_vm4 = vcmask 523264  }
  0x20   : > { %1630 = vmatpush1.bf16.msk.msra.mxu0 %vm1629_vm5, %v1753_v25  ;;  %vm351_vm7 = vcmp.eq.s32.totalorder %v1817_v4, %v349_v23  ;;  %vm353_vm8 = vcmp.eq.s32.totalorder %v1836_v15, %v349_v23  ;;  %vm350_vm9 = vcmp.eq.s32.totalorder %v1817_v4, %v345_v24  ;;  %vm352_vm10 = vcmp.eq.s32.totalorder %v1836_v15, %v345_v24 }
  0x21   : > { %vm1635_vm11 = vmpackc.low %vm353_vm8, %vm351_vm7  ;;  %v727_v24 = vrot.slane %v1833_v13, %v1938_v3 }
  0x22   : > { %1636 = vmatprep.subr.msk.bf16.mxu1 %vm1635_vm11, %v1753_v25  ;;  %vm1637_vm12 = vmpackc.low %vm352_vm10, %vm350_vm9 }
  0x23   : > { %1638 = vmatpush1.bf16.msk.msra.mxu1 %vm1637_vm12, %v1753_v25  ;;  %1631 = vmatmul.mubr.msk.bf16.vlgmr.msra.gmra.mxu0 %vm385_vm6, %v1860_v26 }
  0x24   : > { %440 = vmatprep.mubr.bf16.mxu0 %v1752_v0 }
  0x26   : > { %1639 = vmatmul.mubr.msk.bf16.vlgmr.msra.gmra.mxu1 %vm385_vm6, %v1860_v26 }
  0x27   : > { %521 = vmatprep.mubr.bf16.mxu1 %v1752_v0 }
  0x2b   : > { %1632 = vmatmul.mubr.msk.bf16.gmra.mxu0 %vm385_vm6, %v1877_v27 }
  0x2c   : > { %450 = vmatprep.mubr.bf16.mxu0 %v1752_v0 }
  0x2e   : > { %1640 = vmatmul.mubr.msk.bf16.gmra.mxu1 %vm385_vm6, %v1877_v27 }
  0x2f   : > { %531 = vmatprep.mubr.bf16.mxu1 %v1752_v0 }
  0x33   : > { %1633 = vmatmul.mubr.msk.bf16.gmra.mxu0 %vm385_vm6, %v1888_v28 }
  0x34   : > { %460 = vmatprep.mubr.bf16.mxu0 %v1752_v0 }
  0x36   : > { %1641 = vmatmul.mubr.msk.bf16.gmra.mxu1 %vm385_vm6, %v1888_v28 }
  0x37   : > { %541 = vmatprep.mubr.bf16.mxu1 %v1752_v0 }
  0x3b   : > { %1634 = vmatmul.mubr.msk.bf16.gmra.mxu0 %vm385_vm6, %v1899_v29 }
  0x3c   : > { %616 = vmatprep.mubr.bf16.mxu0 %v1752_v0 }
  0x3e   : > { %1642 = vmatmul.mubr.msk.bf16.gmra.mxu1 %vm385_vm6, %v1899_v29 }
  0x3f   : > { %665 = vmatprep.mubr.bf16.mxu1 %v1752_v0 }
  0xe3   : > { %v1908_v30 = vpop.f32.mrf.mxu0 }
  0xe5   : > { %v1910_v31 = vpop.f32.mrf.mxu0 }
  0xe6   : > { %v1912_v32 = vpop.f32.mrf.mxu1 }
  0xe7   : > { %v1914_v33 = vpop.f32.mrf.mxu0 }
  0xe8   : > { %v1916_v34 = vpop.f32.mrf.mxu1 }
  0xe9   : > { %v1918_v35 = vpop.f32.mrf.mxu0 }
  0xea   : > { %v1920_v36 = vpop.f32.mrf.mxu1 }
  0xeb   : > { %v1922_v37 = vpop.f32.mrf.mxu0 }
  0xec   : > { %v1924_v38 = vpop.f32.mrf.mxu1 }
  0xed   : > { %v444_v39 = vpop.f32.mrf.mxu0 }
  0xee   : > { %v1926_v40 = vpop.f32.mrf.mxu1 }
  0xef   : > { %v1928_v41 = vpop.f32.mrf.mxu0 }
  0xf0   : > { %v1930_v42 = vpop.f32.mrf.mxu1 }
  0xf1   : > { %v448_v43 = vpop.f32.mrf.mxu0 }
  0xf2   : > { %v1932_v44 = vpop.f32.mrf.mxu1  ;;  %v474_v22 = vpack.c.bf16 %v448_v43, %v444_v39  ;;  %v473_v39 = vpack.c.bf16 %v1928_v41, %v1922_v37 }
  0xf3   : > { %v452_v45 = vpop.f32.mrf.mxu0  ;;  %v554_v37 = vpack.c.bf16 %v1932_v44, %v1926_v40  ;;  %v552_v40 = vpack.c.bf16 %v1920_v36, %v1912_v32  ;;  %v364_v32 = vld [vmem:[%s2263_s3] sm:$0x3]  ;;  %v300_v44 = vmin.f32 %v297_v8, 16.0 }
  0xf4   : > { %v529_v46 = vpop.f32.mrf.mxu1 }
  0xf5   : > { %v454_v47 = vpop.f32.mrf.mxu0  ;;  %v555_v43 = vpack.c.bf16 %v529_v46, %v1930_v42  ;;  %v753_v46 = vrot.slane %v1842_v18, %v1946_v9  ;;  %v625_v36 = vmul.bf16 %v1943_v7, %v552_v40 }
  0xf6   : > { %v533_v48 = vpop.f32.mrf.mxu1 }
  0xf7   : > { %v456_v49 = vpop.f32.mrf.mxu0 }
  0xf8   : > { %v535_v50 = vpop.f32.mrf.mxu1  ;;  %v475_v17 = vpack.c.bf16 %v456_v49, %v452_v45  ;;  %v757_v45 = vrot.slane %v1842_v18, %v1938_v3 }
  0xf9   : > { %v458_v51 = vpop.f32.mrf.mxu0 }
  0xfa   : > { %v537_v52 = vpop.f32.mrf.mxu1  ;;  %v476_v62 = vpack.c.bf16 %v458_v51, %v454_v47  ;;  %v723_v51 = vrot.slane %v1833_v13, %v1946_v9  ;;  %v576_v49 = vmul.bf16 %v1943_v7, %v475_v17  ;;  %v765_v42 = vrot.slane %v757_v45, %v1946_v9 }
  0xfb   : > { %v462_v53 = vpop.f32.mrf.mxu0 }
  0xfc   : > { %v539_v54 = vpop.f32.mrf.mxu1  ;;  %v577_v23 = vmul.bf16 %v1735_v61, %v476_v62  ;;  %vm767_vm2 = vcmp.eq.s32.totalorder %v1817_v4, %v765_v42  ;;  %vm769_vm3 = vcmp.eq.s32.totalorder %v1836_v15, %v765_v42 }
  0xfd   : > { %v464_v55 = vpop.f32.mrf.mxu0  ;;  %v557_v19 = vpack.c.bf16 %v539_v54, %v535_v50  ;;  %v472_v54 = vpack.c.bf16 %v1918_v35, %v1910_v31  ;;  %v471_v31 = vpack.c.bf16 %v1914_v33, %v1908_v30  ;;  %v553_v35 = vpack.c.bf16 %v1924_v38, %v1916_v34  ;;  %vm1664_vm7 = vmpackc.low %vm769_vm3, %vm767_vm2 }
  0xfe   : > { %v543_v56 = vpop.f32.mrf.mxu1  ;;  %v627_v30 = vmul.bf16 %v1943_v7, %v554_v37  ;;  %v761_v33 = vrot.slane %v753_v46, %v1946_v9 }
  0xff   : > { %v466_v57 = vpop.f32.mrf.mxu0  ;;  %v630_v50 = vmul.bf16 %v1735_v61, %v557_v19  ;;  %v572_v34 = vmul.bf16 %v1943_v7, %v471_v31  ;;  %v626_v38 = vmul.bf16 %v1735_v61, %v553_v35 }
 0x100   : > { %v545_v58 = vpop.f32.mrf.mxu1  ;;  %v477_v59 = vpack.c.bf16 %v466_v57, %v462_v53  ;;  %v556_v53 = vpack.c.bf16 %v537_v52, %v533_v48  ;;  %v735_v48 = vrot.slane %v727_v24, %v1946_v9  ;;  %v731_v52 = vrot.slane %v723_v51, %v1946_v9 }
 0x101   : > { %v468_v60 = vpop.f32.mrf.mxu0  ;;  %v574_v57 = vmul.bf16 %v1943_v7, %v473_v39  ;;  %vm766_vm8 = vcmp.eq.s32.totalorder %v1817_v4, %v761_v33  ;;  %vm768_vm9 = vcmp.eq.s32.totalorder %v1836_v15, %v761_v33 }
 0x102   : > { %v478_v63 = vpack.c.bf16 %v468_v60, %v464_v55  ;;  %v547_v1 = vpop.f32.mrf.mxu1  ;;  %v578_v20 = vmul.bf16 %v1943_v7, %v477_v59  ;;  %v629_v41 = vmul.bf16 %v1943_v7, %v556_v53  ;;  %v573_v59 = vmul.bf16 %v1735_v61, %v472_v54  ;;  %vm1666_vm10 = vmpackc.low %vm768_vm9, %vm766_vm8 }
 0x103   : > { %v558_v14 = vpack.c.bf16 %v547_v1, %v543_v56  ;;  %v575_v56 = vmul.bf16 %v1735_v61, %v474_v22  ;;  %vm737_vm13 = vcmp.eq.s32.totalorder %v1817_v4, %v735_v48  ;;  %vm739_vm14 = vcmp.eq.s32.totalorder %v1836_v15, %v735_v48 }
 0x104   : > { %v579_v12 = vmul.bf16 %v1735_v61, %v478_v63  ;;  %v549_v16 = vpop.f32.mrf.mxu1  ;;  %vm736_vm15 = vcmp.eq.s32.totalorder %v1817_v4, %v731_v52  ;;  %vm738_vm0 = vcmp.eq.s32.totalorder %v1836_v15, %v731_v52  ;;  %vm1656_vm1 = vmpackc.low %vm739_vm14, %vm737_vm13  ;;  %v302_v60 = vmin.f32 %v1819_v5, 16.0 }
 0x105   : > { %v559_v21 = vpack.c.bf16 %v549_v16, %v545_v58  ;;  %v631_v55 = vmul.bf16 %v1943_v7, %v558_v14  ;;  %v628_v58 = vmul.bf16 %v1735_v61, %v555_v43  ;;  %vm1658_vm5 = vmpackc.low %vm738_vm0, %vm736_vm15 }
 0x106   : > { %592 = vmatprep.subr.bf16.mxu0 %v579_v12  ;;  %v2033_v62 = vsub.f32 %v1814_v2, %v302_v60 }
 0x107   : > { %v632_v47 = vmul.bf16 %v1735_v61, %v559_v21  ;;  %593 = vmatpush1.bf16.msra.mxu0 %v578_v20  ;;  %v2030_v61 = vsub.f32 %v300_v44, %v1814_v2 }
 0x108   : > { %594 = vmatprep.subr.bf16.mxu0 %v577_v23  ;;  %v701_v1 = vrot.slane %v2033_v62, %v1826_v10  ;;  %v705_v6 = vrot.slane %v2033_v62, %v1829_v11 }
 0x109   : > { %641 = vmatprep.subr.bf16.mxu1 %v632_v47  ;;  %v678_v63 = vrot.slane %v2030_v61, %v1826_v10  ;;  %v682_v7 = vrot.slane %v2030_v61, %v1829_v11 }
 0x10a   : > { %642 = vmatpush1.bf16.msra.mxu1 %v631_v55  ;;  %v711_v12 = vrot.slane %v701_v1, %v1826_v10  ;;  %v715_v16 = vrot.slane %v705_v6, %v1826_v10  ;;  %v1738_v6 = vld [vmem:[%s2262_s2 + $0xc] ss:$24 sps:$4 sm:$0xff]  }
 0x10b   : > { %643 = vmatprep.subr.bf16.mxu1 %v630_v50  ;;  %595 = vmatpush1.bf16.msra.mxu0 %v576_v49  ;;  %v688_v5 = vrot.slane %v678_v63, %v1826_v10  ;;  %v692_v2 = vrot.slane %v682_v7, %v1826_v10 }
 0x10c   : > { %596 = vmatprep.subr.bf16.mxu0 %v575_v56 }
 0x10e   : > { %644 = vmatpush1.bf16.msra.mxu1 %v629_v41 }
 0x10f   : > { %645 = vmatprep.subr.bf16.mxu1 %v628_v58  ;;  %597 = vmatpush1.bf16.msra.mxu0 %v574_v57 }
 0x110   : > { %598 = vmatprep.subr.bf16.mxu0 %v573_v59 }
 0x112   : > { %646 = vmatpush1.bf16.msra.mxu1 %v627_v30 }
 0x113   : > { %647 = vmatprep.subr.bf16.mxu1 %v626_v38  ;;  %599 = vmatpush1.bf16.msra.mxu0 %v572_v34 }
 0x114   : > { %1657 = vmatprep.subr.msk.bf16.mxu0 %vm1656_vm1, %v1753_v25 }
 0x116   : > { %648 = vmatpush1.bf16.msra.mxu1 %v625_v36  ;;  %1645 = vmatmul.mubr.msk.bf16.vlgmr.msra.gmra.mxu0 %vm580_vm4, %v364_v32 }
 0x117   : > { %1659 = vmatpush1.bf16.msk.msra.mxu0 %vm1658_vm5, %v1753_v25  ;;  %1665 = vmatprep.subr.msk.bf16.mxu1 %vm1664_vm7, %v1753_v25 }
 0x118   : > { %814 = vmatprep.mubr.bf16.mxu0 %v1752_v0 }
 0x119   : > { %1646 = vmatmul.mubr.msk.bf16.vlgmr.msra.gmra.mxu1 %vm580_vm4, %v364_v32 }
 0x11a   : > { %1667 = vmatpush1.bf16.msk.msra.mxu1 %vm1666_vm10, %v1753_v25  ;;  %895 = vmatprep.mubr.bf16.mxu1 %v1752_v0 }
 0x11e   : > { %1660 = vmatmul.mubr.msk.bf16.vlgmr.msra.gmra.mxu0 %vm385_vm6, %v1860_v26 }
 0x11f   : > { %824 = vmatprep.mubr.bf16.mxu0 %v1752_v0 }
 0x121   : > { %1668 = vmatmul.mubr.msk.bf16.vlgmr.msra.gmra.mxu1 %vm385_vm6, %v1860_v26 }
 0x122   : > { %905 = vmatprep.mubr.bf16.mxu1 %v1752_v0 }
 0x126   : > { %1661 = vmatmul.mubr.msk.bf16.gmra.mxu0 %vm385_vm6, %v1877_v27 }
 0x127   : > { %834 = vmatprep.mubr.bf16.mxu0 %v1752_v0 }
 0x129   : > { %1669 = vmatmul.mubr.msk.bf16.gmra.mxu1 %vm385_vm6, %v1877_v27 }
 0x12a   : > { %915 = vmatprep.mubr.bf16.mxu1 %v1752_v0 }
 0x12e   : > { %1662 = vmatmul.mubr.msk.bf16.gmra.mxu0 %vm385_vm6, %v1888_v28 }
 0x12f   : > { %844 = vmatprep.mubr.bf16.mxu0 %v1752_v0 }
 0x131   : > { %1670 = vmatmul.mubr.msk.bf16.gmra.mxu1 %vm385_vm6, %v1888_v28 }
 0x132   : > { %925 = vmatprep.mubr.bf16.mxu1 %v1752_v0 }
 0x136   : > { %1663 = vmatmul.mubr.msk.bf16.gmra.mxu0 %vm385_vm6, %v1899_v29 }
 0x137   : > { %999 = vmatprep.mubr.bf16.mxu0 %v1752_v0 }
 0x139   : > { %1671 = vmatmul.mubr.msk.bf16.gmra.mxu1 %vm385_vm6, %v1899_v29 }
 0x13a   : > { %1048 = vmatprep.mubr.bf16.mxu1 %v1752_v0 }
 0x1d6   : > { %v618_v8 = vpop.f32.mrf.mxu0 }
 0x1d7   : > { %v693_v19 = vmul.f32 %v688_v5, %v618_v8 }
 0x1d8   : > { %v620_v14 = vpop.f32.mrf.mxu0 }
 0x1d9   : > { %v667_v17 = vpop.f32.mrf.mxu1  ;;  %v694_v23 = vmul.f32 %v692_v2, %v620_v14  ;;  %v2081_v14 = vsub.s32 6, %v1817_v4  ;;  %v2086_v2 = vld [vmem:[%s2262_s2 + $0x8] ss:$24 sps:$4 sm:$0xff]  }
 0x1da   : > { %v716_v20 = vmul.f32 %v711_v12, %v667_v17  ;;  %v622_v21 = vpop.f32.mrf.mxu0 }
 0x1db   : > { %v669_v22 = vpop.f32.mrf.mxu1 }
 0x1dc   : > { %v2047_v24 = vadd.f32 %v716_v20, %v693_v19  ;;  %v717_v47 = vmul.f32 %v715_v16, %v669_v22  ;;  %v623_v11 = vpop.f32.mrf.mxu0  ;;  %v2089_v16 = vsub.s32 2, %v1817_v4 }
 0x1dd   : > { %v671_v51 = vpop.f32.mrf.mxu1 }
 0x1de   : > { %v2049_v53 = vadd.f32 %v717_v47, %v694_v23  ;;  %v2051_v55 = vpop.f32.mrf.mxu0 }
 0x1df   : > { %v672_v45 = vpop.f32.mrf.mxu1 }
 0x1e0   : > { %v2053_v39 = vpop.f32.mrf.mxu0  ;;  %v1108_v45 = vrot.slane %v1833_v13, %v2081_v14 }
 0x1e1   : > { %v2055_v43 = vpop.f32.mrf.mxu1 }
 0x1e2   : > { %v2057_v10 = vpop.f32.mrf.mxu0 }
 0x1e3   : > { %v2059_v49 = vpop.f32.mrf.mxu1 }
 0x1e4   : > { %v2061_v50 = vpop.f32.mrf.mxu0 }
 0x1e5   : > { %v2063_v54 = vpop.f32.mrf.mxu1 }
 0x1e6   : > { %v2065_v56 = vpop.f32.mrf.mxu0 }
 0x1e7   : > { %v2067_v48 = vpop.f32.mrf.mxu1 }
 0x1e8   : > { %v828_v52 = vpop.f32.mrf.mxu0 }
 0x1e9   : > { %v2069_v37 = vpop.f32.mrf.mxu1 }
 0x1ea   : > { %v2071_v41 = vpop.f32.mrf.mxu0 }
 0x1eb   : > { %v2073_v42 = vpop.f32.mrf.mxu1 }
 0x1ec   : > { %v832_v46 = vpop.f32.mrf.mxu0 }
 0x1ed   : > { %v2075_v31 = vpop.f32.mrf.mxu1  ;;  %v858_v11 = vpack.c.bf16 %v832_v46, %v828_v52  ;;  %v857_v52 = vpack.c.bf16 %v2071_v41, %v2065_v56 }
 0x1ee   : > { %v836_v35 = vpop.f32.mrf.mxu0  ;;  %v938_v56 = vpack.c.bf16 %v2075_v31, %v2069_v37 }
 0x1ef   : > { %v913_v57 = vpop.f32.mrf.mxu1 }
 0x1f0   : > { %v838_v58 = vpop.f32.mrf.mxu0  ;;  %v939_v46 = vpack.c.bf16 %v913_v57, %v2073_v42  ;;  %v1134_v57 = vrot.slane %v1842_v18, %v2089_v16 }
 0x1f1   : > { %v917_v59 = vpop.f32.mrf.mxu1 }
 0x1f2   : > { %v840_v40 = vpop.f32.mrf.mxu0 }
 0x1f3   : > { %v919_v30 = vpop.f32.mrf.mxu1  ;;  %v859_v21 = vpack.c.bf16 %v840_v40, %v836_v35  ;;  %v1138_v35 = vrot.slane %v1842_v18, %v2081_v14  ;;  %v936_v18 = vpack.c.bf16 %v2063_v54, %v2055_v43  ;;  %v1655_v43 = vld [vmem:[%s2263_s3 + $0x2] sm:$0x3] }
 0x1f4   : > { %v842_v33 = vpop.f32.mrf.mxu0 }
 0x1f5   : > { %v921_v34 = vpop.f32.mrf.mxu1  ;;  %v860_v8 = vpack.c.bf16 %v842_v33, %v838_v58  ;;  %v1104_v33 = vrot.slane %v1833_v13, %v2089_v16  ;;  %v960_v40 = vmul.bf16 %v2086_v2, %v859_v21  ;;  %v959_v13 = vmul.bf16 %v1738_v6, %v858_v11 }
 0x1f6   : > { %v846_v38 = vpop.f32.mrf.mxu0  ;;  %v1146_v42 = vrot.slane %v1138_v35, %v2089_v16  ;;  %v1008_v54 = vmul.bf16 %v2086_v2, %v936_v18 }
 0x1f7   : > { %v923_v32 = vpop.f32.mrf.mxu1  ;;  %v961_v51 = vmul.bf16 %v1738_v6, %v860_v8 }
 0x1f8   : > { %v848_v36 = vpop.f32.mrf.mxu0  ;;  %v941_v22 = vpack.c.bf16 %v923_v32, %v919_v30  ;;  %v856_v32 = vpack.c.bf16 %v2061_v50, %v2053_v39  ;;  %v855_v39 = vpack.c.bf16 %v2057_v10, %v2051_v55  ;;  %v937_v50 = vpack.c.bf16 %v2067_v48, %v2059_v49 }
 0x1f9   : > { %v927_v44 = vpop.f32.mrf.mxu1  ;;  %v1010_v55 = vmul.bf16 %v2086_v2, %v938_v56  ;;  %v1142_v10 = vrot.slane %v1134_v57, %v2089_v16  ;;  %vm1148_vm0 = vcmp.eq.s32.totalorder %v1817_v4, %v1146_v42  ;;  %vm1150_vm1 = vcmp.eq.s32.totalorder %v1836_v15, %v1146_v42 }
 0x1fa   : > { %v850_v60 = vpop.f32.mrf.mxu0  ;;  %v1013_v30 = vmul.bf16 %v1738_v6, %v941_v22  ;;  %v956_v49 = vmul.bf16 %v2086_v2, %v855_v39  ;;  %v1009_v48 = vmul.bf16 %v1738_v6, %v937_v50  ;;  %vm1693_vm3 = vmpackc.low %vm1150_vm1, %vm1148_vm0 }
 0x1fb   : > { %v929_v63 = vpop.f32.mrf.mxu1  ;;  %v861_v1 = vpack.c.bf16 %v850_v60, %v846_v38  ;;  %v940_v38 = vpack.c.bf16 %v921_v34, %v917_v59  ;;  %v1116_v59 = vrot.slane %v1108_v45, %v2089_v16  ;;  %v1112_v34 = vrot.slane %v1104_v33, %v2089_v16 }
 0x1fc   : > { %v852_v7 = vpop.f32.mrf.mxu0  ;;  %v1011_v60 = vmul.bf16 %v1738_v6, %v939_v46  ;;  %vm1147_vm5 = vcmp.eq.s32.totalorder %v1817_v4, %v1142_v10  ;;  %vm1149_vm7 = vcmp.eq.s32.totalorder %v1836_v15, %v1142_v10 }
 0x1fd   : > { %v862_v5 = vpack.c.bf16 %v852_v7, %v848_v36  ;;  %v931_v12 = vpop.f32.mrf.mxu1  ;;  %v962_v23 = vmul.bf16 %v2086_v2, %v861_v1  ;;  %v1012_v41 = vmul.bf16 %v2086_v2, %v940_v38  ;;  %vm1118_vm11 = vcmp.eq.s32.totalorder %v1817_v4, %v1116_v59  ;;  %vm1695_vm8 = vmpackc.low %vm1149_vm7, %vm1147_vm5 }
 0x1fe   : > { %v942_v19 = vpack.c.bf16 %v931_v12, %v927_v44  ;;  %v958_v44 = vmul.bf16 %v2086_v2, %v857_v52  ;;  %vm1120_vm12 = vcmp.eq.s32.totalorder %v1836_v15, %v1116_v59  ;;  %vm1117_vm13 = vcmp.eq.s32.totalorder %v1817_v4, %v1112_v34  ;;  %v1482_v4 = vld [vmem:[%s2264_s4] sm:$0xf] }
 0x1ff   : > { %v963_v17 = vmul.bf16 %v1738_v6, %v862_v5  ;;  %v933_v20 = vpop.f32.mrf.mxu1  ;;  %vm1119_vm14 = vcmp.eq.s32.totalorder %v1836_v15, %v1112_v34  ;;  %vm1685_vm15 = vmpackc.low %vm1120_vm12, %vm1118_vm11  ;;  %1485 = vperm.xlu0 %1727, %v1482_v4   ;;  %v1060_v15 = vrot.slane %v2030_v61, %v1946_v9  ;;  %v1739_v4 = vld [vmem:[%s2262_s2 + $0x10] ss:$24 sps:$4 sm:$0xff]  }
 0x200   : > { %v943_v47 = vpack.c.bf16 %v933_v20, %v929_v63  ;;  %v1014_v36 = vmul.bf16 %v2086_v2, %v942_v19  ;;  %v957_v63 = vmul.bf16 %v1738_v6, %v856_v32  ;;  %vm1687_vm2 = vmpackc.low %vm1119_vm14, %vm1117_vm13 }
 0x201   : > { %975 = vmatprep.subr.bf16.mxu0 %v963_v17 }
 0x202   : > { %v1015_v58 = vmul.bf16 %v1738_v6, %v943_v47  ;;  %976 = vmatpush1.bf16.msra.mxu0 %v962_v23 }
 0x203   : > { %977 = vmatprep.subr.bf16.mxu0 %v961_v51 }
 0x204   : > { %1024 = vmatprep.subr.bf16.mxu1 %v1015_v58 }
 0x205   : > { %1025 = vmatpush1.bf16.msra.mxu1 %v1014_v36 }
 0x206   : > { %1026 = vmatprep.subr.bf16.mxu1 %v1013_v30  ;;  %978 = vmatpush1.bf16.msra.mxu0 %v960_v40 }
 0x207   : > { %979 = vmatprep.subr.bf16.mxu0 %v959_v13 }
 0x209   : > { %1027 = vmatpush1.bf16.msra.mxu1 %v1012_v41 }
 0x20a   : > { %1028 = vmatprep.subr.bf16.mxu1 %v1011_v60  ;;  %980 = vmatpush1.bf16.msra.mxu0 %v958_v44 }
 0x20b   : > { %981 = vmatprep.subr.bf16.mxu0 %v957_v63 }
 0x20d   : > { %1029 = vmatpush1.bf16.msra.mxu1 %v1010_v55 }
 0x20e   : > { %1030 = vmatprep.subr.bf16.mxu1 %v1009_v48  ;;  %982 = vmatpush1.bf16.msra.mxu0 %v956_v49  ;;  %v1741_v49 = vld [vmem:[%s2262_s2 + $0x14] ss:$24 sps:$4 sm:$0xff]  }
 0x20f   : > { %1686 = vmatprep.subr.msk.bf16.mxu0 %vm1685_vm15, %v1753_v25 }
 0x211   : > { %1031 = vmatpush1.bf16.msra.mxu1 %v1008_v54  ;;  %1674 = vmatmul.mubr.msk.bf16.vlgmr.msra.gmra.mxu0 %vm580_vm4, %v1655_v43 }
 0x212   : > { %1688 = vmatpush1.bf16.msk.msra.mxu0 %vm1687_vm2, %v1753_v25  ;;  %1694 = vmatprep.subr.msk.bf16.mxu1 %vm1693_vm3, %v1753_v25 }
 0x213   : > { %1195 = vmatprep.mubr.bf16.mxu0 %v1752_v0 }
 0x214   : > { %1675 = vmatmul.mubr.msk.bf16.vlgmr.msra.gmra.mxu1 %vm580_vm4, %v1655_v43 }
 0x215   : > { %1696 = vmatpush1.bf16.msk.msra.mxu1 %vm1695_vm8, %v1753_v25  ;;  %1276 = vmatprep.mubr.bf16.mxu1 %v1752_v0  ;;  %v1064_v25 = vrot.slane %v2030_v61, %v1938_v3 }
 0x219   : > { %1689 = vmatmul.mubr.msk.bf16.vlgmr.msra.gmra.mxu0 %vm385_vm6, %v1860_v26 }
 0x21a   : > { %1205 = vmatprep.mubr.bf16.mxu0 %v1752_v0 }
 0x21c   : > { %1697 = vmatmul.mubr.msk.bf16.vlgmr.msra.gmra.mxu1 %vm385_vm6, %v1860_v26  ;;  %v1082_v26 = vrot.slane %v2033_v62, %v1946_v9 }
 0x21d   : > { %1286 = vmatprep.mubr.bf16.mxu1 %v1752_v0 }
 0x21e   : > { %v1092_v37 = vrot.slane %v1082_v26, %v1946_v9 }
 0x221   : > { %1690 = vmatmul.mubr.msk.bf16.gmra.mxu0 %vm385_vm6, %v1877_v27 }
 0x222   : > { %1215 = vmatprep.mubr.bf16.mxu0 %v1752_v0 }
 0x224   : > { %1698 = vmatmul.mubr.msk.bf16.gmra.mxu1 %vm385_vm6, %v1877_v27  ;;  %v1070_v27 = vrot.slane %v1060_v15, %v1946_v9 }
 0x225   : > { %1296 = vmatprep.mubr.bf16.mxu1 %v1752_v0 }
 0x229   : > { %1691 = vmatmul.mubr.msk.bf16.gmra.mxu0 %vm385_vm6, %v1888_v28 }
 0x22a   : > { %1225 = vmatprep.mubr.bf16.mxu0 %v1752_v0 }
 0x22c   : > { %1699 = vmatmul.mubr.msk.bf16.gmra.mxu1 %vm385_vm6, %v1888_v28  ;;  %v1086_v28 = vrot.slane %v2033_v62, %v1938_v3 }
 0x22d   : > { %1306 = vmatprep.mubr.bf16.mxu1 %v1752_v0 }
 0x22e   : > { %v1096_v7 = vrot.slane %v1086_v28, %v1946_v9 }
 0x231   : > { %1692 = vmatmul.mubr.msk.bf16.gmra.mxu0 %vm385_vm6, %v1899_v29 }
 0x232   : > { %1380 = vmatprep.mubr.bf16.mxu0 %v1752_v0 }
 0x234   : > { %1700 = vmatmul.mubr.msk.bf16.gmra.mxu1 %vm385_vm6, %v1899_v29  ;;  %vm1490_vm6 = vcmask 1043456  }
 0x235   : > { %1429 = vmatprep.mubr.bf16.mxu1 %v1752_v0  ;;  %v1074_v0 = vrot.slane %v1064_v25, %v1946_v9 }
 0x2d1   : > { %v1001_v29 = vpop.f32.mrf.mxu0 }
 0x2d2   : > { %v1075_v31 = vmul.f32 %v1070_v27, %v1001_v29 }
 0x2d3   : > { %v1003_v1 = vpop.f32.mrf.mxu0 }
 0x2d4   : > { %v1077_v6 = vadd.f32 %v1075_v31, %v2047_v24  ;;  %v1076_v8 = vmul.f32 %v1074_v0, %v1003_v1  ;;  %v1050_v5 = vpop.f32.mrf.mxu1 }
 0x2d5   : > { %v1097_v12 = vmul.f32 %v1092_v37, %v1050_v5  ;;  %v1005_v2 = vpop.f32.mrf.mxu0 }
 0x2d6   : > { %v1078_v17 = vadd.f32 %v1076_v8, %v2049_v53  ;;  %v1052_v19 = vpop.f32.mrf.mxu1 }
 0x2d7   : > { %v2186_v20 = vadd.f32 %v1097_v12, %v1077_v6  ;;  %v1098_v3 = vmul.f32 %v1096_v7, %v1052_v19  ;;  %v1006_v21 = vpop.f32.mrf.mxu0 }
 0x2d8   : > { %v1054_v22 = vpop.f32.mrf.mxu1 }
 0x2d9   : > { %v2188_v23 = vadd.f32 %v1098_v3, %v1078_v17  ;;  %v2190_v47 = vpop.f32.mrf.mxu0 }
 0x2da   : > { %v1055_v11 = vpop.f32.mrf.mxu1 }
 0x2db   : > { %v2192_v9 = vpop.f32.mrf.mxu0 }
 0x2dc   : > { %v2194_v24 = vpop.f32.mrf.mxu1 }
 0x2dd   : > { %v2196_v51 = vpop.f32.mrf.mxu0 }
 0x2de   : > { %v2198_v45 = vpop.f32.mrf.mxu1  ;;  %v1236_v22 = vpack.c.bf16 %v2196_v51, %v2190_v47  ;;  %v1684_v47 = vld [vmem:[%s2263_s3 + $0x4] sm:$0x3] }
 0x2df   : > { %v2200_v53 = vpop.f32.mrf.mxu0 }
 0x2e0   : > { %v2202_v58 = vpop.f32.mrf.mxu1  ;;  %v1237_v17 = vpack.c.bf16 %v2200_v53, %v2192_v9 }
 0x2e1   : > { %v1207_v33 = vpop.f32.mrf.mxu0  ;;  %v1317_v9 = vpack.c.bf16 %v2202_v58, %v2194_v24  ;;  %v1441_v24 = vrot.slane %v2030_v61, %v2089_v16  ;;  %v1463_v58 = vrot.slane %v2033_v62, %v2089_v16 }
 0x2e2   : > { %v2204_v38 = vpop.f32.mrf.mxu1 }
 0x2e3   : > { %v1209_v36 = vpop.f32.mrf.mxu0  ;;  %v1318_v11 = vpack.c.bf16 %v2204_v38, %v2198_v45  ;;  %v1389_v51 = vmul.bf16 %v1739_v4, %v1317_v9  ;;  %v1445_v45 = vrot.slane %v2030_v61, %v2081_v14  ;;  %v1451_v38 = vrot.slane %v1441_v24, %v2089_v16 }
 0x2e4   : > { %v2206_v35 = vpop.f32.mrf.mxu1 }
 0x2e5   : > { %v1211_v52 = vpop.f32.mrf.mxu0 }
 0x2e6   : > { %v1290_v46 = vpop.f32.mrf.mxu1  ;;  %v1238_v8 = vpack.c.bf16 %v1211_v52, %v1207_v33  ;;  %v1338_v52 = vmul.bf16 %v1741_v49, %v1237_v17 }
 0x2e7   : > { %v1213_v40 = vpop.f32.mrf.mxu0 }
 0x2e8   : > { %v1292_v30 = vpop.f32.mrf.mxu1  ;;  %v1239_v37 = vpack.c.bf16 %v1213_v40, %v1209_v36  ;;  %v1339_v33 = vmul.bf16 %v1739_v4, %v1238_v8  ;;  %v1467_v40 = vrot.slane %v2033_v62, %v2081_v14 }
 0x2e9   : > { %v1217_v32 = vpop.f32.mrf.mxu0  ;;  %v1319_v3 = vpack.c.bf16 %v1292_v30, %v2206_v35  ;;  %v1337_v35 = vmul.bf16 %v1739_v4, %v1236_v22  ;;  %v1455_v30 = vrot.slane %v1445_v45, %v2089_v16 }
 0x2ea   : > { %v1294_v13 = vpop.f32.mrf.mxu1  ;;  %v1340_v19 = vmul.bf16 %v1741_v49, %v1239_v37 }
 0x2eb   : > { %v1219_v59 = vpop.f32.mrf.mxu0  ;;  %v1320_v5 = vpack.c.bf16 %v1294_v13, %v1290_v46  ;;  %v1391_v53 = vmul.bf16 %v1739_v4, %v1319_v3  ;;  %v1390_v46 = vmul.bf16 %v1741_v49, %v1318_v11  ;;  %v1473_v13 = vrot.slane %v1463_v58, %v2089_v16 }
 0x2ec   : > { %v1298_v34 = vpop.f32.mrf.mxu1 }
 0x2ed   : > { %v1221_v56 = vpop.f32.mrf.mxu0  ;;  %v1392_v36 = vmul.bf16 %v1741_v49, %v1320_v5  ;;  %v1528_v5 = vld [vmem:[%s2265_s5] sm:$0xf] }
 0x2ee   : > { %v1300_v41 = vpop.f32.mrf.mxu1  ;;  %v1240_v27 = vpack.c.bf16 %v1221_v56, %v1217_v32  ;;  %v1477_v56 = vrot.slane %v1467_v40, %v2089_v16 }
 0x2ef   : > { %v1223_v42 = vpop.f32.mrf.mxu0 }
 0x2f0   : > { %v1302_v57 = vpop.f32.mrf.mxu1  ;;  %v1241_v48 = vpack.c.bf16 %v1223_v42, %v1219_v59  ;;  %v1341_v12 = vmul.bf16 %v1739_v4, %v1240_v27 }
 0x2f1   : > { %v1227_v39 = vpop.f32.mrf.mxu0  ;;  %v1321_v7 = vpack.c.bf16 %v1302_v57, %v1298_v34 }
 0x2f2   : > { %v1304_v50 = vpop.f32.mrf.mxu1  ;;  %v1342_v31 = vmul.bf16 %v1741_v49, %v1241_v48 }
 0x2f3   : > { %v1229_v44 = vpop.f32.mrf.mxu0  ;;  %v1322_v28 = vpack.c.bf16 %v1304_v50, %v1300_v41  ;;  %v1393_v21 = vmul.bf16 %v1739_v4, %v1321_v7 }
 0x2f4   : > { %v1308_v60 = vpop.f32.mrf.mxu1 }
 0x2f5   : > { %v1231_v63 = vpop.f32.mrf.mxu0  ;;  %v1394_v2 = vmul.bf16 %v1741_v49, %v1322_v28 }
 0x2f6   : > { %v1310_v18 = vpop.f32.mrf.mxu1  ;;  %v1242_v55 = vpack.c.bf16 %v1231_v63, %v1227_v39 }
 0x2f7   : > { %v1233_v10 = vpop.f32.mrf.mxu0 }
 0x2f8   : > { %v1243_v43 = vpack.c.bf16 %v1233_v10, %v1229_v44  ;;  %v1312_v54 = vpop.f32.mrf.mxu1  ;;  %v1343_v0 = vmul.bf16 %v1739_v4, %v1242_v55 }
 0x2f9   : > { %v1323_v25 = vpack.c.bf16 %v1312_v54, %v1308_v60  ;;  %v1486_v60 = vpop.permute.xlu0 %1485 }
 0x2fa   : > { %v1344_v15 = vmul.bf16 %v1741_v49, %v1243_v43  ;;  %v1314_v26 = vpop.f32.mrf.mxu1 }
 0x2fb   : > { %v1324_v29 = vpack.c.bf16 %v1314_v26, %v1310_v18  ;;  %v1395_v6 = vmul.bf16 %v1739_v4, %v1323_v25 }
 0x2fc   : > { %1356 = vmatprep.subr.bf16.mxu0 %v1344_v15 }
 0x2fd   : > { %v1396_v1 = vmul.bf16 %v1741_v49, %v1324_v29  ;;  %1357 = vmatpush1.bf16.msra.mxu0 %v1343_v0 }
 0x2fe   : > { %1358 = vmatprep.subr.bf16.mxu0 %v1342_v31 }
 0x2ff   : > { %1405 = vmatprep.subr.bf16.mxu1 %v1396_v1 }
 0x300   : > { %1406 = vmatpush1.bf16.msra.mxu1 %v1395_v6 }
 0x301   : > { %1407 = vmatprep.subr.bf16.mxu1 %v1394_v2  ;;  %1359 = vmatpush1.bf16.msra.mxu0 %v1341_v12  ;;  %v1536_v12 = vld [vmem:[%s2266_s6] sm:$0xf] }
 0x302   : > { %1360 = vmatprep.subr.bf16.mxu0 %v1340_v19 }
 0x304   : > { %1408 = vmatpush1.bf16.msra.mxu1 %v1393_v21 }
 0x305   : > { %1409 = vmatprep.subr.bf16.mxu1 %v1392_v36  ;;  %1361 = vmatpush1.bf16.msra.mxu0 %v1339_v33 }
 0x306   : > { %1362 = vmatprep.subr.bf16.mxu0 %v1338_v52 }
 0x308   : > { %1410 = vmatpush1.bf16.msra.mxu1 %v1391_v53 }
 0x309   : > { %1411 = vmatprep.subr.bf16.mxu1 %v1390_v46  ;;  %1363 = vmatpush1.bf16.msra.mxu0 %v1337_v35 }
 0x30c   : > { %1412 = vmatpush1.bf16.msra.mxu1 %v1389_v51  ;;  %1703 = vmatmul.mubr.msk.bf16.vlgmr.msra.gmra.mxu0 %vm580_vm4, %v1684_v47 }
 0x30f   : > { %1704 = vmatmul.mubr.msk.bf16.vlgmr.msra.gmra.mxu1 %vm580_vm4, %v1684_v47 }
 0x3cc   : > { %v1382_v32 = vpop.f32.mrf.mxu0 }
 0x3cd   : > { %v1456_v59 = vmul.f32 %v1451_v38, %v1382_v32 }
 0x3ce   : > { %v1384_v34 = vpop.f32.mrf.mxu0 }
 0x3cf   : > { %v1458_v41 = vadd.f32 %v1456_v59, %v2186_v20  ;;  %v1457_v61 = vmul.f32 %v1455_v30, %v1384_v34  ;;  %v1431_v42 = vpop.f32.mrf.mxu1 }
 0x3d0   : > { %v1478_v57 = vmul.f32 %v1473_v13, %v1431_v42  ;;  %v1386_v39 = vpop.f32.mrf.mxu0 }
 0x3d1   : > { %v1459_v50 = vadd.f32 %v1457_v61, %v2188_v23  ;;  %v1433_v44 = vpop.f32.mrf.mxu1 }
 0x3d2   : > { %v1480_v62 = vadd.f32 %v1478_v57, %v1458_v41  ;;  %v1479_v14 = vmul.f32 %v1477_v56, %v1433_v44  ;;  %v1387_v63 = vpop.f32.mrf.mxu0 }
 0x3d3   : > { %v1435_v18 = vpop.f32.mrf.mxu1 }
 0x3d4   : > { %v1481_v55 = vadd.f32 %v1479_v14, %v1459_v50  ;;  %v1488_v10 = vadd.f32 %v1486_v60, %v1480_v62 }
 0x3d5   : > { %v1436_v49 = vpop.f32.mrf.mxu1 }
 0x3d6   : > { %v1489_v48 = vadd.f32 %v1486_v60, %v1481_v55  ;;  %v1491_v16 = vsel %vm1490_vm6, %v1488_v10, 0.0 }
 0x3d8   : > { %v1492_v20 = vsel %vm1490_vm6, %v1489_v48, 0.0 }
 0x3d9   : > { %v1493_v43 = vadd.f32 %v1492_v20, %v1491_v16 }
 0x3db   : > { %1494 = vadd.xlane.f32.xlu0 %v1493_v43 }
 0x464   : > { %v1495_v54 = vpop.xlane.xlu0 %1494 }
 0x465   : > { %v1496_v4 = vrot.slane %v1495_v54, 4 }
 0x467   : > { %v1497_v23 = vadd.f32 %v1496_v4, %v1495_v54 }
 0x469   : > { %v1498_v15 = vrot.slane %v1497_v23, 2 }
 0x46b   : > { %v1499_v25 = vadd.f32 %v1498_v15, %v1497_v23 }
 0x46d   : > { %v1500_v26 = vrot.slane %v1499_v25, 1 }
 0x46f   : > { %v1501_v27 = vadd.f32 %v1500_v26, %v1499_v25 }
 0x471   : > { %1713 = vpush %v1501_v27 }
 0x4a2   : > { %s1714_s15 = spop %1713 }
 0x4a3   : > { %v1503_v28 = vstv %s1714_s15 }
 0x4a4   : > { %v1505_v0 = vmul.f32 0.0009765625, %v1503_v28 }
 0x4a6   : > { %v1506_v29 = vsub.f32 %v1488_v10, %v1505_v0  ;;  %v1507_v37 = vsub.f32 %v1489_v48, %v1505_v0 }
 0x4a8   : > { %v1508_v31 = vmul.f32 %v1506_v29, %v1506_v29  ;;  %v1509_v1 = vmul.f32 %v1507_v37, %v1507_v37 }
 0x4aa   : > { %v1510_v7 = vsel %vm1490_vm6, %v1508_v31, 0.0  ;;  %v1511_v6 = vsel %vm1490_vm6, %v1509_v1, 0.0 }
 0x4ab   : > { %v1512_v8 = vadd.f32 %v1511_v6, %v1510_v7 }
 0x4ad   : > { %1513 = vadd.xlane.f32.xlu1 %v1512_v8 }
 0x4be   : > { %1531 = vperm.xlu1 %1728, %v1528_v5  }
 0x4c2   : > { %1539 = vperm.xlu1 %1728, %v1536_v12  }
 0x536   : > { %v1514_v2 = vpop.xlane.xlu1 %1513 }
 0x537   : > { %v1515_v17 = vrot.slane %v1514_v2, 4 }
 0x539   : > { %v1516_v19 = vadd.f32 %v1515_v17, %v1514_v2 }
 0x53a   : > { %v1532_v9 = vpop.permute.xlu1 %1531 }
 0x53b   : > { %v1517_v3 = vrot.slane %v1516_v19, 2 }
 0x53d   : > { %v1518_v21 = vadd.f32 %v1517_v3, %v1516_v19 }
 0x53e   : > { %v1540_v24 = vpop.permute.xlu1 %1539 }
 0x53f   : > { %v1519_v22 = vrot.slane %v1518_v21, 1 }
 0x541   : > { %v1520_v11 = vadd.f32 %v1519_v22, %v1518_v21 }
 0x543   : > { %1715 = vpush %v1520_v11 }
 0x574   : > { %s1716_s20 = spop %1715 }
 0x575   : > { %v1522_v33 = vstv %s1716_s20 }
 0x576   : > { %v1523_v36 = vmul.f32 0.0009765625, %v1522_v33 }
 0x578   : > { %v1524_v52 = vadd.f32 1e-05, %v1523_v36 }
 0x57a   : > { %1742 = vrsqrt.f32 %v1524_v52 }
 0x587   : > { %v1743_v53 = vpop.eup %1742 }
 0x588   : > { %v1526_v35 = vmul.f32 %v1743_v53, %v1506_v29  ;;  %v1527_v46 = vmul.f32 %v1743_v53, %v1507_v37 }
 0x58a   : > { %v1534_v47 = vmul.f32 %v1532_v9, %v1526_v35  ;;  %v1535_v51 = vmul.f32 %v1532_v9, %v1527_v46 }
 0x58c   : > { %v1542_v45 = vadd.f32 %v1540_v24, %v1534_v47  ;;  %v1543_v58 = vadd.f32 %v1540_v24, %v1535_v51 }
 0x58e   : > { %v1544_v38 = vmax.f32 %v1542_v45, 0.0  ;;  %v1545_v40 = vmax.f32 %v1543_v58, 0.0 }
 0x590   : > { %v1548_v30 = vcombine.low %v1544_v38, %v1545_v40 }
 0x592   : > { %1550 = vst [vmem:[%s278_s23] sm:$0xff] %v1548_v30 }
 0x593 PF: > { %s17_s24 = sadd.s32 1, %s1750_s24  }
 0x594   : > { %p14_p4 = scmp.ge.s32.totalorder %s17_s24, 4  }
 0x596   :  { %16 = sbr.rel (!%p14_p4) target bundleno = 1 (0x1), region = 80 }

// kernel: dsc3block_forward.7
= control target key start
LH: loop header
LB: loop body
LE: loop exit
PB: predicated region body
PF: predicated region fallthrough
CT: control target
= control target key end

     0   :  { %s770_s15 = smov 0   ;;  %s772_s16 = smov 0   ;;  %s870_s0 = inlined_call_operand.vmem [shape: bf16[4,108], index: 0, kind: input, shape index: {}]   ;;  %s871_s1 = inlined_call_operand.vmem [shape: bf16[2,108,256], index: 1, kind: input, shape index: {}]   ;;  %s872_s2 = inlined_call_operand.vmem [shape: f32[2,4,256], index: 2, kind: input, shape index: {}]   ;;  %s873_s3 = inlined_call_operand.vmem [shape: f32[4,1], index: 3, kind: input, shape index: {}]   ;;  %s874_s4 = inlined_call_operand.vmem [shape: f32[2,4,256], index: 4, kind: output, shape index: {}]  }
   0x1   :  { %s774_s17 = smov 0   ;;  %s776_s18 = smov 0  }
   0x2   :  { %s778_s19 = smov 0   ;;  %s780_s20 = smov 0  }
   0x3   :  { %s782_s21 = smov 0  }
   0x4 LB: > { %s23_s22 = sadd.s32 1, %s732_s19  ;;  %s26_s23 = sadd.s32 1, %s736_s20  ;;  %s740_s21 = sphi %s782_s21, %s14_s21   ;;  %s736_s20 = sphi %s780_s20, %s880_s20   ;;  %s732_s19 = sphi %s778_s19, %s879_s19   ;;  %s728_s18 = sphi %s776_s18, %s878_s18   ;;  %s724_s17 = sphi %s774_s17, %s877_s17   ;;  %s720_s16 = sphi %s772_s16, %s876_s16   ;;  %s716_s15 = sphi %s770_s15, %s875_s15  }
   0x5   : > { %p24_p0 = scmp.ge.s32.totalorder %s23_s22, 2  ;;  %p63_p1 = scmp.ne.s32.totalorder %s720_s16, %s716_s15 }
   0x6   : > { %p64_p2 = scmp.eq.s32.totalorder %s740_s21, 0  ;;  %s56_s27 = sadd.s32 1, %s720_s16 }
   0x7   : > { %s882_s22 = smov (%p24_p0, %s23_s22), 0  ;;  %s884_s23 = smov (!%p24_p0, %s26_s23), %s736_s20 }
   0x8   : > { %p65_p3 = por %p64_p2, %p63_p1  ;;  %p28_p4 = scmp.ge.s32.totalorder %s884_s23, 2 }
   0x9   : > { %s52_s24 = ssub.s32 %s732_s19, %s882_s22  ;;  %p573_p6 = scmp.ge.s32.totalorder %s740_s21, 4 }
   0xa   : > { %s886_s23 = smov (%p28_p4, %s884_s23), 0 }
   0xb   : > { %s51_s25 = ssub.s32 %s736_s20, %s886_s23  ;;  %172 = sbr.rel (%p573_p6) target bundleno = 32 (0x20), region = 24 }
   0xc   : > { %s53_s26 = sor.u32 %s52_s24, %s51_s25 }
   0xd   : > { %p54_p5 = scmp.eq.s32.totalorder %s53_s26, 0 }
   0xf   : > { %s821_s28 = scalar_select %p54_p5, %s720_s16, %s56_s27  }
  0x10   : > { %175 = sbr.rel (!%p65_p3) target bundleno = 32 (0x20), region = 28  ;;  %s177_s29 = sand.u32 (%p65_p3), 1, %s720_s16  }
  0x11   : > { %s617_s30 = smul.u32 (%p65_p3), 28, %s736_s20 }
  0x12   : > { %s616_s5 = smul.u32 (%p65_p3), 56, %s177_s29 }
  0x13   : > { %s181_s6 = sadd.s32 (%p65_p3), %s732_s19, %s617_s30 }
  0x14   : > { %s574_s7 = sshll.u32 (%p65_p3), %s181_s6, 2  ;;  %s179_s11 = scalar_lea.vmem (%p65_p3), [#allocation2], %s616_s5 }
  0x15   : > { %s183_s10 = scalar_lea.vmem %s871_s1, %s574_s7 }
  0x16   : > { %v200_v0 = vld [vmem:[%s183_s10] sm:$0xf]  ;;  %v202_v1 = vld [vmem:[%s183_s10 + $0x8] sm:$0xf]  ;;  %v204_v2 = vld [vmem:[%s183_s10 + $0x10] sm:$0xf] }
  0x17   : > { %201 = vst [vmem:[%s179_s11] sm:$0xf] %v200_v0  ;;  %203 = vst [vmem:[%s179_s11 + $0x4] sm:$0xf] %v202_v1  ;;  %v206_v3 = vld [vmem:[%s183_s10 + $0x18] sm:$0xf] }
  0x18   : > { %205 = vst [vmem:[%s179_s11 + $0x8] sm:$0xf] %v204_v2  ;;  %v208_v4 = vld [vmem:[%s183_s10 + $0x20] sm:$0xf]  ;;  %v210_v5 = vld [vmem:[%s183_s10 + $0x28] sm:$0xf] }
  0x19   : > { %207 = vst [vmem:[%s179_s11 + $0xc] sm:$0xf] %v206_v3  ;;  %209 = vst [vmem:[%s179_s11 + $0x10] sm:$0xf] %v208_v4  ;;  %v212_v6 = vld [vmem:[%s183_s10 + $0x30] sm:$0xf] }
  0x1a   : > { %211 = vst [vmem:[%s179_s11 + $0x14] sm:$0xf] %v210_v5  ;;  %v214_v7 = vld [vmem:[%s183_s10 + $0x38] sm:$0xf]  ;;  %v216_v8 = vld [vmem:[%s183_s10 + $0x40] sm:$0xf] }
  0x1b   : > { %213 = vst [vmem:[%s179_s11 + $0x18] sm:$0xf] %v212_v6  ;;  %215 = vst [vmem:[%s179_s11 + $0x1c] sm:$0xf] %v214_v7  ;;  %v218_v9 = vld [vmem:[%s183_s10 + $0x48] sm:$0xf] }
  0x1c   : > { %217 = vst [vmem:[%s179_s11 + $0x20] sm:$0xf] %v216_v8  ;;  %v220_v10 = vld [vmem:[%s183_s10 + $0x50] sm:$0xf]  ;;  %v222_v11 = vld [vmem:[%s183_s10 + $0x58] sm:$0xf] }
  0x1d   : > { %219 = vst [vmem:[%s179_s11 + $0x24] sm:$0xf] %v218_v9  ;;  %221 = vst [vmem:[%s179_s11 + $0x28] sm:$0xf] %v220_v10  ;;  %v224_v12 = vld [vmem:[%s183_s10 + $0x60] sm:$0xf] }
  0x1e   : > { %223 = vst [vmem:[%s179_s11 + $0x2c] sm:$0xf] %v222_v11  ;;  %v226_v13 = vld [vmem:[%s183_s10 + $0x68] sm:$0xf]  ;;  %225 = vst [vmem:[%s179_s11 + $0x30] sm:$0xf] %v224_v12 }
  0x1f   : > { %227 = vst [vmem:[%s179_s11 + $0x34] sm:$0xf] %v226_v13 }
  0x20 PF: > { %p575_p7 = scmp.ge.s32.totalorder %s740_s21, 1  ;;  %p289_p8 = scmp.lt.s32.totalorder %s740_s21, 5 }
  0x22   : > { %p290_p9 = pnand %p575_p7, %p289_p8 }
  0x23   : > { %s296_s12 = sand.u32 (!%p290_p9), 1, %s716_s15   ;;  %p332_p10 = scmp.lt.s32.totalorder (!%p290_p9), %s728_s18, 1 }
  0x24   : > { %293 = sbr.rel (%p290_p9) target bundleno = 271 (0x10f), region = 73  ;;  %p334_p11 = scmp.lt.s32.totalorder (!%p290_p9), %s724_s17, 1 }
  0x25   : > { %s618_s13 = smul.u32 (!%p290_p9), 56, %s296_s12 }
  0x27   : > { %s298_s25 = scalar_lea.vmem (!%p290_p9), [#allocation2], %s618_s13 }
  0x29   : > { %v742_v14 = vmov 0.0   ;;  %vm743_vm0 = vmmov 0   ;;  %v454_v15 = vld [vmem:[%s873_s3] sm:$0xf]  ;;  %v744_v16 = vmov 0   ;;  %vm409_vm1 = vcmask 1045504  }
  0x2a   : > { %598 = vmatprep.subr.bf16.mxu0 %v742_v14  ;;  %612 = vmatprep.mubr.msk.bf16.mxu0 %vm743_vm0, %v742_v14  ;;  %v679_v17 = vld [vmem:[%s298_s25 + $0x30] sm:$0x3f]   ;;  %v680_v19 = vld [vmem:[%s298_s25 + $0x28] sm:$0xff]   ;;  %v681_v20 = vld [vmem:[%s298_s25 + $0x20] sm:$0xff]   ;;  %vm405_vm2 = vcmask 883712   ;;  %s888_s18 = smov (!%p332_p10, %s728_s18), 1 }
  0x2b   : > { %678 = vset.pattern.permute.xlu0 %v744_v16  ;;  %v411_v18 = vsel %vm409_vm1, %v679_v17, 0  ;;  %v682_v21 = vld [vmem:[%s298_s25 + $0x18] sm:$0xff]   ;;  %v683_v22 = vld [vmem:[%s298_s25 + $0x10] sm:$0xff]   ;;  %v684_v23 = vld [vmem:[%s298_s25 + $0x8] sm:$0xff]   ;;  %s890_s17 = smov (!%p334_p11, %s724_s17), 1  ;;  %s576_s27 = sshll.u32 %s888_s18, 1 }
  0x2c   : > { %457 = vperm.xlu0 %678, %v454_v15   ;;  %599 = vmatpush3.bf16.msra.mxu0 %v411_v18  ;;  %v685_v24 = vld [vmem:[%s298_s25] sm:$0xff]   ;;  %s337_s29 = sadd.s32 %s576_s27, %s890_s17 }
  0x2d   : > { %600 = vmatprep.subr.bf16.mxu0 %v742_v14  ;;  %v349_v25 = vld [vmem:[%s870_s0] sm:$0x3]  ;;  %s577_s30 = sshll.u32 %s337_s29, 2 }
  0x2e   : > { %s339_s7 = scalar_lea.vmem %s872_s2, %s577_s30  ;;  %s347_s10 = scalar_lea.vmem %s874_s4, %s577_s30 }
  0x2f   : > { %v461_v29 = vld [vmem:[%s339_s7] sm:$0xf] }
  0x30   : > { %601 = vmatpush3.bf16.msra.mxu0 %v680_v19 }
  0x31   : > { %602 = vmatprep.subr.bf16.mxu0 %v742_v14 }
  0x34   : > { %603 = vmatpush3.bf16.msra.mxu0 %v681_v20 }
  0x35   : > { %604 = vmatprep.subr.bf16.mxu0 %v742_v14 }
  0x38   : > { %605 = vmatpush3.bf16.msra.mxu0 %v682_v21 }
  0x39   : > { %606 = vmatprep.subr.bf16.mxu0 %v742_v14 }
  0x3c   : > { %607 = vmatpush3.bf16.msra.mxu0 %v683_v22 }
  0x3d   : > { %608 = vmatprep.subr.bf16.mxu0 %v742_v14 }
  0x40   : > { %609 = vmatpush3.bf16.msra.mxu0 %v684_v23 }
  0x41   : > { %610 = vmatprep.subr.bf16.mxu0 %v742_v14 }
  0x44   : > { %611 = vmatpush3.bf16.msra.mxu0 %v685_v24 }
  0x47   : > { %613 = vmatmul.mubr.msk.bf16.vlgmr.msra.gmra.mxu0 %vm405_vm2, %v349_v25 }
  0xa7   : > { %v458_v27 = vpop.permute.xlu0 %457 }
 0x107   : > { %v447_v26 = vpop.f32.mrf.mxu0 }
 0x108   : > { %v453_v28 = vmax.f32 %v447_v26, 0.0 }
 0x109   : > { %v614_v30 = vpop.f32.mrf.mxu0 }
 0x10a   : > { %v460_v31 = vmul.f32 %v458_v27, %v453_v28 }
 0x10b   : > { %v450_v32 = vpop.f32.mrf.mxu0 }
 0x10c   : > { %v462_v33 = vadd.f32 %v461_v29, %v460_v31 }
 0x10d   : > { %v615_v34 = vpop.f32.mrf.mxu0 }
 0x10e   : > { %463 = vst [vmem:[%s347_s10] sm:$0xf] %v462_v33 }
 0x10f PF: > { %s14_s21 = sadd.s32 1, %s740_s21   ;;  %s875_s15 = smov %s720_s16 }
 0x110   : > { %p11_p12 = scmp.ge.s32.totalorder %s14_s21, 6   ;;  %s876_s16 = smov %s821_s28 }
 0x111   : > { %s877_s17 = smov %s732_s19  ;;  %s878_s18 = smov %s736_s20 }
 0x112   : > { %s879_s19 = smov %s882_s22  ;;  %s880_s20 = smov %s886_s23 }
 0x113   :  { %13 = sbr.rel (!%p11_p12) target bundleno = 4 (0x4), region = 115 }

</bundles_post_ra>
